<compile_context>
chip_gen: v7x
topology: tpu7x:2x2x1
jax: 0.10.0
libtpu: 0.0.40
codegen_flags: <defaults>
</compile_context>

<pallas_src>
import functools

import jax
import jax.numpy as jnp
import numpy as np
from jax.experimental import pallas as pl
from jax.experimental.pallas import tpu as pltpu


def _attention_kernel(x_ref, wfold_ref, sel_ref, selt_ref, lvm_ref, wp_ref, bp_ref,
                      o_ref, *, num_heads):
    H = num_heads
    x = x_ref[0]                                # (N, C)
    N = x.shape[0]

    # ---- single folded projection (MXU): (N, C) @ (C, H+2) ----
    #   cols [0:H]  -> s[i,h]  = q_sum[i,h] * lk_sum[h] * qk_scale
    #   col  [H]    -> k_sum[i]       col [H+1] -> v_sum[i]
    skv = jnp.dot(x, wfold_ref[...], preferred_element_type=jnp.float32)   # (N, H+2)
    s = skv[:, :H]                              # (N, H)
    k_col = skv[:, H:H + 1]                     # (N, 1)
    v_col = skv[:, H + 1:H + 2]                 # (N, 1)

    # Move k_sum from sublanes to lanes (softmax axis) via a diag-masked sum;
    # simple, robust lowering (one small cross-sublane reduce per grid step).
    row_i = jax.lax.broadcasted_iota(jnp.int32, (N, N), 0)
    col_i = jax.lax.broadcasted_iota(jnp.int32, (N, N), 1)
    k_row = jnp.sum(jnp.where(row_i == col_i, k_col, 0.0),
                    axis=0, keepdims=True)      # (1, N)

    # Rank-1 row-max of the logits: max_j s*k_j = s*k_max if s>=0 else s*k_min.
    k_max = jnp.max(k_col, axis=0, keepdims=True)   # (1, 1)
    k_min = jnp.min(k_col, axis=0, keepdims=True)   # (1, 1)

    # ---- all heads at once, lane-dense (N, H*N) ----
    # s_exp[i, h*N + j] = s[i, h]   (MXU matmul with a constant 0/1 selector)
    s_exp = jnp.dot(s, sel_ref[...], preferred_element_type=jnp.float32)   # (N, H*N)
    k_tile = jnp.concatenate([k_row] * H, axis=1)                          # (1, H*N)
    # logits - rowmax for every head/row, then exp on the EUP; values in (0, 1]
    arg = s_exp * (k_tile - jnp.where(s_exp >= 0, k_max, k_min))           # (N, H*N)
    e = jnp.exp(arg)

    # Softmax numerator & denominator for every head in ONE matmul:
    #   nd[i, h]     = sum_j e[i, h*N+j] * v_sum[j]
    #   nd[i, H + h] = sum_j e[i, h*N+j]
    v_tile = jnp.concatenate([v_col] * H, axis=0)                          # (H*N, 1)
    r = jnp.concatenate([selt_ref[...] * v_tile, selt_ref[...]], axis=1)   # (H*N, 2H)
    nd = jnp.dot(e, r, preferred_element_type=jnp.float32)                 # (N, 2H)
    # Deferred normalization on the EUP (attn_drop(p=0) is identity).
    w = nd[:, :H] * pl.reciprocal(nd[:, H:], approx=True)                  # (N, H)

    # y[i, h*hd + c] = w[i, h] * v_learnable[h*hd + c]  -> one tiny MXU matmul,
    # then the (c d)-permuted projection + bias (proj_drop(p=0) is identity).
    y = jnp.dot(w, lvm_ref[...], preferred_element_type=jnp.float32)       # (N, C)
    out = jnp.dot(y, wp_ref[...], preferred_element_type=jnp.float32) + bp_ref[...]
    o_ref[0] = out.astype(o_ref.dtype)


def attention_forward(x, params, num_heads, qk_scale):
    """Pallas forward. x: (B, N, C) float32, sr_ratio=1 / linear=False path."""
    B, N, C = x.shape
    H = num_heads
    hd = C // H

    wq_t = params['wq'].T              # (C, C)
    wkv_t = params['wkv'].T            # (C, 2C)
    wp_t = params['wproj'].T           # (C, C)

    # ---- host-side algebraic folding (no in-kernel q/kv matmuls needed) ----
    # q is only consumed through per-head channel sums; kv only through the
    # even(k)/odd(v) column sums.  Exact reshape+sum (no host matmul).
    a = wq_t.reshape(C, H, hd).sum(axis=-1)                        # (C, H)
    lk_sum = params['k_learnable'].reshape(H, hd).sum(axis=-1)     # (H,)
    a_scaled = a * (lk_sum * qk_scale)[None, :]                    # (C, H)
    b_kv = wkv_t.reshape(C, C, 2).sum(axis=1)                      # (C, 2) even/odd sums
    w_fold = jnp.concatenate([a_scaled, b_kv], axis=1)             # (C, H+2)

    # Constant head-block selectors for the vectorized softmax (0/1 matrices).
    sel = ((np.arange(H * N)[None, :] // N) == np.arange(H)[:, None]).astype(np.float32)   # (H, H*N)
    selt = np.ascontiguousarray(sel.T)                                                      # (H*N, H)

    # Head-masked v_learnable so that y = w @ lvm.
    head_mask = ((np.arange(C)[None, :] // hd) == np.arange(H)[:, None]).astype(np.float32)  # (H, C)
    lvm = jnp.asarray(head_mask) * params['v_learnable'][None, :]  # (H, C)

    # Fold the 'b d n c -> b n (c d)' flatten into a row permutation of Wproj^T:
    # kernel produces columns ordered d-major (d*hd + c); torch uses c*H + d.
    idx = np.arange(C)
    perm = (idx % hd) * H + (idx // hd)
    wp_perm = wp_t[perm, :]                                        # (C, C)
    bp = params['bproj'].reshape(1, C)

    kernel = functools.partial(_attention_kernel, num_heads=H)

    def rep(shape):
        return pl.BlockSpec(shape, lambda b: (0,) * len(shape))

    # NOTE: on v5e/v6e (single TensorCore) merging both batches into one grid
    # step would shave ~0.35us/step of grid overhead; grid=(B,)+"parallel" is
    # kept so v7x's second TensorCore takes the other batch.
    return pl.pallas_call(
        kernel,
        out_shape=jax.ShapeDtypeStruct((B, N, C), x.dtype),
        grid=(B,),
        in_specs=[
            pl.BlockSpec((1, N, C), lambda b: (b, 0, 0)),   # x
            rep((C, H + 2)),        # folded [s | k | v] projection
            rep((H, H * N)),        # head expansion selector
            rep((H * N, H)),        # its transpose (head reduction selector)
            rep((H, C)),            # head-masked v_learnable
            rep((C, C)),            # permuted Wproj^T
            rep((1, C)),            # proj bias
        ],
        out_specs=pl.BlockSpec((1, N, C), lambda b: (b, 0, 0)),
        compiler_params=pltpu.CompilerParams(dimension_semantics=("parallel",)),
    )(x, w_fold, jnp.asarray(sel), jnp.asarray(selt), lvm, wp_perm, bp)


def attention_reference(x, params, num_heads, qk_scale):
    """Pure-JAX transliteration of the PyTorch forward (sr_ratio=1, linear=False)."""
    B, N, C = x.shape
    H = num_heads
    hd = C // H
    q = x @ params['wq'].T
    kv = x @ params['wkv'].T
    qv = q.reshape(B, N, H, hd).transpose(0, 2, 1, 3)             # b d n c
    kvr = kv.reshape(B, N, H, hd, 2)                              # B N (d c qk)
    k = kvr[..., 0].transpose(0, 2, 1, 3)                         # b d n c
    v = kvr[..., 1].transpose(0, 2, 1, 3)
    l_k = jnp.broadcast_to(params['k_learnable'], (B, C)).reshape(B, H, hd)
    l_v = jnp.broadcast_to(params['v_learnable'], (B, C)).reshape(B, H, hd)
    k = k.transpose(0, 2, 1, 3)                                   # b n h c
    v = v.transpose(0, 2, 1, 3)
    k = jnp.einsum('bnhc,bpq->bpnq', k, l_k)
    v = jnp.einsum('bnhc,bpq->bpnq', v, l_v)
    attn = jnp.einsum('bijl,bikm->bijk', qv, k) * qk_scale
    attn = jax.nn.softmax(attn, axis=-1)
    attn = jnp.einsum('bdln,bdnj->bdlj', attn, v)
    y = attn.transpose(0, 2, 3, 1).reshape(B, N, C)               # b n (c d)
    return y @ params['wproj'].T + params['bproj']


if __name__ == "__main__":
    B, C = 2, 32
    H_img, W_img = 8, 8
    num_heads = 8
    N = H_img * W_img
    head_dim = C // num_heads
    qk_scale = head_dim ** (-0.5)

    key = jax.random.PRNGKey(0)
    ks = jax.random.split(key, 6)
    x = jax.random.normal(ks[0], (B, N, C), jnp.float32)
    params = {
        # nn.Linear weights are (out_features, in_features); trunc_normal(std=0.02)
        'wq': jax.random.normal(ks[1], (C, C), jnp.float32) * 0.02,
        'wkv': jax.random.normal(ks[2], (2 * C, C), jnp.float32) * 0.02,
        'wproj': jax.random.normal(ks[3], (C, C), jnp.float32) * 0.02,
        'bproj': jnp.zeros((C,), jnp.float32),               # init: constant 0
        'k_learnable': jax.random.normal(ks[4], (C,), jnp.float32),
        'v_learnable': jax.random.normal(ks[5], (C,), jnp.float32),
    }

    with jax.default_matmul_precision('highest'):
        out = attention_forward(x, params, num_heads, qk_scale)
        out = jax.block_until_ready(out)
        ref = attention_reference(x, params, num_heads, qk_scale)

    np.testing.assert_allclose(np.asarray(out), np.asarray(ref), rtol=1e-2, atol=1e-3)
    print("KERNEL_OK")
</pallas_src>

<mosaic_0001>
module attributes {stable_mosaic.version = 11 : i64} {
  func.func @_attention_kernel(%arg0: i32, %arg1: memref<1x64x32xf32, #tpu.memory_space<vmem>>, %arg2: memref<32x10xf32, #tpu.memory_space<vmem>>, %arg3: memref<8x512xf32, #tpu.memory_space<vmem>>, %arg4: memref<512x8xf32, #tpu.memory_space<vmem>>, %arg5: memref<8x32xf32, #tpu.memory_space<vmem>>, %arg6: memref<32x32xf32, #tpu.memory_space<vmem>>, %arg7: memref<1x32xf32, #tpu.memory_space<vmem>>, %arg8: memref<1x64x32xf32, #tpu.memory_space<vmem>>) attributes {dimension_semantics = [#tpu.dimension_semantics<parallel>], iteration_bounds = array<i64: 2>, scalar_prefetch = 0 : i64, scratch_operands = 0 : i64, tpu.core_type = #tpu.core_type<tc>, window_params = [{transform_indices = @transform_0, window_bounds = array<i64: 1, 64, 32>}, {pipeline_mode = #tpu.pipeline_mode<synchronous>, transform_indices = @transform_1, window_bounds = array<i64: 32, 10>}, {pipeline_mode = #tpu.pipeline_mode<synchronous>, transform_indices = @transform_2, window_bounds = array<i64: 8, 512>}, {pipeline_mode = #tpu.pipeline_mode<synchronous>, transform_indices = @transform_3, window_bounds = array<i64: 512, 8>}, {pipeline_mode = #tpu.pipeline_mode<synchronous>, transform_indices = @transform_4, window_bounds = array<i64: 8, 32>}, {pipeline_mode = #tpu.pipeline_mode<synchronous>, transform_indices = @transform_5, window_bounds = array<i64: 32, 32>}, {pipeline_mode = #tpu.pipeline_mode<synchronous>, transform_indices = @transform_6, window_bounds = array<i64: 1, 32>}, {transform_indices = @transform_7, window_bounds = array<i64: 1, 64, 32>}]} {
    %c0 = arith.constant 0 : index
    %c0_0 = arith.constant 0 : index
    %c0_1 = arith.constant 0 : index
    %0 = vector.load %arg1[%c0, %c0_0, %c0_1] : memref<1x64x32xf32, #tpu.memory_space<vmem>>, vector<1x64x32xf32>
    %1 = vector.shape_cast %0 : vector<1x64x32xf32> to vector<64x32xf32>
    %c0_2 = arith.constant 0 : index
    %c0_3 = arith.constant 0 : index
    %2 = vector.load %arg2[%c0_2, %c0_3] : memref<32x10xf32, #tpu.memory_space<vmem>>, vector<32x10xf32>
    %cst = arith.constant dense<0.000000e+00> : vector<64x10xf32>
    %3 = tpu.matmul %1, %2, %cst {dimension_numbers = #tpu.dot_dimension_numbers<[1], [0], [0], [1], [0, 0, 1, 1], [], []>, precision = #tpu.contract_precision<fp32>} : vector<64x32xf32>, vector<32x10xf32>, vector<64x10xf32> -> vector<64x10xf32>
    %4 = vector.extract_strided_slice %3 {offsets = [0, 0], sizes = [64, 8], strides = [1, 1]} : vector<64x10xf32> to vector<64x8xf32>
    %5 = vector.extract_strided_slice %3 {offsets = [0, 8], sizes = [64, 1], strides = [1, 1]} : vector<64x10xf32> to vector<64x1xf32>
    %6 = vector.extract_strided_slice %3 {offsets = [0, 9], sizes = [64, 1], strides = [1, 1]} : vector<64x10xf32> to vector<64x1xf32>
    %7 = tpu.iota {dimensions = array<i32: 0>} : vector<64x64xi32>
    %8 = tpu.iota {dimensions = array<i32: 1>} : vector<64x64xi32>
    %9 = arith.cmpi eq, %7, %8 : vector<64x64xi32>
    %cst_4 = arith.constant 0.000000e+00 : f32
    %10 = vector.shape_cast %5 : vector<64x1xf32> to vector<64x1xf32>
    %11 = vector.broadcast %10 : vector<64x1xf32> to vector<64x64xf32>
    %12 = vector.broadcast %cst_4 : f32 to vector<64x64xf32>
    %13 = arith.select %9, %11, %12 : vector<64x64xi1>, vector<64x64xf32>
    %cst_5 = arith.constant dense<0.000000e+00> : vector<64xf32>
    %14 = vector.multi_reduction <add>, %13, %cst_5 [0] : vector<64x64xf32> to vector<64xf32>
    %15 = vector.shape_cast %14 : vector<64xf32> to vector<1x64xf32>
    %cst_6 = arith.constant dense<0xFF800000> : vector<1xf32>
    %16 = vector.multi_reduction <maximumf>, %5, %cst_6 [0] : vector<64x1xf32> to vector<1xf32>
    %17 = vector.shape_cast %16 : vector<1xf32> to vector<1x1xf32>
    %cst_7 = arith.constant dense<0x7F800000> : vector<1xf32>
    %18 = vector.multi_reduction <minimumf>, %5, %cst_7 [0] : vector<64x1xf32> to vector<1xf32>
    %19 = vector.shape_cast %18 : vector<1xf32> to vector<1x1xf32>
    %c0_8 = arith.constant 0 : index
    %c0_9 = arith.constant 0 : index
    %20 = vector.load %arg3[%c0_8, %c0_9] : memref<8x512xf32, #tpu.memory_space<vmem>>, vector<8x512xf32>
    %cst_10 = arith.constant dense<0.000000e+00> : vector<64x512xf32>
    %21 = tpu.matmul %4, %20, %cst_10 {dimension_numbers = #tpu.dot_dimension_numbers<[1], [0], [0], [1], [0, 0, 1, 1], [], []>, precision = #tpu.contract_precision<fp32>} : vector<64x8xf32>, vector<8x512xf32>, vector<64x512xf32> -> vector<64x512xf32>
    %22 = tpu.concatenate %15, %15, %15, %15, %15, %15, %15, %15 in 1 : vector<1x64xf32>, vector<1x64xf32>, vector<1x64xf32>, vector<1x64xf32>, vector<1x64xf32>, vector<1x64xf32>, vector<1x64xf32>, vector<1x64xf32> -> vector<1x512xf32>
    %cst_11 = arith.constant 0.000000e+00 : f32
    %23 = vector.broadcast %cst_11 : f32 to vector<64x512xf32>
    %24 = arith.cmpf oge, %21, %23 : vector<64x512xf32>
    %25 = vector.shape_cast %17 : vector<1x1xf32> to vector<1x1xf32>
    %26 = vector.broadcast %25 : vector<1x1xf32> to vector<64x512xf32>
    %27 = vector.shape_cast %19 : vector<1x1xf32> to vector<1x1xf32>
    %28 = vector.broadcast %27 : vector<1x1xf32> to vector<64x512xf32>
    %29 = arith.select %24, %26, %28 : vector<64x512xi1>, vector<64x512xf32>
    %30 = vector.broadcast %22 : vector<1x512xf32> to vector<64x512xf32>
    %31 = arith.subf %30, %29 : vector<64x512xf32>
    %32 = arith.mulf %21, %31 : vector<64x512xf32>
    %33 = math.exp %32 : vector<64x512xf32>
    %34 = tpu.concatenate %6, %6, %6, %6, %6, %6, %6, %6 in 0 : vector<64x1xf32>, vector<64x1xf32>, vector<64x1xf32>, vector<64x1xf32>, vector<64x1xf32>, vector<64x1xf32>, vector<64x1xf32>, vector<64x1xf32> -> vector<512x1xf32>
    %c0_12 = arith.constant 0 : index
    %c0_13 = arith.constant 0 : index
    %35 = vector.load %arg4[%c0_12, %c0_13] : memref<512x8xf32, #tpu.memory_space<vmem>>, vector<512x8xf32>
    %36 = vector.broadcast %34 : vector<512x1xf32> to vector<512x8xf32>
    %37 = arith.mulf %35, %36 : vector<512x8xf32>
    %c0_14 = arith.constant 0 : index
    %c0_15 = arith.constant 0 : index
    %38 = vector.load %arg4[%c0_14, %c0_15] : memref<512x8xf32, #tpu.memory_space<vmem>>, vector<512x8xf32>
    %39 = tpu.concatenate %37, %38 in 1 : vector<512x8xf32>, vector<512x8xf32> -> vector<512x16xf32>
    %cst_16 = arith.constant dense<0.000000e+00> : vector<64x16xf32>
    %40 = tpu.matmul %33, %39, %cst_16 {dimension_numbers = #tpu.dot_dimension_numbers<[1], [0], [0], [1], [0, 0, 1, 1], [], []>, precision = #tpu.contract_precision<fp32>} : vector<64x512xf32>, vector<512x16xf32>, vector<64x16xf32> -> vector<64x16xf32>
    %41 = vector.extract_strided_slice %40 {offsets = [0, 0], sizes = [64, 8], strides = [1, 1]} : vector<64x16xf32> to vector<64x8xf32>
    %42 = vector.extract_strided_slice %40 {offsets = [0, 8], sizes = [64, 8], strides = [1, 1]} : vector<64x16xf32> to vector<64x8xf32>
    %43 = tpu.reciprocal %42 {approx = true} : vector<64x8xf32> -> vector<64x8xf32>
    %44 = arith.mulf %41, %43 : vector<64x8xf32>
    %c0_17 = arith.constant 0 : index
    %c0_18 = arith.constant 0 : index
    %45 = vector.load %arg5[%c0_17, %c0_18] : memref<8x32xf32, #tpu.memory_space<vmem>>, vector<8x32xf32>
    %cst_19 = arith.constant dense<0.000000e+00> : vector<64x32xf32>
    %46 = tpu.matmul %44, %45, %cst_19 {dimension_numbers = #tpu.dot_dimension_numbers<[1], [0], [0], [1], [0, 0, 1, 1], [], []>, precision = #tpu.contract_precision<fp32>} : vector<64x8xf32>, vector<8x32xf32>, vector<64x32xf32> -> vector<64x32xf32>
    %c0_20 = arith.constant 0 : index
    %c0_21 = arith.constant 0 : index
    %47 = vector.load %arg6[%c0_20, %c0_21] : memref<32x32xf32, #tpu.memory_space<vmem>>, vector<32x32xf32>
    %cst_22 = arith.constant dense<0.000000e+00> : vector<64x32xf32>
    %48 = tpu.matmul %46, %47, %cst_22 {dimension_numbers = #tpu.dot_dimension_numbers<[1], [0], [0], [1], [0, 0, 1, 1], [], []>, precision = #tpu.contract_precision<fp32>} : vector<64x32xf32>, vector<32x32xf32>, vector<64x32xf32> -> vector<64x32xf32>
    %c0_23 = arith.constant 0 : index
    %c0_24 = arith.constant 0 : index
    %49 = vector.load %arg7[%c0_23, %c0_24] : memref<1x32xf32, #tpu.memory_space<vmem>>, vector<1x32xf32>
    %50 = vector.broadcast %49 : vector<1x32xf32> to vector<64x32xf32>
    %51 = arith.addf %48, %50 : vector<64x32xf32>
    %c0_25 = arith.constant 0 : index
    %c0_26 = arith.constant 0 : index
    %c0_27 = arith.constant 0 : index
    %52 = vector.load %arg8[%c0_25, %c0_26, %c0_27] : memref<1x64x32xf32, #tpu.memory_space<vmem>>, vector<1x64x32xf32>
    %53 = vector.shape_cast %52 : vector<1x64x32xf32> to vector<64x32xf32>
    %54 = vector.shape_cast %51 : vector<64x32xf32> to vector<1x64x32xf32>
    tpu.vector_store %arg8[%c0_25, %c0_26, %c0_27], %54 {strides = array<i32>} : memref<1x64x32xf32, #tpu.memory_space<vmem>>, vector<1x64x32xf32>,
    return
  }
  func.func @transform_0(%arg0: i32) -> (i32, i32, i32) {
    %c0_i32 = arith.constant 0 : i32
    %c0_i32_0 = arith.constant 0 : i32
    %c0_i32_1 = arith.constant 0 : i32
    return %arg0, %c0_i32, %c0_i32_0 : i32, i32, i32
  }
  func.func @transform_1(%arg0: i32) -> (i32, i32) {
    %c0_i32 = arith.constant 0 : i32
    %c0_i32_0 = arith.constant 0 : i32
    %c0_i32_1 = arith.constant 0 : i32
    return %c0_i32, %c0_i32_0 : i32, i32
  }
  func.func @transform_2(%arg0: i32) -> (i32, i32) {
    %c0_i32 = arith.constant 0 : i32
    %c0_i32_0 = arith.constant 0 : i32
    %c0_i32_1 = arith.constant 0 : i32
    return %c0_i32, %c0_i32_0 : i32, i32
  }
  func.func @transform_3(%arg0: i32) -> (i32, i32) {
    %c0_i32 = arith.constant 0 : i32
    %c0_i32_0 = arith.constant 0 : i32
    %c0_i32_1 = arith.constant 0 : i32
    return %c0_i32, %c0_i32_0 : i32, i32
  }
  func.func @transform_4(%arg0: i32) -> (i32, i32) {
    %c0_i32 = arith.constant 0 : i32
    %c0_i32_0 = arith.constant 0 : i32
    %c0_i32_1 = arith.constant 0 : i32
    return %c0_i32, %c0_i32_0 : i32, i32
  }
  func.func @transform_5(%arg0: i32) -> (i32, i32) {
    %c0_i32 = arith.constant 0 : i32
    %c0_i32_0 = arith.constant 0 : i32
    %c0_i32_1 = arith.constant 0 : i32
    return %c0_i32, %c0_i32_0 : i32, i32
  }
  func.func @transform_6(%arg0: i32) -> (i32, i32) {
    %c0_i32 = arith.constant 0 : i32
    %c0_i32_0 = arith.constant 0 : i32
    %c0_i32_1 = arith.constant 0 : i32
    return %c0_i32, %c0_i32_0 : i32, i32
  }
  func.func @transform_7(%arg0: i32) -> (i32, i32, i32) {
    %c0_i32 = arith.constant 0 : i32
    %c0_i32_0 = arith.constant 0 : i32
    %c0_i32_1 = arith.constant 0 : i32
    return %arg0, %c0_i32, %c0_i32_0 : i32, i32, i32
  }
}

</mosaic_0001>

<bundles_post_ra>
// kernel: tpu_custom_call.1
= control target key start
LH: loop header
LB: loop body
LE: loop exit
PB: predicated region body
PF: predicated region fallthrough
CT: control target
= control target key end

     0   :  { %s9915_s24 = smov 0   ;;  %s13587_s0 = inlined_call_operand.vmem [shape: f32[2,64,32], index: 0, kind: input, shape index: {}]   ;;  %s13588_s1 = inlined_call_operand.vmem [shape: f32[32,10], index: 1, kind: input, shape index: {}]   ;;  %s13589_s2 = inlined_call_operand.vmem [shape: f32[8,512], index: 2, kind: input, shape index: {}]   ;;  %s13590_s3 = inlined_call_operand.vmem [shape: f32[512,8], index: 3, kind: input, shape index: {}]   ;;  %s13591_s4 = inlined_call_operand.vmem [shape: f32[8,32], index: 4, kind: input, shape index: {}]   ;;  %s13592_s5 = inlined_call_operand.vmem [shape: f32[32,32], index: 5, kind: input, shape index: {}]   ;;  %s13593_s6 = inlined_call_operand.vmem [shape: f32[1,32], index: 6, kind: input, shape index: {}]   ;;  %s13594_s7 = inlined_call_operand.vmem [shape: f32[2,64,32], index: 7, kind: output, shape index: {}]  }
   0x1 LB: > { %s7774_s25 = sadd.s32 4294967295, %s9867_s24   ;;  %p7778_p0 = scmp.ge.s32.totalorder %s9867_s24, 1  ;;  %s9867_s24 = sphi %s9915_s24, %s17_s24  }
   0x2   : > { %p237_p1 = scmp.lt.s32.totalorder %s9867_s24, 3 }
   0x4   : > { %p238_p2 = pnand %p7778_p0, %p237_p1 }
   0x6   : > { %241 = sbr.rel (%p238_p2) target bundleno = 1978 (0x7ba), region = 48 }
   0xd   : > { %v287_v0 = vld [vmem:[%s13588_s1] sm:$0xff]  ;;  %v288_v1 = vld [vmem:[%s13588_s1 + $0x8] sm:$0xff]  ;;  %v289_v2 = vld [vmem:[%s13588_s1 + $0x10] sm:$0xff]  ;;  %p269_p3 = scmp.lt.s32.totalorder %s7774_s25, 1  ;;  %vm291_vm0 = vcmask 261120   ;;  %vm1238_vm1 = vcmask 64512  }
   0xe   : > { %v317_v3 = vand.u32 4294901760, %v287_v0  ;;  %v320_v4 = vand.u32 4294901760, %v288_v1  ;;  %v290_v5 = vld [vmem:[%s13588_s1 + $0x18] sm:$0xff]  ;;  %v323_v6 = vand.u32 4294901760, %v289_v2  ;;  %vm1191_vm2 = vcmask 72768   ;;  %s9872_s27 = smov 8  }
   0xf   : > { %v326_v7 = vand.u32 4294901760, %v290_v5  ;;  %s14500_s25 = smov (!%p269_p3, %s7774_s25), 1  ;;  %vm1169_vm6 = vcmask 523264   ;;  %s9873_s13 = smov 64  }
  0x10   : > { %v9937_v8 = vpack.c.bf16 %v320_v4, %v317_v3  ;;  %v9939_v9 = vsub.f32 %v287_v0, %v317_v3  ;;  %v9941_v10 = vsub.f32 %v288_v1, %v320_v4  ;;  %v9943_v11 = vsub.f32 %v289_v2, %v323_v6  ;;  %s7786_s11 = sshll.u32 %s14500_s25, 6  ;;  %s9874_s17 = smov 120  }
  0x11   : > { %v9945_v12 = vpack.c.bf16 %v326_v7, %v323_v6  ;;  %v9948_v13 = vsub.f32 %v290_v5, %v326_v7  ;;  %s9956_s14 = scalar_lea.vmem %s13587_s0, %s7786_s11  ;;  %s278_s9 = scalar_lea.vmem %s13594_s7, %s7786_s11 }
  0x12   : > { %8983 = vmatprep.subr.bf16.mxu0 %v9937_v8  ;;  %v468_v14 = vand.u32 4294901760, %v9939_v9  ;;  %v475_v15 = vand.u32 4294901760, %v9941_v10  ;;  %v279_v16 = vld [vmem:[%s9956_s14] sm:$0xff]  ;;  %v280_v17 = vld [vmem:[%s9956_s14 + $0x8] sm:$0xff]  ;;  %v281_v18 = vld [vmem:[%s9956_s14 + $0x10] sm:$0xff]  ;;  %v482_v19 = vand.u32 4294901760, %v9943_v11 }
  0x13   : > { %8985 = vmatpush3.bf16.msra.mxu0 %v9937_v8  ;;  %v489_v20 = vand.u32 4294901760, %v9948_v13  ;;  %v293_v21 = vsel %vm291_vm0, %v279_v16, 0  ;;  %v296_v24 = vsel %vm291_vm0, %v280_v17, 0  ;;  %v282_v25 = vld [vmem:[%s9956_s14 + $0x18] sm:$0xff]  ;;  %v283_v26 = vld [vmem:[%s9956_s14 + $0x20] sm:$0xff]  ;;  %v299_v29 = vsel %vm291_vm0, %v281_v18, 0 }
  0x14   : > { %8987 = vmatprep.subr.bf16.mxu0 %v9945_v12  ;;  %v469_v22 = vsub.f32 %v9939_v9, %v468_v14  ;;  %v476_v23 = vsub.f32 %v9941_v10, %v475_v15  ;;  %v9977_v27 = vand.u32 4294901760, %v293_v21  ;;  %v9979_v28 = vand.u32 4294901760, %v296_v24  ;;  %v284_v39 = vld [vmem:[%s9956_s14 + $0x28] sm:$0xff]  ;;  %v285_v48 = vld [vmem:[%s9956_s14 + $0x30] sm:$0xff]  ;;  %v286_v61 = vld [vmem:[%s9956_s14 + $0x38] sm:$0xff] }
  0x15   : > { %v302_v30 = vsel %vm291_vm0, %v282_v25, 0  ;;  %v9983_v33 = vand.u32 4294901760, %v299_v29  ;;  %v305_v37 = vsel %vm291_vm0, %v283_v26, 0  ;;  %v483_v38 = vsub.f32 %v9943_v11, %v482_v19 }
  0x16   : > { %v470_v31 = vand.u32 4294901760, %v469_v22  ;;  %v477_v32 = vand.u32 4294901760, %v476_v23  ;;  %v9985_v34 = vand.u32 4294901760, %v302_v30  ;;  %v9989_v35 = vsub.f32 %v293_v21, %v9977_v27 }
  0x17   : > { %8989 = vmatpush3.bf16.msra.mxu0 %v9945_v12  ;;  %v9992_v36 = vsub.f32 %v296_v24, %v9979_v28  ;;  %v10000_v41 = vsub.f32 %v299_v29, %v9983_v33  ;;  %v10005_v43 = vand.u32 4294901760, %v305_v37  ;;  %v484_v46 = vand.u32 4294901760, %v483_v38 }
  0x18   : > { %v8990_v40 = vpack.c.bf16 %v477_v32, %v470_v31  ;;  %v10003_v42 = vsub.f32 %v302_v30, %v9985_v34  ;;  %v387_v44 = vand.u32 4294901760, %v9989_v35  ;;  %v490_v47 = vsub.f32 %v9948_v13, %v489_v20 }
  0x19   : > { %v397_v45 = vand.u32 4294901760, %v9992_v36  ;;  %v407_v49 = vand.u32 4294901760, %v10000_v41  ;;  %v10016_v51 = vsub.f32 %v305_v37, %v10005_v43  ;;  %v308_v52 = vsel %vm291_vm0, %v284_v39, 0  ;;  %v1236_v39 = vld [vmem:[%s13589_s2 + $0x10] sm:$0xff] }
  0x1a   : > { %8991 = vmatprep.subr.bf16.mxu0 %v8990_v40  ;;  %v417_v50 = vand.u32 4294901760, %v10003_v42  ;;  %v388_v53 = vsub.f32 %v9989_v35, %v387_v44  ;;  %v491_v55 = vand.u32 4294901760, %v490_v47  ;;  %v10025_v56 = vand.u32 4294901760, %v308_v52 }
  0x1b   : > { %v398_v54 = vsub.f32 %v9992_v36, %v397_v45  ;;  %v408_v57 = vsub.f32 %v10000_v41, %v407_v49  ;;  %v427_v59 = vand.u32 4294901760, %v10016_v51  ;;  %v311_v60 = vsel %vm291_vm0, %v285_v48, 0 }
  0x1c   : > { %v418_v58 = vsub.f32 %v10003_v42, %v417_v50  ;;  %v389_v62 = vand.u32 4294901760, %v388_v53  ;;  %v10037_v0 = vsub.f32 %v308_v52, %v10025_v56  ;;  %v8994_v3 = vpack.c.bf16 %v491_v55, %v484_v46 }
  0x1d   : > { %v399_v63 = vand.u32 4294901760, %v398_v54  ;;  %v409_v1 = vand.u32 4294901760, %v408_v57  ;;  %v428_v2 = vsub.f32 %v10016_v51, %v427_v59  ;;  %v10042_v4 = vand.u32 4294901760, %v311_v60 }
  0x1e   : > { %8666 = vmatprep.mubr.f32.mxu0 %v389_v62  ;;  %v437_v5 = vand.u32 4294901760, %v10037_v0  ;;  %v314_v6 = vsel %vm291_vm0, %v286_v61, 0  ;;  %v419_v7 = vand.u32 4294901760, %v418_v58  ;;  %v8998_v24 = vpack.c.bf16 %v9941_v10, %v9939_v9  ;;  %v1235_v10 = vld [vmem:[%s13589_s2 + $0x8] sm:$0xff] }
  0x1f   : > { %8667 = vmatmul.mubr.f32.vlgmr.msra.gmra.mrb[0].mxu0 %v399_v63  ;;  %v446_v16 = vsub.f32 %v311_v60, %v10042_v4  ;;  %v10047_v17 = vand.u32 4294901760, %v314_v6  ;;  %v429_v18 = vand.u32 4294901760, %v428_v2  ;;  %v9002_v37 = vpack.c.bf16 %v9948_v13, %v9943_v11 }
  0x20   : > { %8993 = vmatpush3.bf16.msra.mxu0 %v8990_v40  ;;  %8669 = vmatprep.mubr.f32.mxu0 %v409_v1  ;;  %v438_v21 = vsub.f32 %v10037_v0, %v437_v5  ;;  %v9014_v38 = vpack.c.bf16 %v475_v15, %v468_v14  ;;  %v9018_v9 = vpack.c.bf16 %v489_v20, %v482_v19  ;;  %v10116_v11 = vand.u32 4294901760, %v1235_v10 }
  0x21   : > { %8995 = vmatprep.subr.bf16.mxu0 %v8994_v3  ;;  %v447_v22 = vand.u32 4294901760, %v446_v16  ;;  %v456_v23 = vsub.f32 %v314_v6, %v10047_v17  ;;  %v13595_v14 = vmov 0.0   ;;  %v10169_v47 = vand.u32 4294901760, %v1236_v39 }
  0x22   : > { %v439_v25 = vand.u32 4294901760, %v438_v21  ;;  %9462 = vmatprep.subr.mxu1 %v10116_v11  ;;  %1354 = vmatprep.mubr.f32.mxu1 %v13595_v14  ;;  %v10130_v15 = vsub.f32 %v1235_v10, %v10116_v11 }
  0x23   : > { %8670 = vmatmul.mubr.f32.gmra.mrb[2].mxu0 %v419_v7  ;;  %v448_v26 = vsub.f32 %v446_v16, %v447_v22  ;;  %v457_v29 = vand.u32 4294901760, %v456_v23  ;;  %v10180_v52 = vsub.f32 %v1236_v39, %v10169_v47 }
  0x24   : > { %8672 = vmatprep.mubr.f32.mxu0 %v429_v18  ;;  %8997 = vmatpush3.bf16.msra.mxu0 %v8994_v3  ;;  %v1412_v19 = vand.u32 4294901760, %v10130_v15 }
  0x25   : > { %v449_v30 = vand.u32 4294901760, %v448_v26  ;;  %v458_v31 = vsub.f32 %v456_v23, %v457_v29  ;;  %8999 = vmatprep.subr.bf16.mxu0 %v8998_v24 }
  0x26   : > { %v1413_v20 = vsub.f32 %v10130_v15, %v1412_v19 }
  0x27   : > { %8673 = vmatmul.mubr.f32.gmra.mrb[4].mxu0 %v439_v25  ;;  %v459_v32 = vand.u32 4294901760, %v458_v31 }
  0x28   : > { %8675 = vmatprep.mubr.f32.mxu0 %v449_v30 }
  0x2b   : > { %8676 = vmatmul.mubr.f32.gmra.mrb[6].mxu0 %v459_v32 }
  0x2c   : > { %8686 = vmatprep.mubr.f32.mxu0 %v9977_v27 }
  0x2f   : > { %8687 = vmatmul.mubr.f32.vlgmr.msra.gmra.mrb[0].mxu0 %v9979_v28 }
  0x30   : > { %9001 = vmatpush3.bf16.msra.mxu0 %v8998_v24  ;;  %8689 = vmatprep.mubr.f32.mxu0 %v9983_v33 }
  0x31   : > { %9003 = vmatprep.subr.bf16.mxu0 %v9002_v37 }
  0x33   : > { %8690 = vmatmul.mubr.f32.gmra.mrb[2].mxu0 %v9985_v34 }
  0x34   : > { %8692 = vmatprep.mubr.f32.mxu0 %v10005_v43  ;;  %9005 = vmatpush3.bf16.msra.mxu0 %v9002_v37 }
  0x35   : > { %9007 = vmatprep.subr.bf16.mxu0 %v9937_v8 }
  0x37   : > { %8693 = vmatmul.mubr.f32.gmra.mrb[4].mxu0 %v10025_v56 }
  0x38   : > { %8695 = vmatprep.mubr.f32.mxu0 %v10042_v4 }
  0x3b   : > { %8696 = vmatmul.mubr.f32.gmra.mrb[6].mxu0 %v10047_v17 }
  0x3c   : > { %8706 = vmatprep.mubr.f32.mxu0 %v9989_v35 }
  0x3f   : > { %8707 = vmatmul.mubr.f32.vlgmr.msra.gmra.mrb[0].mxu0 %v9992_v36 }
  0x40   : > { %9009 = vmatpush3.bf16.msra.mxu0 %v9937_v8  ;;  %8709 = vmatprep.mubr.f32.mxu0 %v10000_v41 }
  0x41   : > { %9011 = vmatprep.subr.bf16.mxu0 %v9945_v12 }
  0x43   : > { %8710 = vmatmul.mubr.f32.gmra.mrb[2].mxu0 %v10003_v42 }
  0x44   : > { %8712 = vmatprep.mubr.f32.mxu0 %v10016_v51  ;;  %9013 = vmatpush3.bf16.msra.mxu0 %v9945_v12 }
  0x45   : > { %9015 = vmatprep.subr.bf16.mxu0 %v9014_v38 }
  0x47   : > { %8713 = vmatmul.mubr.f32.gmra.mrb[4].mxu0 %v10037_v0 }
  0x48   : > { %8715 = vmatprep.mubr.f32.mxu0 %v446_v16 }
  0x4b   : > { %8716 = vmatmul.mubr.f32.gmra.mrb[6].mxu0 %v456_v23 }
  0x4c   : > { %8726 = vmatprep.mubr.f32.mxu0 %v387_v44 }
  0x4f   : > { %8727 = vmatmul.mubr.f32.vlgmr.msra.gmra.mrb[0].mxu0 %v397_v45 }
  0x50   : > { %9017 = vmatpush3.bf16.msra.mxu0 %v9014_v38  ;;  %8729 = vmatprep.mubr.f32.mxu0 %v407_v49 }
  0x51   : > { %9019 = vmatprep.subr.bf16.mxu0 %v9018_v9 }
  0x53   : > { %8730 = vmatmul.mubr.f32.gmra.mrb[2].mxu0 %v417_v50 }
  0x54   : > { %8732 = vmatprep.mubr.f32.mxu0 %v427_v59  ;;  %9021 = vmatpush3.bf16.msra.mxu0 %v9018_v9 }
  0x55   : > { %9023 = vmatprep.subr.bf16.mxu0 %v9937_v8 }
  0x57   : > { %8733 = vmatmul.mubr.f32.gmra.mrb[4].mxu0 %v437_v5 }
  0x58   : > { %8735 = vmatprep.mubr.f32.mxu0 %v447_v22 }
  0x5b   : > { %8736 = vmatmul.mubr.f32.gmra.mrb[6].mxu0 %v457_v29 }
  0x5c   : > { %8746 = vmatprep.mubr.f32.mxu0 %v9977_v27 }
  0x5f   : > { %8747 = vmatmul.mubr.f32.vlgmr.msra.gmra.mrb[0].mxu0 %v9979_v28 }
  0x60   : > { %9025 = vmatpush3.bf16.msra.mxu0 %v9937_v8  ;;  %8749 = vmatprep.mubr.f32.mxu0 %v9983_v33  ;;  %v9869_v8 = vmov 8  }
  0x61   : > { %9027 = vmatprep.subr.bf16.mxu0 %v9945_v12  ;;  %9766 = vset.pattern.permute.xlu0 %v9869_v8 }
  0x62   : > { %9767 = vset.pattern.permute.xlu1 %v9869_v8 }
  0x63   : > { %8750 = vmatmul.mubr.f32.gmra.mrb[2].mxu0 %v9985_v34 }
  0x64   : > { %8752 = vmatprep.mubr.f32.mxu0 %v10005_v43  ;;  %9029 = vmatpush3.bf16.msra.mxu0 %v9945_v12  ;;  %v1234_v12 = vld [vmem:[%s13589_s2] sm:$0xff] }
  0x65   : > { %v10121_v13 = vand.u32 4294901760, %v1234_v12  ;;  %1256 = vmatprep.subr.mxu0 %v10116_v11 }
  0x67   : > { %8753 = vmatmul.mubr.f32.gmra.mrb[4].mxu0 %v10025_v56  ;;  %9463 = vmatpush1.msra.mxu1 %v10121_v13 }
  0x68   : > { %8755 = vmatprep.mubr.f32.mxu0 %v10042_v4 }
  0x6b   : > { %8756 = vmatmul.mubr.f32.gmra.mrb[6].mxu0 %v10047_v17 }
  0x6c   : > { %8766 = vmatprep.mubr.f32.mxu0 %v9977_v27  ;;  %v1237_v27 = vld [vmem:[%s13589_s2 + $0x18] sm:$0xff] }
  0x6f   : > { %8767 = vmatmul.mubr.f32.vlgmr.msra.gmra.mrb[0].mxu0 %v9979_v28  ;;  %v1414_v28 = vand.u32 4294901760, %v1413_v20 }
  0x70   : > { %8769 = vmatprep.mubr.f32.mxu0 %v9983_v33  ;;  %1258 = vmatpush1.msra.mxu0 %v10121_v13  ;;  %v10139_v33 = vand.u32 4294901760, %v1237_v27 }
  0x71   : > { %1415 = vmatprep.subr.mxu1 %v1414_v28 }
  0x72   : > { %2064 = vmatprep.subr.mxu0 %v10139_v33  ;;  %v10147_v36 = vsub.f32 %v1237_v27, %v10139_v33 }
  0x73   : > { %8770 = vmatmul.mubr.f32.gmra.mrb[2].mxu0 %v9985_v34  ;;  %v10143_v34 = vsub.f32 %v1234_v12, %v10121_v13 }
  0x74   : > { %8772 = vmatprep.mubr.f32.mxu0 %v10005_v43  ;;  %v2220_v44 = vand.u32 4294901760, %v10147_v36 }
  0x75   : > { %v1418_v35 = vand.u32 4294901760, %v10143_v34 }
  0x76   : > { %v10194_v57 = vsub.f32 %v10147_v36, %v2220_v44 }
  0x77   : > { %8773 = vmatmul.mubr.f32.gmra.mrb[4].mxu0 %v10025_v56  ;;  %v10157_v41 = vsub.f32 %v10143_v34, %v1418_v35 }
  0x78   : > { %8775 = vmatprep.mubr.f32.mxu0 %v10042_v4 }
  0x79   : > { %v1420_v51 = vand.u32 4294901760, %v10157_v41 }
  0x7b   : > { %8776 = vmatmul.mubr.f32.gmra.mrb[6].mxu0 %v10047_v17 }
  0x7c   : > { %1321 = vmatprep.mubr.f32.mxu0 %v13595_v14 }
 0x142   : > { %v10152_v40 = vpop.f32.mrb[0].mxu0 }
 0x143   : > { %v1241_v42 = vsel %vm1238_vm1, %v10152_v40, 0  ;;  %v10161_v43 = vpop.f32.mrb[1].mxu0  ;;  %v1193_v53 = vsel %vm1191_vm2, %v10152_v40, -inf  ;;  %v1214_v58 = vsel %vm1191_vm2, %v10152_v40, inf }
 0x144   : > { %v10164_v45 = vand.u32 4294901760, %v1241_v42  ;;  %v1239_v46 = vsel %vm1238_vm1, %v10161_v43, 0  ;;  %1123 = vperm.xlu0 %9766, %v10161_v43   ;;  %v1192_v59 = vsel %vm1191_vm2, %v10161_v43, -inf  ;;  %v1213_v62 = vsel %vm1191_vm2, %v10161_v43, inf }
 0x145   : > { %v10171_v48 = vand.u32 4294901760, %v1239_v46 }
 0x146   : > { %v10174_v49 = vsub.f32 %v1241_v42, %v10164_v45  ;;  %v10176_v50 = vpop.f32.mrb[2].mxu0 }
 0x147   : > { %v10185_v54 = vsub.f32 %v1239_v46, %v10171_v48  ;;  %v1245_v55 = vsel %vm1238_vm1, %v10176_v50, 0  ;;  %v10189_v56 = vpop.f32.mrb[3].mxu0  ;;  %v1195_v63 = vsel %vm1191_vm2, %v10176_v50, -inf  ;;  %v1216_v0 = vsel %vm1191_vm2, %v10176_v50, inf }
 0x148   : > { %v10200_v60 = vand.u32 4294901760, %v1245_v55  ;;  %v1243_v61 = vsel %vm1238_vm1, %v10189_v56, 0  ;;  %1128 = vperm.xlu0 %9766, %v10152_v40   ;;  %1133 = vperm.xlu1 %9767, %v10189_v56   ;;  %v1194_v2 = vsel %vm1191_vm2, %v10189_v56, -inf  ;;  %v1215_v3 = vsel %vm1191_vm2, %v10189_v56, inf }
 0x149   : > { %v10212_v1 = vand.u32 4294901760, %v1243_v61  ;;  %v10221_v5 = vand.u32 4294901760, %v10185_v54  ;;  %v10224_v6 = vand.u32 4294901760, %v10174_v49 }
 0x14a   : > { %v10218_v4 = vpop.f32.mrb[4].mxu0  ;;  %v10227_v7 = vsub.f32 %v1245_v55, %v10200_v60 }
 0x14b   : > { %v1198_v16 = vsel %vm1191_vm2, %v10218_v4, -inf  ;;  %v1219_v17 = vsel %vm1191_vm2, %v10218_v4, inf  ;;  %v1249_v18 = vsel %vm1238_vm1, %v10218_v4, 0  ;;  %v10235_v21 = vpop.f32.mrb[5].mxu0  ;;  %v10244_v26 = vsub.f32 %v1243_v61, %v10212_v1 }
 0x14c   : > { %v1199_v22 = vmax.f32 %v1193_v53, %v1198_v16  ;;  %v1220_v23 = vmin.f32 %v1214_v58, %v1219_v17  ;;  %v10237_v24 = vand.u32 4294901760, %v1249_v18  ;;  %v1196_v25 = vsel %vm1191_vm2, %v10235_v21, -inf  ;;  %1138 = vperm.xlu1 %9767, %v10176_v50   ;;  %1143 = vperm.xlu0 %9766, %v10235_v21  }
 0x14d   : > { %v1197_v29 = vmax.f32 %v1192_v59, %v1196_v25  ;;  %v1217_v30 = vsel %vm1191_vm2, %v10235_v21, inf  ;;  %v1247_v31 = vsel %vm1238_vm1, %v10235_v21, 0  ;;  %v1325_v10 = vsub.f32 %v10185_v54, %v10221_v5 }
 0x14e   : > { %v10251_v32 = vsub.f32 %v1249_v18, %v10237_v24  ;;  %v1218_v37 = vmin.f32 %v1213_v62, %v1217_v30  ;;  %v10253_v38 = vand.u32 4294901760, %v1247_v31  ;;  %v10255_v9 = vpop.f32.mrb[6].mxu0  ;;  %v10266_v39 = vand.u32 4294901760, %v10227_v7 }
 0x14f   : > { %v1204_v12 = vmax.f32 %v1197_v29, %v1199_v22  ;;  %v1202_v20 = vsel %vm1191_vm2, %v10255_v9, -inf  ;;  %v1223_v27 = vsel %vm1191_vm2, %v10255_v9, inf  ;;  %v10263_v28 = vpop.f32.mrb[7].mxu0  ;;  %v1253_v58 = vsel %vm1238_vm1, %v10255_v9, 0 }
 0x150   : > { %v1225_v42 = vmin.f32 %v1218_v37, %v1220_v23  ;;  %v10269_v46 = vsub.f32 %v1247_v31, %v10253_v38  ;;  %v1203_v53 = vmax.f32 %v1195_v63, %v1202_v20  ;;  %v1224_v55 = vmin.f32 %v1216_v0, %v1223_v27  ;;  %1148 = vperm.xlu1 %9767, %v10218_v4  }
 0x151   : > { %v1200_v59 = vsel %vm1191_vm2, %v10263_v28, -inf  ;;  %v1221_v61 = vsel %vm1191_vm2, %v10263_v28, inf  ;;  %v1251_v62 = vsel %vm1238_vm1, %v10263_v28, 0  ;;  %1153 = vperm.xlu0 %9766, %v10263_v28   ;;  %v1326_v0 = vand.u32 4294901760, %v1325_v10 }
 0x152   : > { %v1201_v16 = vmax.f32 %v1194_v2, %v1200_v59  ;;  %v1222_v17 = vmin.f32 %v1215_v3, %v1221_v61  ;;  %v10281_v63 = vand.u32 4294901760, %v1251_v62  ;;  %v1358_v18 = vsub.f32 %v10227_v7, %v10266_v39 }
 0x153   : > { %v1336_v22 = vsub.f32 %v10174_v49, %v10224_v6  ;;  %v10288_v23 = vand.u32 4294901760, %v10244_v26  ;;  %v2222_v25 = vand.u32 4294901760, %v10194_v57  ;;  %1327 = vmatmul.mubr.f32.vlgmr.msra.gmra.mrb[8].mxu0 %v1326_v0  ;;  %v10293_v2 = vand.u32 4294901760, %v10269_v46 }
 0x154   : > { %v1205_v29 = vmax.f32 %v1201_v16, %v1203_v53  ;;  %v1226_v30 = vmin.f32 %v1222_v17, %v1224_v55  ;;  %1158 = vperm.xlu1 %9767, %v10255_v9   ;;  %v2226_v3 = vand.u32 4294901760, %v10180_v52  ;;  %v10296_v31 = vand.u32 4294901760, %v1253_v58  ;;  %1332 = vmatprep.mubr.f32.mxu0 %v13595_v14 }
 0x155   : > { %v10299_v37 = vsub.f32 %v1251_v62, %v10281_v63  ;;  %v10302_v10 = vand.u32 4294901760, %v1358_v18  ;;  %v9871_v57 = vmov 9   ;;  %v10306_v20 = vand.u32 4294901760, %v10251_v32  ;;  %2066 = vmatpush1.msra.mxu0 %v10169_v47 }
 0x156   : > { %9768 = vset.pattern.permute.xlu0 %v9871_v57  ;;  %v1337_v27 = vand.u32 4294901760, %v1336_v22  ;;  %v1347_v53 = vsub.f32 %v10244_v26, %v10288_v23  ;;  %v1369_v55 = vsub.f32 %v10269_v46, %v10293_v2  ;;  %v10314_v59 = vmin.f32 %v1225_v42, %v1226_v30  ;;  %2223 = vmatprep.subr.mxu0 %v2222_v25  ;;  %v10385_v25 = vld [vmem:[%s13590_s3] sm:$0xff]  ;;  %v10403_v30 = vld [vmem:[%s13590_s3 + $0x8] sm:$0xff] }
 0x157   : > { %3147 = vperm.xlu0 %9768, %v10161_v43   ;;  %1360 = vmatmul.mubr.f32.vlgmr.msra.gmra.mrb[0].mxu1 %v10302_v10  ;;  %v10317_v61 = vmax.f32 %v1204_v12, %v1205_v29  ;;  %v10322_v62 = vsub.f32 %v1253_v58, %v10296_v31  ;;  %v1380_v42 = vsub.f32 %v10251_v32, %v10306_v20  ;;  %v10329_v16 = vand.u32 4294901760, %v10299_v37  ;;  %v10396_v29 = vld [vmem:[%s13590_s3 + $0xa0] sm:$0xff] }
 0x158   : > { %1338 = vmatmul.mubr.f32.gmra.mrb[10].mxu0 %v1337_v27  ;;  %1421 = vmatpush1.msra.mxu1 %v1420_v51  ;;  %v1370_v43 = vand.u32 4294901760, %v1369_v55  ;;  %v2227_v12 = vsub.f32 %v10180_v52, %v2226_v3  ;;  %v1348_v41 = vand.u32 4294901760, %v1347_v53  ;;  %v10433_v53 = vld [vmem:[%s13590_s3 + $0x90] sm:$0xff] }
 0x159   : > { %1343 = vmatprep.mubr.f32.mxu0 %v13595_v14  ;;  %1365 = vmatprep.mubr.f32.mxu1 %v13595_v14  ;;  %v1381_v51 = vand.u32 4294901760, %v1380_v42  ;;  %v1391_v58 = vsub.f32 %v10299_v37, %v10329_v16  ;;  %v10342_v17 = vand.u32 4294901760, %v10322_v62  ;;  %v10450_v55 = vld [vmem:[%s13590_s3 + $0x10] sm:$0xff]  ;;  %v10463_v42 = vld [vmem:[%s13590_s3 + $0xc0] sm:$0xff] }
 0x15a   : > { %9769 = vset.pattern.permute.xlu1 %v9871_v57  ;;  %1543 = vmatprep.subr.mxu1 %v10130_v15  ;;  %v2228_v18 = vand.u32 4294901760, %v2227_v12  ;;  %v10469_v12 = vld [vmem:[%s13590_s3 + $0xa8] sm:$0xff] }
 0x15b   : > { %3159 = vperm.xlu0 %9768, %v10176_v50   ;;  %1371 = vmatmul.mubr.f32.gmra.mrb[2].mxu1 %v1370_v43  ;;  %v1392_v50 = vand.u32 4294901760, %v1391_v58  ;;  %v1402_v22 = vsub.f32 %v10322_v62, %v10342_v17 }
 0x15c   : > { %3151 = vperm.xlu1 %9769, %v10152_v40   ;;  %1349 = vmatmul.mubr.f32.gmra.mrb[12].mxu0 %v1348_v41  ;;  %v10350_v40 = vld [vmem:[%s13590_s3 + $0x88] sm:$0xff] }
 0x15d   : > { %1376 = vmatprep.mubr.f32.mxu1 %v13595_v14  ;;  %2129 = vmatprep.mubr.f32.mxu0 %v13595_v14 }
 0x15f   : > { %3167 = vperm.xlu0 %9768, %v10218_v4   ;;  %1382 = vmatmul.mubr.f32.gmra.mrb[4].mxu1 %v1381_v51  ;;  %v10369_v4 = vld [vmem:[%s13590_s3 + $0x80] sm:$0xff] }
 0x160   : > { %3155 = vperm.xlu1 %9769, %v10189_v56   ;;  %2135 = vmatmul.mubr.f32.vlgmr.msra.gmra.mrb[14].mxu0 %v1326_v0  ;;  %v10363_v56 = vld [vmem:[%s13590_s3 + $0x98] sm:$0xff]  ;;  %v1403_v0 = vand.u32 4294901760, %v1402_v22 }
 0x161   : > { %1387 = vmatprep.mubr.f32.mxu1 %v13595_v14  ;;  %2140 = vmatprep.mubr.f32.mxu0 %v13595_v14 }
 0x162   : > { %2229 = vmatpush1.msra.mxu0 %v2228_v18  ;;  %v1207_v18 = vrot.slane %v10317_v61, 4 }
 0x163   : > { %3340 = vrot.lane.b32.xlu0 %v10350_v40, %s9872_s27  ;;  %2351 = vmatprep.subr.mxu0 %v10147_v36  ;;  %v10600_v36 = vld [vmem:[%s13590_s3 + $0x180] sm:$0xff] }
 0x164   : > { %1393 = vmatmul.mubr.f32.gmra.mrb[6].mxu1 %v1392_v50  ;;  %3163 = vperm.xlu1 %9769, %v10235_v21   ;;  %v10379_v21 = vld [vmem:[%s13590_s3 + $0x18] sm:$0xff] }
 0x165   : > { %2146 = vmatmul.mubr.f32.gmra.mrb[16].mxu0 %v1337_v27  ;;  %1398 = vmatprep.mubr.f32.mxu1 %v13595_v14  ;;  %v10427_v27 = vld [vmem:[%s13590_s3 + $0xb0] sm:$0xff] }
 0x166   : > { %2151 = vmatprep.mubr.f32.mxu0 %v13595_v14 }
 0x167   : > { %3344 = vrot.lane.b32.xlu0 %v10363_v56, %s9872_s27 }
 0x168   : > { %1404 = vmatmul.mubr.f32.gmra.mrb[8].mxu1 %v1403_v0  ;;  %3338 = vrot.lane.b32.xlu1 %v10369_v4, %s9872_s27 }
 0x169   : > { %2157 = vmatmul.mubr.f32.gmra.mrb[18].mxu0 %v1348_v41  ;;  %1484 = vmatprep.mubr.f32.mxu1 %v13595_v14 }
 0x16a   : > { %2162 = vmatprep.mubr.f32.mxu0 %v13595_v14 }
 0x16b   : > { %3312 = vrot.lane.b32.xlu0 %v10379_v21, %s9872_s27 }
 0x16c   : > { %1486 = vmatmul.mubr.f32.vlgmr.msra.gmra.mrb[10].mxu1 %v10171_v48  ;;  %3306 = vrot.lane.b32.xlu1 %v10385_v25, %s9872_s27 }
 0x16d   : > { %1546 = vmatpush1.msra.mxu1 %v10143_v34  ;;  %2168 = vmatmul.mubr.f32.gmra.mrb[20].mxu0 %v10302_v10  ;;  %v10416_v10 = vld [vmem:[%s13590_s3 + $0x20] sm:$0xff] }
 0x16e   : > { %1491 = vmatprep.mubr.f32.mxu1 %v13595_v14  ;;  %2173 = vmatprep.mubr.f32.mxu0 %v13595_v14  ;;  %v10647_v34 = vld [vmem:[%s13590_s3 + $0x1a0] sm:$0xff] }
 0x16f   : > { %3346 = vrot.lane.b32.xlu0 %v10396_v29, %s9872_s27  ;;  %1675 = vmatprep.subr.mxu1 %v10116_v11 }
 0x170   : > { %1493 = vmatmul.mubr.f32.gmra.mrb[12].mxu1 %v10164_v45  ;;  %3308 = vrot.lane.b32.xlu1 %v10403_v30, %s9872_s27 }
 0x171   : > { %2179 = vmatmul.mubr.f32.gmra.mrb[22].mxu0 %v1370_v43  ;;  %1498 = vmatprep.mubr.f32.mxu1 %v13595_v14  ;;  %v1228_v43 = vrot.slane %v10314_v59, 4 }
 0x172   : > { %2184 = vmatprep.mubr.f32.mxu0 %v13595_v14 }
 0x173   : > { %3314 = vrot.lane.b32.xlu0 %v10416_v10, %s9872_s27  ;;  %v1229_v41 = vmin.f32 %v10314_v59, %v1228_v43  ;;  %v10488_v59 = vld [vmem:[%s13590_s3 + $0x28] sm:$0xff]  ;;  %v10517_v43 = vld [vmem:[%s13590_s3 + $0x38] sm:$0xff] }
 0x174   : > { %1500 = vmatmul.mubr.f32.gmra.mrb[14].mxu1 %v10212_v1  ;;  %3175 = vperm.xlu1 %9769, %v10255_v9   ;;  %v10444_v9 = vld [vmem:[%s13590_s3 + $0x30] sm:$0xff] }
 0x175   : > { %2190 = vmatmul.mubr.f32.gmra.mrb[24].mxu0 %v1381_v51  ;;  %1505 = vmatprep.mubr.f32.mxu1 %v13595_v14  ;;  %v10481_v51 = vld [vmem:[%s13590_s3 + $0x40] sm:$0xff]  ;;  %v1230_v58 = vrot.slane %v1229_v41, 2 }
 0x176   : > { %2195 = vmatprep.mubr.f32.mxu0 %v13595_v14 }
 0x177   : > { %3350 = vrot.lane.b32.xlu0 %v10427_v27, %s9872_s27  ;;  %v1231_v22 = vmin.f32 %v1229_v41, %v1230_v58  ;;  %v10529_v58 = vld [vmem:[%s13590_s3 + $0xc8] sm:$0xff] }
 0x178   : > { %1507 = vmatmul.mubr.f32.gmra.mrb[0].mxu1 %v10200_v60  ;;  %3342 = vrot.lane.b32.xlu1 %v10433_v53, %s9872_s27 }
 0x179   : > { %2201 = vmatmul.mubr.f32.gmra.mrb[26].mxu0 %v1392_v50  ;;  %1512 = vmatprep.mubr.f32.mxu1 %v13595_v14  ;;  %v10504_v50 = vld [vmem:[%s13590_s3 + $0xb8] sm:$0xff]  ;;  %v1232_v41 = vrot.slane %v1231_v22, 1 }
 0x17a   : > { %2206 = vmatprep.mubr.f32.mxu0 %v13595_v14  ;;  %9770 = vset.pattern.permute.xlu1 %v9869_v8 }
 0x17b   : > { %3318 = vrot.lane.b32.xlu0 %v10444_v9, %s9872_s27 }
 0x17c   : > { %1514 = vmatmul.mubr.f32.gmra.mrb[2].mxu1 %v10253_v38  ;;  %3310 = vrot.lane.b32.xlu1 %v10450_v55, %s9872_s27 }
 0x17d   : > { %2212 = vmatmul.mubr.f32.gmra.mrb[28].mxu0 %v1403_v0  ;;  %1519 = vmatprep.mubr.f32.mxu1 %v13595_v14  ;;  %v1208_v0 = vmax.f32 %v10317_v61, %v1207_v18  ;;  %v3108_v18 = vld [vmem:[%s13590_s3 + $0xd0] sm:$0xff] }
 0x17e   : > { %2292 = vmatprep.mubr.f32.mxu0 %v13595_v14 }
 0x17f   : > { %3354 = vrot.lane.b32.xlu0 %v10463_v42, %s9872_s27  ;;  %v1209_v61 = vrot.slane %v1208_v0, 2 }
 0x180   : > { %1521 = vmatmul.mubr.f32.gmra.mrb[4].mxu1 %v10237_v24  ;;  %3348 = vrot.lane.b32.xlu1 %v10469_v12, %s9872_s27 }
 0x181   : > { %2294 = vmatmul.mubr.f32.vlgmr.msra.gmra.mrb[14].mxu0 %v10171_v48  ;;  %1526 = vmatprep.mubr.f32.mxu1 %v13595_v14 }
 0x182   : > { %2299 = vmatprep.mubr.f32.mxu0 %v13595_v14  ;;  %2354 = vmatpush1.msra.mxu0 %v10180_v52 }
 0x183   : > { %3322 = vrot.lane.b32.xlu0 %v10481_v51, %s9872_s27  ;;  %2483 = vmatprep.subr.mxu0 %v10139_v33 }
 0x184   : > { %1528 = vmatmul.mubr.f32.gmra.mrb[6].mxu1 %v10281_v63  ;;  %3316 = vrot.lane.b32.xlu1 %v10488_v59, %s9872_s27 }
 0x185   : > { %2301 = vmatmul.mubr.f32.gmra.mrb[16].mxu0 %v10164_v45  ;;  %1533 = vmatprep.mubr.f32.mxu1 %v13595_v14 }
 0x186   : > { %2306 = vmatprep.mubr.f32.mxu0 %v13595_v14 }
 0x187   : > { %3171 = vperm.xlu0 %9768, %v10263_v28   ;;  %v1233_v28 = vmin.f32 %v1231_v22, %v1232_v41  ;;  %v10546_v22 = vld [vmem:[%s13590_s3 + $0x48] sm:$0xff]  ;;  %v3110_v41 = vld [vmem:[%s13590_s3 + $0xe0] sm:$0xff] }
 0x188   : > { %1535 = vmatmul.mubr.f32.gmra.mrb[8].mxu1 %v10296_v31  ;;  %3352 = vrot.lane.b32.xlu1 %v10504_v50, %s9872_s27 }
 0x189   : > { %2308 = vmatmul.mubr.f32.gmra.mrb[18].mxu0 %v10212_v1  ;;  %1609 = vmatprep.mubr.f32.mxu1 %v13595_v14 }
 0x18a   : > { %2313 = vmatprep.mubr.f32.mxu0 %v13595_v14 }
 0x18b   : > { %9771 = vset.pattern.permute.xlu0 %v9869_v8  ;;  %v1210_v8 = vmax.f32 %v1208_v0, %v1209_v61  ;;  %v3112_v61 = vld [vmem:[%s13590_s3 + $0xf0] sm:$0xff] }
 0x18c   : > { %1612 = vmatmul.mubr.f32.vlgmr.msra.gmra.mrb[10].mxu1 %v10185_v54  ;;  %3320 = vrot.lane.b32.xlu1 %v10517_v43, %s9872_s27 }
 0x18d   : > { %1677 = vmatpush1.msra.mxu1 %v10121_v13  ;;  %2315 = vmatmul.mubr.f32.gmra.mrb[20].mxu0 %v10200_v60  ;;  %v1211_v15 = vrot.slane %v1210_v8, 1 }
 0x18e   : > { %1617 = vmatprep.mubr.f32.mxu1 %v13595_v14  ;;  %2320 = vmatprep.mubr.f32.mxu0 %v13595_v14 }
 0x18f   : > { %2915 = vperm.xlu0 %9771, %v1233_v28   ;;  %1816 = vmatprep.subr.mxu1 %v1412_v19  ;;  %v3092_v19 = vld [vmem:[%s13590_s3 + $0x50] sm:$0xff]  ;;  %v1212_v0 = vmax.f32 %v1210_v8, %v1211_v15 }
 0x190   : > { %1620 = vmatmul.mubr.f32.gmra.mrb[12].mxu1 %v10174_v49  ;;  %3356 = vrot.lane.b32.xlu1 %v10529_v58, %s9872_s27  ;;  %v3096_v28 = vld [vmem:[%s13590_s3 + $0x70] sm:$0xff] }
 0x191   : > { %2322 = vmatmul.mubr.f32.gmra.mrb[22].mxu0 %v10253_v38  ;;  %1625 = vmatprep.mubr.f32.mxu1 %v13595_v14 }
 0x192   : > { %2327 = vmatprep.mubr.f32.mxu0 %v13595_v14 }
 0x193   : > { %3358 = vrot.lane.b32.xlu0 %v3108_v18, %s9872_s27  ;;  %v10700_v18 = vld [vmem:[%s13590_s3 + $0x1c0] sm:$0xff] }
 0x194   : > { %1628 = vmatmul.mubr.f32.gmra.mrb[14].mxu1 %v10244_v26  ;;  %3324 = vrot.lane.b32.xlu1 %v10546_v22, %s9872_s27 }
 0x195   : > { %2329 = vmatmul.mubr.f32.gmra.mrb[24].mxu0 %v10237_v24  ;;  %1633 = vmatprep.mubr.f32.mxu1 %v13595_v14 }
 0x196   : > { %2334 = vmatprep.mubr.f32.mxu0 %v13595_v14  ;;  %9772 = vset.pattern.permute.xlu0 %v9871_v57  ;;  %v3094_v57 = vld [vmem:[%s13590_s3 + $0x60] sm:$0xff] }
 0x197   : > { %3326 = vrot.lane.b32.xlu0 %v3092_v19, %s9872_s27 }
 0x198   : > { %1636 = vmatmul.mubr.f32.gmra.mrb[0].mxu1 %v10227_v7  ;;  %2910 = vperm.xlu1 %9770, %v1212_v0  }
 0x199   : > { %2336 = vmatmul.mubr.f32.gmra.mrb[26].mxu0 %v10281_v63  ;;  %1641 = vmatprep.mubr.f32.mxu1 %v13595_v14 }
 0x19a   : > { %2341 = vmatprep.mubr.f32.mxu0 %v13595_v14 }
 0x19b   : > { %3362 = vrot.lane.b32.xlu0 %v3110_v41, %s9872_s27 }
 0x19c   : > { %1644 = vmatmul.mubr.f32.gmra.mrb[2].mxu1 %v10269_v46 }
 0x19d   : > { %2343 = vmatmul.mubr.f32.gmra.mrb[28].mxu0 %v10296_v31  ;;  %1649 = vmatprep.mubr.f32.mxu1 %v13595_v14 }
 0x19e   : > { %2417 = vmatprep.mubr.f32.mxu0 %v13595_v14 }
 0x19f   : > { %3330 = vrot.lane.b32.xlu0 %v3094_v57, %s9872_s27 }
 0x1a0   : > { %1652 = vmatmul.mubr.f32.gmra.mrb[4].mxu1 %v10251_v32 }
 0x1a1   : > { %2420 = vmatmul.mubr.f32.vlgmr.msra.gmra.mrb[14].mxu0 %v10185_v54  ;;  %1657 = vmatprep.mubr.f32.mxu1 %v13595_v14  ;;  %v10658_v54 = vld [vmem:[%s13590_s3 + $0x120] sm:$0xff] }
 0x1a2   : > { %2425 = vmatprep.mubr.f32.mxu0 %v13595_v14  ;;  %2485 = vmatpush1.msra.mxu0 %v10169_v47 }
 0x1a3   : > { %3366 = vrot.lane.b32.xlu0 %v3112_v61, %s9872_s27  ;;  %2624 = vmatprep.subr.mxu0 %v2220_v44  ;;  %v10611_v44 = vld [vmem:[%s13590_s3 + $0x100] sm:$0xff] }
 0x1a4   : > { %1660 = vmatmul.mubr.f32.gmra.mrb[6].mxu1 %v10299_v37 }
 0x1a5   : > { %2428 = vmatmul.mubr.f32.gmra.mrb[16].mxu0 %v10174_v49  ;;  %1665 = vmatprep.mubr.f32.mxu1 %v13595_v14  ;;  %v10625_v49 = vld [vmem:[%s13590_s3 + $0x190] sm:$0xff] }
 0x1a6   : > { %2433 = vmatprep.mubr.f32.mxu0 %v13595_v14 }
 0x1a7   : > { %3334 = vrot.lane.b32.xlu0 %v3096_v28, %s9872_s27 }
 0x1a8   : > { %1668 = vmatmul.mubr.f32.gmra.mrb[8].mxu1 %v10322_v62 }
 0x1a9   : > { %2436 = vmatmul.mubr.f32.gmra.mrb[18].mxu0 %v10244_v26  ;;  %1740 = vmatprep.mubr.f32.mxu1 %v13595_v14 }
 0x1aa   : > { %2441 = vmatprep.mubr.f32.mxu0 %v13595_v14 }
 0x1ab   : > { %3402 = vrot.lane.b32.xlu0 %v10600_v36, %s9872_s27 }
 0x1ac   : > { %1744 = vmatmul.mubr.f32.vlgmr.msra.gmra.mrb[10].mxu1 %v10221_v5 }
 0x1ad   : > { %1820 = vmatpush1.msra.mxu1 %v1418_v35  ;;  %2444 = vmatmul.mubr.f32.gmra.mrb[20].mxu0 %v10227_v7  ;;  %v1102_v35 = vlaneseq }
 0x1ae   : > { %1749 = vmatprep.mubr.f32.mxu1 %v13595_v14  ;;  %2449 = vmatprep.mubr.f32.mxu0 %v13595_v14 }
 0x1af   : > { %3370 = vrot.lane.b32.xlu0 %v10611_v44, %s9872_s27  ;;  %1941 = vmatprep.subr.mxu1 %v10116_v11  ;;  %v10636_v11 = vld [vmem:[%s13590_s3 + $0x110] sm:$0xff]  ;;  %v10666_v7 = vshrl.u32 %v1102_v35, 7  ;;  %v10668_v26 = vand.u32 127, %v1102_v35 }
 0x1b0   : > { %1753 = vmatmul.mubr.f32.gmra.mrb[12].mxu1 %v10224_v6 }
 0x1b1   : > { %2452 = vmatmul.mubr.f32.gmra.mrb[22].mxu0 %v10269_v46  ;;  %1758 = vmatprep.mubr.f32.mxu1 %v13595_v14  ;;  %13939 = vst [vmem:[#allocation2_spill] sm:$0xff] %v10666_v7  ;;  %v1104_v46 = vadd.s32 8, %v10666_v7  ;;  %vm1113_vm3 = vcmp.eq.s32.totalorder %v10666_v7, %v10668_v26  ;;  %v1107_v52 = vadd.s32 32, %v10666_v7  ;;  %v1108_v0 = vadd.s32 40, %v10666_v7 }
 0x1b2   : > { %2457 = vmatprep.mubr.f32.mxu0 %v13595_v14  ;;  %v1109_v28 = vadd.s32 48, %v10666_v7 }
 0x1b3   : > { %3406 = vrot.lane.b32.xlu0 %v10625_v49, %s9872_s27  ;;  %vm1114_vm4 = vcmp.eq.s32.totalorder %v1104_v46, %v10668_v26  ;;  %vm1117_vm8 = vcmp.eq.s32.totalorder %v1107_v52, %v10668_v26  ;;  %vm1118_vm9 = vcmp.eq.s32.totalorder %v1108_v0, %v10668_v26  ;;  %v3122_v52 = vld [vmem:[%s13590_s3 + $0x140] sm:$0xff] }
 0x1b4   : > { %1762 = vmatmul.mubr.f32.gmra.mrb[14].mxu1 %v10288_v23  ;;  %vm1119_vm10 = vcmp.eq.s32.totalorder %v1109_v28, %v10668_v26 }
 0x1b5   : > { %2460 = vmatmul.mubr.f32.gmra.mrb[24].mxu0 %v10251_v32  ;;  %1767 = vmatprep.mubr.f32.mxu1 %v13595_v14  ;;  %v3136_v32 = vld [vmem:[%s13590_s3 + $0x1b0] sm:$0xff] }
 0x1b6   : > { %2465 = vmatprep.mubr.f32.mxu0 %v13595_v14 }
 0x1b7   : > { %3374 = vrot.lane.b32.xlu0 %v10636_v11, %s9872_s27 }
 0x1b8   : > { %1771 = vmatmul.mubr.f32.gmra.mrb[0].mxu1 %v10266_v39 }
 0x1b9   : > { %2468 = vmatmul.mubr.f32.gmra.mrb[26].mxu0 %v10299_v37  ;;  %1776 = vmatprep.mubr.f32.mxu1 %v13595_v14  ;;  %v1105_v37 = vadd.s32 16, %v10666_v7 }
 0x1ba   : > { %2473 = vmatprep.mubr.f32.mxu0 %v13595_v14 }
 0x1bb   : > { %3410 = vrot.lane.b32.xlu0 %v10647_v34, %s9872_s27  ;;  %vm1115_vm5 = vcmp.eq.s32.totalorder %v1105_v37, %v10668_v26 }
 0x1bc   : > { %1780 = vmatmul.mubr.f32.gmra.mrb[2].mxu1 %v10293_v2 }
 0x1bd   : > { %2476 = vmatmul.mubr.f32.gmra.mrb[28].mxu0 %v10322_v62  ;;  %1785 = vmatprep.mubr.f32.mxu1 %v13595_v14  ;;  %v3120_v62 = vld [vmem:[%s13590_s3 + $0x130] sm:$0xff] }
 0x1be   : > { %2548 = vmatprep.mubr.f32.mxu0 %v13595_v14 }
 0x1bf   : > { %3378 = vrot.lane.b32.xlu0 %v10658_v54, %s9872_s27 }
 0x1c0   : > { %1789 = vmatmul.mubr.f32.gmra.mrb[4].mxu1 %v10306_v20 }
 0x1c1   : > { %2552 = vmatmul.mubr.f32.vlgmr.msra.gmra.mrb[14].mxu0 %v10221_v5  ;;  %1794 = vmatprep.mubr.f32.mxu1 %v13595_v14 }
 0x1c2   : > { %2557 = vmatprep.mubr.f32.mxu0 %v13595_v14  ;;  %2628 = vmatpush1.msra.mxu0 %v2226_v3 }
 0x1c3   : > { %3414 = vrot.lane.b32.xlu0 %v3136_v32, %s9872_s27  ;;  %2749 = vmatprep.subr.mxu0 %v10139_v33  ;;  %v1124_v5 = vpop.permute.xlu0 %1123  ;;  %v1106_v33 = vadd.s32 24, %v10666_v7 }
 0x1c4   : > { %1798 = vmatmul.mubr.f32.gmra.mrb[6].mxu1 %v10329_v16  ;;  %v1161_v3 = vsel %vm1113_vm3, %v1124_v5, 0.0 }
 0x1c5   : > { %2561 = vmatmul.mubr.f32.gmra.mrb[16].mxu0 %v10224_v6  ;;  %1803 = vmatprep.mubr.f32.mxu1 %v13595_v14  ;;  %v1170_v41 = vsel %vm1169_vm6, %v1161_v3, 0.0  ;;  %vm1116_vm7 = vcmp.eq.s32.totalorder %v1106_v33, %v10668_v26  ;;  %v1110_v33 = vadd.s32 56, %v10666_v7 }
 0x1c6   : > { %2566 = vmatprep.mubr.f32.mxu0 %v13595_v14 }
 0x1c7   : > { %3382 = vrot.lane.b32.xlu0 %v3120_v62, %s9872_s27  ;;  %v1129_v8 = vpop.permute.xlu0 %1128  ;;  %v1134_v6 = vpop.permute.xlu1 %1133  ;;  %vm1120_vm11 = vcmp.eq.s32.totalorder %v1110_v33, %v10668_v26 }
 0x1c8   : > { %1807 = vmatmul.mubr.f32.gmra.mrb[8].mxu1 %v10342_v17  ;;  %v1162_v15 = vsel %vm1114_vm4, %v1129_v8, 0.0  ;;  %v1163_v19 = vsel %vm1115_vm5, %v1134_v6, 0.0  ;;  %v10732_v8 = vld [vmem:[%s13590_s3 + $0x1d0] sm:$0xff] }
 0x1c9   : > { %2570 = vmatmul.mubr.f32.gmra.mrb[18].mxu0 %v10288_v23  ;;  %1883 = vmatprep.mubr.f32.mxu1 %v13595_v14  ;;  %v1171_v57 = vsel %vm1169_vm6, %v1162_v15, 0.0  ;;  %v1173_v23 = vsel %vm1169_vm6, %v1163_v19, 0.0 }
 0x1ca   : > { %2575 = vmatprep.mubr.f32.mxu0 %v13595_v14  ;;  %v1172_v61 = vadd.f32 %v1171_v57, %v1170_v41 }
 0x1cb   : > { %3418 = vrot.lane.b32.xlu0 %v10700_v18, %s9872_s27  ;;  %v1139_v35 = vpop.permute.xlu1 %1138  ;;  %v1144_v32 = vpop.permute.xlu0 %1143 }
 0x1cc   : > { %1885 = vmatmul.mubr.f32.vlgmr.msra.gmra.mrb[10].mxu1 %v10171_v48  ;;  %v1174_v46 = vadd.f32 %v1173_v23, %v1172_v61  ;;  %v1164_v37 = vsel %vm1116_vm7, %v1139_v35, 0.0  ;;  %v1165_v5 = vsel %vm1117_vm8, %v1144_v32, 0.0  ;;  %v3124_v32 = vld [vmem:[%s13590_s3 + $0x150] sm:$0xff] }
 0x1cd   : > { %1943 = vmatpush1.msra.mxu1 %v10121_v13  ;;  %2579 = vmatmul.mubr.f32.gmra.mrb[20].mxu0 %v10266_v39  ;;  %v1175_v62 = vsel %vm1169_vm6, %v1164_v37, 0.0  ;;  %v1177_v13 = vsel %vm1169_vm6, %v1165_v5, 0.0 }
 0x1ce   : > { %1890 = vmatprep.mubr.f32.mxu1 %v13595_v14  ;;  %2584 = vmatprep.mubr.f32.mxu0 %v13595_v14  ;;  %v1176_v3 = vadd.f32 %v1175_v62, %v1174_v46 }
 0x1cf   : > { %3386 = vrot.lane.b32.xlu0 %v3122_v52, %s9872_s27  ;;  %v1149_v39 = vpop.permute.xlu1 %1148 }
 0x1d0   : > { %1892 = vmatmul.mubr.f32.gmra.mrb[12].mxu1 %v10164_v45  ;;  %v1178_v6 = vadd.f32 %v1177_v13, %v1176_v3  ;;  %v1166_v15 = vsel %vm1118_vm9, %v1149_v39, 0.0  ;;  %v1154_v19 = vpop.permute.xlu0 %1153  ;;  %v10780_v3 = vld [vmem:[%s13590_s3 + $0x188] sm:$0xff]  ;;  %v10800_v39 = vld [vmem:[%s13590_s3 + $0x198] sm:$0xff] }
 0x1d1   : > { %2588 = vmatmul.mubr.f32.gmra.mrb[22].mxu0 %v10293_v2  ;;  %1897 = vmatprep.mubr.f32.mxu1 %v13595_v14  ;;  %v1179_v0 = vsel %vm1169_vm6, %v1166_v15, 0.0  ;;  %v1167_v41 = vsel %vm1119_vm10, %v1154_v19, 0.0  ;;  %v10795_v13 = vld [vmem:[%s13590_s3 + $0x108] sm:$0xff]  ;;  %v10812_v19 = vld [vmem:[%s13590_s3 + $0x118] sm:$0xff] }
 0x1d2   : > { %2593 = vmatprep.mubr.f32.mxu0 %v13595_v14  ;;  %v1180_v57 = vadd.f32 %v1179_v0, %v1178_v6  ;;  %v1181_v61 = vsel %vm1169_vm6, %v1167_v41, 0.0  ;;  %v10822_v41 = vld [vmem:[%s13590_s3 + $0xe8] sm:$0xff] }
 0x1d3   : > { %3422 = vrot.lane.b32.xlu0 %v10732_v8, %s9872_s27  ;;  %v1159_v2 = vpop.permute.xlu1 %1158 }
 0x1d4   : > { %1899 = vmatmul.mubr.f32.gmra.mrb[14].mxu1 %v10212_v1  ;;  %v1182_v28 = vadd.f32 %v1181_v61, %v1180_v57  ;;  %v1168_v23 = vsel %vm1120_vm11, %v1159_v2, 0.0  ;;  %v10827_v57 = vld [vmem:[%s13590_s3 + $0x68] sm:$0xff] }
 0x1d5   : > { %2597 = vmatmul.mubr.f32.gmra.mrb[24].mxu0 %v10306_v20  ;;  %1904 = vmatprep.mubr.f32.mxu1 %v13595_v14  ;;  %v1183_v35 = vsel %vm1169_vm6, %v1168_v23, 0.0  ;;  %v10760_v20 = vld [vmem:[%s13590_s3 + $0xd8] sm:$0xff] }
 0x1d6   : > { %2602 = vmatprep.mubr.f32.mxu0 %v13595_v14  ;;  %v10747_v26 = vpop.permute.xlu0 %3147  ;;  %v1184_v46 = vadd.f32 %v1183_v35, %v1182_v28 }
 0x1d7   : > { %v10753_v37 = vmul.f32 %v10747_v26, %v3122_v52  ;;  %3390 = vrot.lane.b32.xlu0 %v3124_v32, %s9872_s27  ;;  %v10764_v5 = vmul.f32 %v10747_v26, %v10600_v36  ;;  %v10768_v62 = vmul.f32 %v10747_v26, %v10611_v44  ;;  %v10775_v52 = vld [vmem:[%s13590_s3 + $0x58] sm:$0xff]  ;;  %v10784_v36 = vmul.f32 %v10747_v26, %v10700_v18 }
 0x1d8   : > { %1906 = vmatmul.mubr.f32.gmra.mrb[0].mxu1 %v10200_v60  ;;  %v1185_v33 = vrot.slane %v1184_v46, 4 }
 0x1d9   : > { %13940 = vst [vmem:[#allocation3_spill] sm:$0xff] %v10753_v37  ;;  %13941 = vst [vmem:[#allocation4_spill] sm:$0xff] %v10764_v5  ;;  %2606 = vmatmul.mubr.f32.gmra.mrb[26].mxu0 %v10329_v16  ;;  %1911 = vmatprep.mubr.f32.mxu1 %v13595_v14  ;;  %v3142_v16 = vld [vmem:[%s13590_s3 + $0x1e0] sm:$0xff] }
 0x1da   : > { %13942 = vst [vmem:[#allocation5_spill] sm:$0xff] %v10768_v62  ;;  %13943 = vst [vmem:[#allocation6_spill] sm:$0xff] %v10784_v36  ;;  %2611 = vmatprep.mubr.f32.mxu0 %v13595_v14  ;;  %v10787_v44 = vpop.permute.xlu0 %3159  ;;  %v1186_v18 = vadd.f32 %v1185_v33, %v1184_v46  ;;  %v3126_v46 = vld [vmem:[%s13590_s3 + $0x160] sm:$0xff]  ;;  %v10856_v33 = vld [vmem:[%s13590_s3 + $0x1a8] sm:$0xff] }
 0x1db   : > { %13944 = vst [vmem:[#allocation7_spill] sm:$0xff] %v10787_v44  ;;  %v10802_v6 = vpop.permute.xlu1 %3151  ;;  %3426 = vrot.lane.b32.xlu0 %v3142_v16, %s9872_s27  ;;  %v10807_v15 = vmul.f32 %v10787_v44, %v10760_v20  ;;  %v10817_v0 = vmul.f32 %v10787_v44, %v10775_v52  ;;  %v10841_v23 = vmul.f32 %v10787_v44, %v10800_v39 }
 0x1dc   : > { %1913 = vmatmul.mubr.f32.gmra.mrb[2].mxu1 %v10253_v38  ;;  %v10831_v61 = vmul.f32 %v10802_v6, %v10780_v3  ;;  %v1187_v2 = vrot.slane %v1186_v18, 2  ;;  %v10837_v28 = vmul.f32 %v10802_v6, %v10795_v13  ;;  %v3195_v62 = vmul.f32 %v10802_v6, %v10350_v40 }
 0x1dd   : > { %13945 = vst [vmem:[#allocation8_spill] sm:$0xff] %v10807_v15  ;;  %13946 = vst [vmem:[#allocation9_spill] sm:$0xff] %v10817_v0  ;;  %2615 = vmatmul.mubr.f32.gmra.mrb[28].mxu0 %v10342_v17  ;;  %1918 = vmatprep.mubr.f32.mxu1 %v13595_v14  ;;  %v10851_v17 = vmul.f32 %v10787_v44, %v10812_v19 }
 0x1de   : > { %13947 = vst [vmem:[#allocation10_spill] sm:$0xff] %v10831_v61  ;;  %13948 = vst [vmem:[#allocation11_spill] sm:$0xff] %v10837_v28  ;;  %2691 = vmatprep.mubr.f32.mxu0 %v13595_v14  ;;  %v10844_v35 = vpop.permute.xlu0 %3167  ;;  %v1188_v36 = vadd.f32 %v1187_v2, %v1186_v18  ;;  %v10881_v18 = vld [vmem:[%s13590_s3 + $0x1f0] sm:$0xff]  ;;  %v13954_v2 = vmov 0.0  }
 0x1df   : > { %13949 = vst [vmem:[#allocation12_spill] sm:$0xff] %v10841_v23  ;;  %13950 = vst [vmem:[#allocation13_spill] sm:$0xff] %v10851_v17  ;;  %v10858_v37 = vpop.permute.xlu1 %3155  ;;  %3394 = vrot.lane.b32.xlu0 %v3126_v46, %s9872_s27  ;;  %v10863_v14 = vmul.f32 %v10844_v35, %v10822_v41  ;;  %v10867_v23 = vmul.f32 %v10844_v35, %v10827_v57  ;;  %v10872_v17 = vld [vmem:[%s13590_s3 + $0x128] sm:$0xff]  ;;  %v10889_v5 = vmul.f32 %v10844_v35, %v10856_v33 }
 0x1e0   : > { %1920 = vmatmul.mubr.f32.gmra.mrb[4].mxu1 %v10237_v24  ;;  %v10876_v28 = vmul.f32 %v10858_v37, %v3124_v32  ;;  %v1189_v61 = vrot.slane %v1188_v36, 1  ;;  %v10906_v40 = vmul.f32 %v10858_v37, %v10625_v49  ;;  %v3197_v49 = vmul.f32 %v10787_v44, %v10363_v56 }
 0x1e1   : > { %13951 = vst [vmem:[#allocation14_spill] sm:$0xff] %v10863_v14  ;;  %13952 = vst [vmem:[#allocation15_spill] sm:$0xff] %v10867_v23  ;;  %2693 = vmatmul.mubr.f32.vlgmr.msra.gmra.mrb[14].mxu0 %v10171_v48  ;;  %1925 = vmatprep.mubr.f32.mxu1 %v13954_v2 }
 0x1e2   : > { %13953 = vst [vmem:[#allocation16_spill] sm:$0xff] %v10876_v28  ;;  %13955 = vst [vmem:[#allocation17_spill] sm:$0xff] %v10889_v5  ;;  %2698 = vmatprep.mubr.f32.mxu0 %v13954_v2  ;;  %v3341_v32 = vpop.permute.xlu0 %3340  ;;  %2751 = vmatpush1.msra.mxu0 %v10169_v47  ;;  %v10895_v28 = vmul.f32 %v10844_v35, %v10872_v17  ;;  %v10900_v0 = vadd.f32 %v1189_v61, %v1188_v36 }
 0x1e3   : > { %v10897_v23 = vpop.permute.xlu1 %3163  ;;  %v3515_v14 = vsel %vm1238_vm1, %v3195_v62, %v3341_v32  ;;  %3430 = vrot.lane.b32.xlu0 %v10881_v18, %s9872_s27  ;;  %13959 = vst [vmem:[#allocation21_spill] sm:$0xff] %v10906_v40  ;;  %v10918_v62 = vld [vmem:[%s13590_s3 + $0x170] sm:$0xff] }
 0x1e4   : > { %13956 = vst [vmem:[#allocation18_spill] sm:$0xff] %v10895_v28  ;;  %13957 = vst [vmem:[#allocation19_spill] sm:$0xff] %v10897_v23  ;;  %1927 = vmatmul.mubr.f32.gmra.mrb[6].mxu1 %v10281_v63  ;;  %v3614_v47 = vand.u32 4294901760, %v3515_v14  ;;  %v10910_v5 = vmul.f32 %v10897_v23, %v3142_v16  ;;  %v10913_v28 = vmul.f32 %v10897_v23, %v3126_v46  ;;  %2872 = vrot.lane.b32.xlu1 %v10900_v0, %s9873_s13 }
 0x1e5   : > { %13958 = vst [vmem:[#allocation20_spill] sm:$0xff] %v10900_v0  ;;  %2700 = vmatmul.mubr.f32.gmra.mrb[16].mxu0 %v10164_v45  ;;  %1932 = vmatprep.mubr.f32.mxu1 %v13954_v2  ;;  %v3194_v16 = vmul.f32 %v10747_v26, %v10369_v4  ;;  %v10932_v46 = vmul.f32 %v10858_v37, %v10636_v11 }
 0x1e6   : > { %13960 = vst [vmem:[#allocation22_spill] sm:$0xff] %v10910_v5  ;;  %13961 = vst [vmem:[#allocation23_spill] sm:$0xff] %v10913_v28  ;;  %v10924_v36 = vsub.f32 %v3515_v14, %v3614_v47  ;;  %2705 = vmatprep.mubr.f32.mxu0 %v13954_v2  ;;  %v3345_v61 = vpop.permute.xlu0 %3344  ;;  %v10941_v14 = vmul.f32 %v10897_v23, %v10647_v34  ;;  %v10945_v56 = vmul.f32 %v10897_v23, %v10658_v54 }
 0x1e7   : > { %13963 = vst [vmem:[#allocation25_spill] sm:$0xff] %v10932_v46  ;;  %v3339_v32 = vpop.permute.xlu1 %3338  ;;  %v10935_v28 = vsel %vm1238_vm1, %v3197_v49, %v3345_v61  ;;  %3398 = vrot.lane.b32.xlu0 %v10918_v62, %s9872_s27  ;;  %v10949_v4 = vmul.f32 %v10858_v37, %v10732_v8  ;;  %v3181_v54 = vmul.f32 %v10787_v44, %v10379_v21 }
 0x1e8   : > { %13962 = vst [vmem:[#allocation24_spill] sm:$0xff] %v10924_v36  ;;  %13964 = vst [vmem:[#allocation26_spill] sm:$0xff] %v10941_v14  ;;  %1934 = vmatmul.mubr.f32.gmra.mrb[8].mxu1 %v10296_v31  ;;  %v3514_v11 = vsel %vm1238_vm1, %v3194_v16, %v3339_v32  ;;  %v13599_v49 = vand.u32 4294901760, %v10935_v28  ;;  %v3901_v61 = vand.u32 4294901760, %v10924_v36  ;;  %v3178_v16 = vmul.f32 %v10747_v26, %v10385_v25 }
 0x1e9   : > { %13965 = vst [vmem:[#allocation27_spill] sm:$0xff] %v10945_v56  ;;  %13966 = vst [vmem:[#allocation28_spill] sm:$0xff] %v10949_v4  ;;  %2707 = vmatmul.mubr.f32.gmra.mrb[18].mxu0 %v10212_v1  ;;  %v3611_v34 = vand.u32 4294901760, %v3514_v11  ;;  %2006 = vmatprep.mubr.f32.mxu1 %v13954_v2 }
 0x1ea   : > { %v10962_v8 = vsub.f32 %v10935_v28, %v13599_v49  ;;  %2712 = vmatprep.mubr.f32.mxu0 %v13954_v2  ;;  %v3313_v32 = vpop.permute.xlu0 %3312  ;;  %3360 = vrot.lane.b32.xlu1 %v10760_v20, %s9872_s27  ;;  %v10970_v5 = vsub.f32 %v10924_v36, %v3901_v61 }
 0x1eb   : > { %v10972_v4 = vsub.f32 %v3514_v11, %v3611_v34  ;;  %v3307_v21 = vpop.permute.xlu1 %3306  ;;  %v10975_v44 = vsel %vm1238_vm1, %v3181_v54, %v3313_v32  ;;  %v10977_v49 = vpack.c.bf16 %v3614_v47, %v3611_v34  ;;  %v3198_v11 = vmul.f32 %v10897_v23, %v10396_v29 }
 0x1ec   : > { %13967 = vst [vmem:[#allocation29_spill] sm:$0xff] %v10962_v8  ;;  %2008 = vmatmul.mubr.f32.vlgmr.msra.gmra.mrb[10].mxu1 %v10171_v48  ;;  %v3498_v56 = vsel %vm1238_vm1, %v3178_v16, %v3307_v21  ;;  %v13601_v25 = vand.u32 4294901760, %v10975_v44  ;;  %v13604_v14 = vand.u32 4294901760, %v10962_v8  ;;  %v3179_v16 = vmul.f32 %v10802_v6, %v10403_v30 }
 0x1ed   : > { %13968 = vst [vmem:[#allocation30_spill] sm:$0xff] %v10972_v4  ;;  %13969 = vst [vmem:[#allocation31_spill] sm:$0xff] %v10977_v49  ;;  %2714 = vmatmul.mubr.f32.gmra.mrb[20].mxu0 %v10200_v60  ;;  %v3563_v20 = vand.u32 4294901760, %v3498_v56  ;;  %2013 = vmatprep.mubr.f32.mxu1 %v13954_v2  ;;  %v3894_v54 = vand.u32 4294901760, %v10972_v4  ;;  %v3903_v15 = vand.u32 4294901760, %v10970_v5 }
 0x1ee   : > { %v10993_v34 = vsub.f32 %v10975_v44, %v13601_v25  ;;  %2719 = vmatprep.mubr.f32.mxu0 %v13954_v2  ;;  %9031 = vmatprep.subr.bf16.mxu1 %v10977_v49  ;;  %v3347_v32 = vpop.permute.xlu0 %3346  ;;  %v11002_v29 = vsub.f32 %v10962_v8, %v13604_v14 }
 0x1ef   : > { %v11004_v21 = vsub.f32 %v3498_v56, %v3563_v20  ;;  %v3309_v47 = vpop.permute.xlu1 %3308  ;;  %v11007_v36 = vsel %vm1238_vm1, %v3198_v11, %v3347_v32  ;;  %3328 = vrot.lane.b32.xlu1 %v10775_v52, %s9872_s27  ;;  %v9158_v25 = vpack.c.bf16 %v3901_v61, %v3894_v54  ;;  %v3895_v49 = vsub.f32 %v10972_v4, %v3894_v54  ;;  %v3113_v61 = vld [vmem:[%s13590_s3 + $0xf8] sm:$0xff] }
 0x1f0   : > { %13970 = vst [vmem:[#allocation32_spill] sm:$0xff] %v10993_v34  ;;  %v13608_v30 = vand.u32 4294901760, %v10993_v34  ;;  %2015 = vmatmul.mubr.f32.gmra.mrb[12].mxu1 %v10164_v45  ;;  %v3499_v46 = vsel %vm1238_vm1, %v3179_v16, %v3309_v47  ;;  %v13609_v14 = vand.u32 4294901760, %v11007_v36  ;;  %v3182_v52 = vmul.f32 %v10897_v23, %v10416_v10  ;;  %v11027_v54 = vld [vmem:[%s13590_s3 + $0x78] sm:$0xff] }
 0x1f1   : > { %13971 = vst [vmem:[#allocation33_spill] sm:$0xff] %v11004_v21  ;;  %v13610_v56 = vand.u32 4294901760, %v11004_v21  ;;  %2721 = vmatmul.mubr.f32.gmra.mrb[22].mxu0 %v10253_v38  ;;  %v3566_v11 = vand.u32 4294901760, %v3499_v46  ;;  %2020 = vmatprep.mubr.f32.mxu1 %v13954_v2 }
 0x1f2   : > { %v11032_v47 = vsub.f32 %v10993_v34, %v13608_v30  ;;  %v11037_v16 = vsub.f32 %v11007_v36, %v13609_v14  ;;  %2726 = vmatprep.mubr.f32.mxu0 %v13954_v2  ;;  %9159 = vmatprep.subr.bf16.mxu0 %v9158_v25  ;;  %v3315_v10 = vpop.permute.xlu0 %3314  ;;  %v11057_v25 = vld [vmem:[%s13590_s3 + $0x1b8] sm:$0xff] }
 0x1f3   : > { %v3783_v32 = vsub.f32 %v11004_v21, %v13610_v56  ;;  %v11043_v4 = vpack.c.bf16 %v3566_v11, %v3563_v20  ;;  %v11045_v40 = vsub.f32 %v3499_v46, %v3566_v11  ;;  %v11047_v23 = vpop.permute.xlu1 %3175  ;;  %v11050_v30 = vsel %vm1238_vm1, %v3182_v52, %v3315_v10  ;;  %3364 = vrot.lane.b32.xlu1 %v10822_v41, %s9872_s27  ;;  %v11071_v41 = vld [vmem:[%s13590_s3 + $0x138] sm:$0xff] }
 0x1f4   : > { %13972 = vst [vmem:[#allocation34_spill] sm:$0xff] %v11037_v16  ;;  %2022 = vmatmul.mubr.f32.gmra.mrb[14].mxu1 %v10212_v1  ;;  %v13612_v20 = vand.u32 4294901760, %v11050_v30  ;;  %v11062_v46 = vmul.f32 %v11047_v23, %v3113_v61  ;;  %v11066_v11 = vmul.f32 %v11047_v23, %v11027_v54  ;;  %13977 = vst [vmem:[#allocation39_spill] sm:$0xff] %v11071_v41  ;;  %v3896_v52 = vand.u32 4294901760, %v3895_v49 }
 0x1f5   : > { %13973 = vst [vmem:[#allocation35_spill] sm:$0xff] %v11043_v4  ;;  %13974 = vst [vmem:[#allocation36_spill] sm:$0xff] %v11045_v40  ;;  %v3789_v10 = vand.u32 4294901760, %v11045_v40  ;;  %2728 = vmatmul.mubr.f32.gmra.mrb[24].mxu0 %v10237_v24  ;;  %2027 = vmatprep.mubr.f32.mxu1 %v13954_v2  ;;  %v3196_v56 = vmul.f32 %v10858_v37, %v10433_v53 }
 0x1f6   : > { %13975 = vst [vmem:[#allocation37_spill] sm:$0xff] %v11062_v46  ;;  %13976 = vst [vmem:[#allocation38_spill] sm:$0xff] %v11066_v11  ;;  %v11083_v11 = vsub.f32 %v11050_v30, %v13612_v20  ;;  %2733 = vmatprep.mubr.f32.mxu0 %v13954_v2  ;;  %9033 = vmatpush3.bf16.msra.mxu1 %v11043_v4  ;;  %v11087_v49 = vpop.permute.xlu0 %3350  ;;  %v11092_v46 = vmul.f32 %v11047_v23, %v11057_v25 }
 0x1f7   : > { %v3790_v53 = vsub.f32 %v11045_v40, %v3789_v10  ;;  %v3343_v0 = vpop.permute.xlu1 %3342  ;;  %3332 = vrot.lane.b32.xlu1 %v10827_v57, %s9872_s27  ;;  %v11100_v20 = vmul.f32 %v11047_v23, %v11071_v41  ;;  %v11105_v7 = vpack.c.bf16 %v3903_v15, %v3896_v52  ;;  %v13981_v57 = vand.u32 4294901760, %v11037_v16 }
 0x1f8   : > { %13978 = vst [vmem:[#allocation40_spill] sm:$0xff] %v11083_v11  ;;  %13979 = vst [vmem:[#allocation41_spill] sm:$0xff] %v11092_v46  ;;  %v13618_v4 = vand.u32 4294901760, %v11083_v11  ;;  %2029 = vmatmul.mubr.f32.gmra.mrb[0].mxu1 %v10200_v60  ;;  %v3516_v14 = vsel %vm1238_vm1, %v3196_v56, %v3343_v0  ;;  %v3784_v46 = vand.u32 4294901760, %v3783_v32  ;;  %v3180_v15 = vmul.f32 %v10858_v37, %v10450_v55 }
 0x1f9   : > { %13980 = vst [vmem:[#allocation42_spill] sm:$0xff] %v11100_v20  ;;  %v3791_v5 = vand.u32 4294901760, %v3790_v53  ;;  %2735 = vmatmul.mubr.f32.gmra.mrb[26].mxu0 %v10281_v63  ;;  %v3617_v40 = vand.u32 4294901760, %v3516_v14  ;;  %2034 = vmatprep.mubr.f32.mxu1 %v13954_v2  ;;  %v11112_v41 = vsub.f32 %v11037_v16, %v13981_v57  ;;  %v13983_v52 = vand.u32 4294901760, %v10935_v28 }
 0x1fa   : > { %v11117_v20 = vsub.f32 %v11083_v11, %v13618_v4  ;;  %2740 = vmatprep.mubr.f32.mxu0 %v13954_v2  ;;  %v11122_v0 = vpop.permute.xlu0 %3318  ;;  %v3199_v28 = vmul.f32 %v10844_v35, %v10469_v12  ;;  %v3186_v12 = vmul.f32 %v10747_v26, %v10481_v51 }
 0x1fb   : > { %v11124_v56 = vsub.f32 %v3516_v14, %v3617_v40  ;;  %v3311_v32 = vpop.permute.xlu1 %3310  ;;  %3368 = vrot.lane.b32.xlu1 %v3113_v61, %s9872_s27  ;;  %v11129_v53 = vpack.c.bf16 %v13983_v52, %v3617_v40  ;;  %v11131_v57 = vpack.c.bf16 %v3791_v5, %v3784_v46  ;;  %v3202_v40 = vmul.f32 %v10747_v26, %v10463_v42 }
 0x1fc   : > { %2036 = vmatmul.mubr.f32.gmra.mrb[2].mxu1 %v10253_v38  ;;  %v3500_v4 = vsel %vm1238_vm1, %v3180_v15, %v3311_v32  ;;  %v13986_v5 = vand.u32 4294901760, %v10975_v44  ;;  %v13989_v61 = vand.u32 4294901760, %v10962_v8  ;;  %v13990_v42 = vand.u32 4294901760, %v11004_v21 }
 0x1fd   : > { %13982 = vst [vmem:[#allocation43_spill] sm:$0xff] %v11124_v56  ;;  %13984 = vst [vmem:[#allocation44_spill] sm:$0xff] %v11129_v53  ;;  %2742 = vmatmul.mubr.f32.gmra.mrb[28].mxu0 %v10296_v31  ;;  %v3569_v55 = vand.u32 4294901760, %v3500_v4  ;;  %2041 = vmatprep.mubr.f32.mxu1 %v13954_v2  ;;  %v3908_v14 = vand.u32 4294901760, %v11124_v56  ;;  %v11174_v26 = vmul.f32 %v10802_v6, %v10546_v22 }
 0x1fe   : > { %13985 = vst [vmem:[#allocation45_spill] sm:$0xff] %v11131_v57  ;;  %2814 = vmatprep.mubr.f32.mxu0 %v13954_v2  ;;  %9035 = vmatprep.subr.bf16.mxu1 %v11129_v53  ;;  %v3355_v46 = vpop.permute.xlu0 %3354  ;;  %v9160_v57 = vpack.c.bf16 %v3789_v10, %v13990_v42  ;;  %v3183_v10 = vmul.f32 %v10844_v35, %v10488_v59 }
 0x1ff   : > { %v11148_v15 = vpack.c.bf16 %v13986_v5, %v3569_v55  ;;  %v11150_v32 = vsub.f32 %v3500_v4, %v3569_v55  ;;  %v3349_v52 = vpop.permute.xlu1 %3348  ;;  %3336 = vrot.lane.b32.xlu1 %v11027_v54, %s9872_s27  ;;  %v9162_v53 = vpack.c.bf16 %v13989_v61, %v3908_v14  ;;  %v11164_v4 = vmul.f32 %v10802_v6, %v10529_v58 }
 0x200   : > { %2043 = vmatmul.mubr.f32.gmra.mrb[4].mxu1 %v10237_v24  ;;  %v3519_v44 = vsel %vm1238_vm1, %v3199_v28, %v3349_v52  ;;  %v3909_v55 = vsub.f32 %v11124_v56, %v3908_v14  ;;  %v11177_v58 = vsel %vm1238_vm1, %v3202_v40, %v3355_v46  ;;  %v3805_v5 = vand.u32 4294901760, %v11032_v47 }
 0x201   : > { %13987 = vst [vmem:[#allocation46_spill] sm:$0xff] %v11148_v15  ;;  %13988 = vst [vmem:[#allocation47_spill] sm:$0xff] %v11150_v32  ;;  %v3796_v54 = vand.u32 4294901760, %v11150_v32  ;;  %2816 = vmatmul.mubr.f32.vlgmr.msra.gmra.mrb[14].mxu0 %v10171_v48  ;;  %v3626_v51 = vand.u32 4294901760, %v3519_v44  ;;  %2048 = vmatprep.mubr.f32.mxu1 %v13954_v2  ;;  %v3917_v48 = vand.u32 4294901760, %v11002_v29  ;;  %v13992_v46 = vand.u32 4294901760, %v11007_v36 }
 0x202   : > { %9161 = vmatpush3.bf16.msra.mxu0 %v9160_v57  ;;  %2821 = vmatprep.mubr.f32.mxu0 %v13954_v2  ;;  %v3323_v14 = vpop.permute.xlu0 %3322  ;;  %v3910_v28 = vand.u32 4294901760, %v3909_v55  ;;  %v3201_v55 = vmul.f32 %v11047_v23, %v10504_v50  ;;  %v13623_v36 = vand.u32 4294901760, %v11177_v58 }
 0x203   : > { %v11185_v52 = vsub.f32 %v11150_v32, %v3796_v54  ;;  %v11187_v22 = vsub.f32 %v3519_v44, %v3626_v51  ;;  %9037 = vmatpush3.bf16.msra.mxu1 %v11148_v15  ;;  %9163 = vmatprep.subr.bf16.mxu0 %v9162_v53  ;;  %v3317_v57 = vpop.permute.xlu1 %3316  ;;  %v11191_v40 = vsel %vm1238_vm1, %v3186_v12, %v3323_v14  ;;  %v13994_v44 = vand.u32 4294901760, %v10993_v34 }
 0x204   : > { %2050 = vmatmul.mubr.f32.gmra.mrb[6].mxu1 %v10281_v63  ;;  %v3503_v59 = vsel %vm1238_vm1, %v3183_v10, %v3317_v57  ;;  %v13621_v29 = vand.u32 4294901760, %v11191_v40  ;;  %3404 = vrot.lane.b32.xlu1 %v10780_v3, %s9872_s27  ;;  %v11200_v42 = vpack.c.bf16 %v3626_v51, %v13992_v46  ;;  %v3185_v3 = vmul.f32 %v11047_v23, %v10517_v43 }
 0x205   : > { %13991 = vst [vmem:[#allocation48_spill] sm:$0xff] %v11187_v22  ;;  %v9164_v53 = vpack.c.bf16 %v13994_v44, %v3796_v54  ;;  %2823 = vmatmul.mubr.f32.gmra.mrb[16].mxu0 %v10164_v45  ;;  %v3578_v12 = vand.u32 4294901760, %v3503_v59  ;;  %2055 = vmatprep.mubr.f32.mxu1 %v13954_v2  ;;  %v13624_v10 = vand.u32 4294901760, %v11187_v22  ;;  %v11221_v54 = vpack.c.bf16 %v3917_v48, %v3910_v28 }
 0x206   : > { %13993 = vst [vmem:[#allocation49_spill] sm:$0xff] %v11200_v42  ;;  %v11215_v51 = vsub.f32 %v11191_v40, %v13621_v29  ;;  %2828 = vmatprep.mubr.f32.mxu0 %v13954_v2  ;;  %9039 = vmatprep.subr.bf16.mxu1 %v11200_v42  ;;  %v11219_v45 = vpop.permute.xlu0 %3171  ;;  %v13997_v43 = vand.u32 4294901760, %v11050_v30  ;;  %v14000_v44 = vand.u32 4294901760, %v11037_v16  ;;  %v14027_v42 = vld [vmem:[#allocation20_spill] sm:$0xff] }
 0x207   : > { %13996 = vst [vmem:[#allocation51_spill] sm:$0xff] %v11221_v54  ;;  %v11229_v57 = vsub.f32 %v3503_v59, %v3578_v12  ;;  %9165 = vmatpush3.bf16.msra.mxu0 %v9164_v53  ;;  %v3353_v46 = vpop.permute.xlu1 %3352  ;;  %v3184_v28 = vmul.f32 %v11219_v45, %v10444_v9  ;;  %v3200_v59 = vmul.f32 %v11219_v45, %v10427_v27  ;;  %v3812_v53 = vand.u32 4294901760, %v11117_v20 }
 0x208   : > { %13995 = vst [vmem:[#allocation50_spill] sm:$0xff] %v11215_v51  ;;  %v11227_v14 = vpack.c.bf16 %v3578_v12, %v13997_v43  ;;  %v9166_v61 = vpack.c.bf16 %v13624_v10, %v14000_v44  ;;  %v13622_v48 = vand.u32 4294901760, %v11215_v51  ;;  %2057 = vmatmul.mubr.f32.gmra.mrb[8].mxu1 %v10296_v31  ;;  %v3521_v30 = vsel %vm1238_vm1, %v3201_v55, %v3353_v46 }
 0x209   : > { %13999 = vst [vmem:[#allocation53_spill] sm:$0xff] %v11229_v57  ;;  %3372 = vrot.lane.b32.xlu1 %v10795_v13, %s9872_s27  ;;  %v3817_v12 = vand.u32 4294901760, %v11229_v57  ;;  %2830 = vmatmul.mubr.f32.gmra.mrb[18].mxu0 %v10212_v1  ;;  %v3632_v9 = vand.u32 4294901760, %v3521_v30  ;;  %v3504_v55 = vsel %vm1238_vm1, %v3184_v28, %v11122_v0  ;;  %v11255_v13 = vsub.f32 %v11177_v58, %v13623_v36 }
 0x20a   : > { %13998 = vst [vmem:[#allocation52_spill] sm:$0xff] %v11227_v14  ;;  %9041 = vmatpush3.bf16.msra.mxu1 %v11227_v14  ;;  %v11260_v27 = vsub.f32 %v11215_v51, %v13622_v48  ;;  %2835 = vmatprep.mubr.f32.mxu0 %v13954_v2  ;;  %v3581_v1 = vand.u32 4294901760, %v3504_v55  ;;  %v3520_v46 = vsel %vm1238_vm1, %v3200_v59, %v11087_v49  ;;  %v14003_v43 = vand.u32 4294901760, %v11083_v11 }
 0x20b   : > { %14001 = vst [vmem:[#allocation54_spill] sm:$0xff] %v11255_v13  ;;  %9167 = vmatprep.subr.bf16.mxu0 %v9166_v61  ;;  %v3818_v44 = vsub.f32 %v11229_v57, %v3817_v12  ;;  %v11266_v0 = vsub.f32 %v3521_v30, %v3632_v9  ;;  %v3321_v28 = vpop.permute.xlu1 %3320  ;;  %v3629_v29 = vand.u32 4294901760, %v3520_v46  ;;  %v3798_v48 = vand.u32 4294901760, %v11185_v52 }
 0x20c   : > { %v9168_v50 = vpack.c.bf16 %v3817_v12, %v14003_v43  ;;  %v3505_v36 = vsel %vm1238_vm1, %v3185_v3, %v3321_v28  ;;  %v11273_v61 = vsub.f32 %v3504_v55, %v3581_v1  ;;  %v3950_v3 = vand.u32 4294901760, %v11255_v13 }
 0x20d   : > { %14002 = vst [vmem:[#allocation55_spill] sm:$0xff] %v11266_v0  ;;  %3408 = vrot.lane.b32.xlu1 %v10800_v39, %s9872_s27  ;;  %v3819_v49 = vand.u32 4294901760, %v3818_v44  ;;  %2837 = vmatmul.mubr.f32.gmra.mrb[20].mxu0 %v10200_v60  ;;  %v3584_v30 = vand.u32 4294901760, %v3505_v36  ;;  %v11278_v59 = vpack.c.bf16 %v3632_v9, %v3629_v29  ;;  %v11280_v10 = vsub.f32 %v3520_v46, %v3629_v29 }
 0x20e   : > { %14004 = vst [vmem:[#allocation56_spill] sm:$0xff] %v11273_v61  ;;  %2842 = vmatprep.mubr.f32.mxu0 %v13954_v2  ;;  %9169 = vmatpush3.bf16.msra.mxu0 %v9168_v50  ;;  %v3943_v20 = vand.u32 4294901760, %v11266_v0  ;;  %v3824_v52 = vand.u32 4294901760, %v11273_v61  ;;  %v11288_v39 = vmul.f32 %v11219_v45, %v10881_v18  ;;  %v11298_v50 = vmul.f32 %v11219_v45, %v10918_v62 }
 0x20f   : > { %14005 = vst [vmem:[#allocation57_spill] sm:$0xff] %v11278_v59  ;;  %14006 = vst [vmem:[#allocation58_spill] sm:$0xff] %v11280_v10  ;;  %v11290_v12 = vpack.c.bf16 %v3584_v30, %v3581_v1  ;;  %v11292_v60 = vsub.f32 %v3505_v36, %v3584_v30  ;;  %v3357_v43 = vpop.permute.xlu1 %3356  ;;  %9043 = vmatprep.subr.bf16.mxu1 %v11278_v59  ;;  %v3936_v29 = vand.u32 4294901760, %v11280_v10  ;;  %v14010_v36 = vand.u32 4294901760, %v11187_v22 }
 0x210   : > { %v3523_v9 = vsel %vm1238_vm1, %v11164_v4, %v3357_v43  ;;  %v11306_v18 = vpack.c.bf16 %v3805_v5, %v3798_v48  ;;  %v11311_v1 = vpack.c.bf16 %v3819_v49, %v3812_v53  ;;  %v3944_v48 = vsub.f32 %v11266_v0, %v3943_v20 }
 0x211   : > { %14007 = vst [vmem:[#allocation59_spill] sm:$0xff] %v11290_v12  ;;  %14008 = vst [vmem:[#allocation60_spill] sm:$0xff] %v11292_v60  ;;  %3376 = vrot.lane.b32.xlu1 %v10812_v19, %s9872_s27  ;;  %v3930_v55 = vsub.f32 %v11187_v22, %v14010_v36  ;;  %v3831_v46 = vand.u32 4294901760, %v11292_v60  ;;  %2844 = vmatmul.mubr.f32.gmra.mrb[22].mxu0 %v10253_v38  ;;  %v3638_v4 = vand.u32 4294901760, %v3523_v9  ;;  %v14013_v38 = vand.u32 4294901760, %v11177_v58 }
 0x212   : > { %14009 = vst [vmem:[#allocation61_spill] sm:$0xff] %v11306_v18  ;;  %14011 = vst [vmem:[#allocation62_spill] sm:$0xff] %v11311_v1  ;;  %9045 = vmatpush3.bf16.msra.mxu1 %v11290_v12  ;;  %v9170_v19 = vpack.c.bf16 %v3943_v20, %v3936_v29  ;;  %2849 = vmatprep.mubr.f32.mxu0 %v13954_v2  ;;  %v3937_v5 = vsub.f32 %v11280_v10, %v3936_v29  ;;  %v14015_v20 = vand.u32 4294901760, %v11112_v41  ;;  %v14069_v1 = vld [vmem:[#allocation26_spill] sm:$0xff]  ;;  %v14074_v18 = vld [vmem:[#allocation27_spill] sm:$0xff] }
 0x213   : > { %v3931_v47 = vand.u32 4294901760, %v3930_v55  ;;  %v3825_v53 = vsub.f32 %v11273_v61, %v3824_v52  ;;  %v3832_v44 = vsub.f32 %v11292_v60, %v3831_v46  ;;  %v11323_v28 = vsub.f32 %v3523_v9, %v3638_v4  ;;  %v3325_v49 = vpop.permute.xlu1 %3324  ;;  %v14028_v60 = vld [vmem:[#allocation8_spill] sm:$0xff] }
 0x214   : > { %9171 = vmatprep.subr.bf16.mxu0 %v9170_v19  ;;  %v11327_v30 = vpack.c.bf16 %v3638_v4, %v14013_v38  ;;  %v3507_v43 = vsel %vm1238_vm1, %v11174_v26, %v3325_v49  ;;  %v9172_v29 = vpack.c.bf16 %v3831_v46, %v3824_v52  ;;  %v3938_v4 = vand.u32 4294901760, %v3937_v5 }
 0x215   : > { %14012 = vst [vmem:[#allocation63_spill] sm:$0xff] %v11323_v28  ;;  %3412 = vrot.lane.b32.xlu1 %v10856_v33, %s9872_s27  ;;  %v11335_v36 = vpack.c.bf16 %v3931_v47, %v14015_v20  ;;  %v3833_v55 = vand.u32 4294901760, %v3832_v44  ;;  %2851 = vmatmul.mubr.f32.gmra.mrb[24].mxu0 %v10237_v24  ;;  %v3590_v9 = vand.u32 4294901760, %v3507_v43  ;;  %v3957_v58 = vand.u32 4294901760, %v11323_v28 }
 0x216   : > { %14014 = vst [vmem:[#allocation64_spill] sm:$0xff] %v11327_v30  ;;  %9047 = vmatprep.subr.bf16.mxu1 %v11327_v30  ;;  %2856 = vmatprep.mubr.f32.mxu0 %v13954_v2  ;;  %v3945_v26 = vand.u32 4294901760, %v3944_v48  ;;  %v3826_v19 = vand.u32 4294901760, %v3825_v53  ;;  %v3951_v33 = vsub.f32 %v11255_v13, %v3950_v3  ;;  %v14017_v41 = vand.u32 4294901760, %v11191_v40  ;;  %v14026_v30 = vld [vmem:[#allocation2_spill] sm:$0xff] }
 0x217   : > { %14016 = vst [vmem:[#allocation65_spill] sm:$0xff] %v11335_v36  ;;  %9173 = vmatpush3.bf16.msra.mxu0 %v9172_v29  ;;  %v11346_v46 = vsub.f32 %v3507_v43, %v3590_v9  ;;  %v9174_v24 = vpack.c.bf16 %v3957_v58, %v3950_v3  ;;  %v3958_v40 = vsub.f32 %v11323_v28, %v3957_v58  ;;  %v14022_v53 = vand.u32 4294901760, %v11215_v51 }
 0x218   : > { %v11344_v52 = vpack.c.bf16 %v3590_v9, %v14017_v41  ;;  %v11350_v47 = vpack.c.bf16 %v3945_v26, %v3938_v4  ;;  %v11352_v5 = vpack.c.bf16 %v3833_v55, %v3826_v19  ;;  %v3952_v38 = vand.u32 4294901760, %v3951_v33  ;;  %v14025_v9 = vld [vmem:[#allocation39_spill] sm:$0xff]  ;;  %v11396_v4 = vpop.permute.xlu0 %2915  ;;  %v11401_v26 = vld [vmem:[%s13590_s3 + $0x1d8] sm:$0xff] }
 0x219   : > { %14019 = vst [vmem:[#allocation67_spill] sm:$0xff] %v11346_v46  ;;  %3380 = vrot.lane.b32.xlu1 %v10872_v17, %s9872_s27  ;;  %v3845_v44 = vand.u32 4294901760, %v11346_v46  ;;  %2858 = vmatmul.mubr.f32.gmra.mrb[26].mxu0 %v10281_v63  ;;  %v3959_v43 = vand.u32 4294901760, %v3958_v40  ;;  %v3840_v29 = vand.u32 4294901760, %v11260_v27  ;;  %v11412_v41 = vld [vmem:[%s13590_s3 + $0x158] sm:$0xff]  ;;  %v11450_v63 = vpop.permute.xlu1 %2910  ;;  %v9853_v17 = vld [vmem:[%s13590_s3 + $0xd0] sm:$0xff] }
 0x21a   : > { %14018 = vst [vmem:[#allocation66_spill] sm:$0xff] %v11344_v52  ;;  %14020 = vst [vmem:[#allocation68_spill] sm:$0xff] %v11350_v47  ;;  %9049 = vmatpush3.bf16.msra.mxu1 %v11344_v52  ;;  %2863 = vmatprep.mubr.f32.mxu0 %v13954_v2  ;;  %v3204_v52 = vmul.f32 %v9853_v17, %v10858_v37  ;;  %v2952_v12 = vsub.s32 0, %v14026_v30 }
 0x21b   : > { %14021 = vst [vmem:[#allocation69_spill] sm:$0xff] %v11352_v5  ;;  %9175 = vmatprep.subr.bf16.mxu0 %v9174_v24  ;;  %v3846_v3 = vsub.f32 %v11346_v46, %v3845_v44  ;;  %v9176_v49 = vpack.c.bf16 %v3845_v44, %v14022_v53  ;;  %v11372_v20 = vpack.c.bf16 %v3959_v43, %v3952_v38  ;;  %v11437_v38 = vld [vmem:[%s13590_s3 + $0x1f8] sm:$0xff]  ;;  %v9854_v46 = vld [vmem:[%s13590_s3 + $0x50] sm:$0xff] }
 0x21c   : > { %v3359_v24 = vpop.permute.xlu0 %3358  ;;  %v3188_v13 = vmul.f32 %v9854_v46, %v10858_v37 }
 0x21d   : > { %3416 = vrot.lane.b32.xlu1 %v11057_v25, %s9872_s27  ;;  %v3847_v2 = vand.u32 4294901760, %v3846_v3  ;;  %2865 = vmatmul.mubr.f32.gmra.mrb[28].mxu0 %v10296_v31  ;;  %14023 = vst [vmem:[#allocation70_spill] sm:$0xff] %v11372_v20  ;;  %v11381_v25 = vld [vmem:[%s13590_s3 + $0x1c8] sm:$0xff]  ;;  %v3524_v59 = vsel %vm1238_vm1, %v3204_v52, %v3359_v24  ;;  %v14064_v20 = vld [vmem:[#allocation25_spill] sm:$0xff] }
 0x21e   : > { %9177 = vmatpush3.bf16.msra.mxu0 %v9176_v49  ;;  %v11388_v31 = vld [vmem:[%s13590_s3 + $0x148] sm:$0xff]  ;;  %v3641_v51 = vand.u32 4294901760, %v3524_v59 }
 0x21f   : > { %v11374_v55 = vpack.c.bf16 %v3847_v2, %v3840_v29  ;;  %v11423_v3 = vld [vmem:[%s13590_s3 + $0x1e8] sm:$0xff]  ;;  %v11444_v29 = vld [vmem:[%s13590_s3 + $0x178] sm:$0xff] }
 0x220   : > { %v3327_v53 = vpop.permute.xlu0 %3326  ;;  %v11430_v49 = vld [vmem:[%s13590_s3 + $0x168] sm:$0xff]  ;;  %v11473_v24 = vsub.f32 %v3524_v59, %v3641_v51  ;;  %v9856_v59 = vld [vmem:[%s13590_s3 + $0x60] sm:$0xff] }
 0x221   : > { %14024 = vst [vmem:[#allocation71_spill] sm:$0xff] %v11374_v55  ;;  %3384 = vrot.lane.b32.xlu1 %v14025_v9, %s9872_s27  ;;  %v3508_v17 = vsel %vm1238_vm1, %v3188_v13, %v3327_v53 }
 0x222   : > { %14029 = vst [vmem:[#allocation39_spill] sm:$0xff] %v11473_v24  ;;  %v3593_v37 = vand.u32 4294901760, %v3508_v17 }
 0x224   : > { %v3363_v43 = vpop.permute.xlu0 %3362 }
 0x225   : > { %3420 = vrot.lane.b32.xlu1 %v11381_v25, %s9872_s27 }
 0x226   : > { %v11390_v27 = vpop.f32.mrb[8].mxu0 }
 0x227   : > { %v11394_v58 = vpop.f32.mrb[9].mxu0 }
 0x228   : > { %v3331_v2 = vpop.permute.xlu0 %3330 }
 0x229   : > { %3388 = vrot.lane.b32.xlu1 %v11388_v31, %s9872_s27 }
 0x22b   : > { %v11403_v19 = vpop.f32.mrb[10].mxu0 }
 0x22c   : > { %v11407_v33 = vpop.f32.mrb[11].mxu0  ;;  %v3367_v9 = vpop.permute.xlu0 %3366 }
 0x22d   : > { %3424 = vrot.lane.b32.xlu1 %v11401_v26, %s9872_s27 }
 0x22f   : > { %v11414_v44 = vpop.f32.mrb[12].mxu0 }
 0x230   : > { %v11418_v40 = vpop.f32.mrb[13].mxu0  ;;  %v11448_v48 = vpop.permute.xlu0 %3334 }
 0x231   : > { %3392 = vrot.lane.b32.xlu1 %v11412_v41, %s9872_s27 }
 0x234   : > { %v11452_v62 = vpop.permute.xlu0 %3402 }
 0x235   : > { %3428 = vrot.lane.b32.xlu1 %v11423_v3, %s9872_s27 }
 0x238   : > { %v11466_v28 = vpop.permute.xlu0 %3370 }
 0x239   : > { %3396 = vrot.lane.b32.xlu1 %v11430_v49, %s9872_s27 }
 0x23d   : > { %3432 = vrot.lane.b32.xlu1 %v11437_v38, %s9872_s27 }
 0x241   : > { %3400 = vrot.lane.b32.xlu1 %v11444_v29, %s9872_s27 }
 0x256   : > { %v2873_v14 = vpop.permute.xlu1 %2872 }
 0x257   : > { %v2875_v15 = vsel %vm1169_vm6, %v14027_v42, %v2873_v14  ;;  %v9855_v42 = vld [vmem:[%s13590_s3 + $0xe0] sm:$0xff]  ;;  %v14030_v14 = vld [vmem:[#allocation19_spill] sm:$0xff] }
 0x258   : > { %v11468_v61 = vrot.slane %v2875_v15, %v2952_v12  ;;  %v3206_v10 = vmul.f32 %v9855_v42, %v14030_v14  ;;  %v11480_v15 = vpop.permute.xlu0 %3406 }
 0x25a   : > { %v3526_v46 = vsel %vm1238_vm1, %v3206_v10, %v3363_v43  ;;  %v13652_v10 = vand.u32 4294901760, %v11473_v24 }
 0x25c   : > { %v3361_v30 = vpop.permute.xlu1 %3360 }
 0x25d   : > { %v3525_v52 = vsel %vm1238_vm1, %v14028_v60, %v3361_v30  ;;  %v3190_v60 = vmul.f32 %v9856_v59, %v14030_v14  ;;  %v14033_v30 = vld [vmem:[#allocation9_spill] sm:$0xff] }
 0x25e   : > { %v3644_v0 = vand.u32 4294901760, %v3525_v52 }
 0x260   : > { %v11482_v12 = vsub.f32 %v3525_v52, %v3644_v0  ;;  %v11484_v13 = vpack.c.bf16 %v3644_v0, %v3641_v51  ;;  %v11495_v52 = vsub.f32 %v3508_v17, %v3593_v37  ;;  %v3647_v51 = vand.u32 4294901760, %v3526_v46  ;;  %v9857_v17 = vld [vmem:[%s13590_s3 + $0xf0] sm:$0xff] }
 0x261   : > { %v3329_v53 = vpop.permute.xlu1 %3328  ;;  %v3510_v0 = vsel %vm1238_vm1, %v3190_v60, %v3331_v2  ;;  %v3208_v16 = vmul.f32 %v9857_v17, %v11219_v45  ;;  %v11511_v2 = vpop.permute.xlu0 %3374  ;;  %v14037_v60 = vld [vmem:[#allocation14_spill] sm:$0xff] }
 0x262   : > { %14031 = vst [vmem:[#allocation2_spill] sm:$0xff] %v11482_v12  ;;  %14032 = vst [vmem:[#allocation20_spill] sm:$0xff] %v11484_v13  ;;  %v3509_v42 = vsel %vm1238_vm1, %v14033_v30, %v3329_v53  ;;  %9051 = vmatprep.subr.bf16.mxu1 %v11484_v13  ;;  %v3971_v43 = vand.u32 4294901760, %v11482_v12  ;;  %v3599_v13 = vand.u32 4294901760, %v3510_v0 }
 0x263   : > { %14034 = vst [vmem:[#allocation8_spill] sm:$0xff] %v11495_v52  ;;  %v3596_v11 = vand.u32 4294901760, %v3509_v42 }
 0x264   : > { %v9178_v57 = vpack.c.bf16 %v3971_v43, %v13652_v10  ;;  %v11501_v14 = vsub.f32 %v11482_v12, %v3971_v43  ;;  %v13659_v43 = vand.u32 4294901760, %v11495_v52  ;;  %v3528_v12 = vsel %vm1238_vm1, %v3208_v16, %v3367_v9  ;;  %v14042_v16 = vld [vmem:[#allocation15_spill] sm:$0xff] }
 0x265   : > { %v11503_v59 = vpack.c.bf16 %v3596_v11, %v3593_v37  ;;  %v11505_v53 = vsub.f32 %v3509_v42, %v3596_v11  ;;  %v3365_v30 = vpop.permute.xlu1 %3364  ;;  %v11516_v37 = vsub.f32 %v3526_v46, %v3647_v51  ;;  %v11530_v46 = vsub.f32 %v3510_v0, %v3599_v13 }
 0x266   : > { %v3527_v10 = vsel %vm1238_vm1, %v14037_v60, %v3365_v30  ;;  %9179 = vmatprep.subr.bf16.mxu0 %v9178_v57  ;;  %v9858_v30 = vld [vmem:[%s13590_s3 + $0x70] sm:$0xff] }
 0x267   : > { %14035 = vst [vmem:[#allocation19_spill] sm:$0xff] %v11503_v59  ;;  %14036 = vst [vmem:[#allocation9_spill] sm:$0xff] %v11505_v53  ;;  %v3859_v11 = vand.u32 4294901760, %v11505_v53  ;;  %v3650_v42 = vand.u32 4294901760, %v3527_v10  ;;  %9053 = vmatpush3.bf16.msra.mxu1 %v11503_v59  ;;  %v3192_v60 = vmul.f32 %v9858_v30, %v11219_v45  ;;  %v3653_v59 = vand.u32 4294901760, %v3528_v12 }
 0x268   : > { %14038 = vst [vmem:[#allocation14_spill] sm:$0xff] %v11516_v37  ;;  %14041 = vst [vmem:[#allocation74_spill] sm:$0xff] %v11530_v46 }
 0x269   : > { %v11522_v22 = vsub.f32 %v11505_v53, %v3859_v11  ;;  %v11524_v17 = vsub.f32 %v3527_v10, %v3650_v42  ;;  %v3333_v32 = vpop.permute.xlu1 %3332  ;;  %v11526_v34 = vpack.c.bf16 %v3650_v42, %v3647_v51  ;;  %v9180_v57 = vpack.c.bf16 %v3859_v11, %v13659_v43  ;;  %v11543_v42 = vpop.permute.xlu0 %3410 }
 0x26a   : > { %v3511_v9 = vsel %vm1238_vm1, %v14042_v16, %v3333_v32  ;;  %v13665_v51 = vand.u32 4294901760, %v11516_v37  ;;  %v3512_v0 = vsel %vm1238_vm1, %v3192_v60, %v11448_v48  ;;  %v11557_v8 = vsub.f32 %v3528_v12, %v3653_v59 }
 0x26b   : > { %14039 = vst [vmem:[#allocation72_spill] sm:$0xff] %v11524_v17  ;;  %14040 = vst [vmem:[#allocation73_spill] sm:$0xff] %v11526_v34  ;;  %v3602_v10 = vand.u32 4294901760, %v3511_v9  ;;  %9055 = vmatprep.subr.bf16.mxu1 %v11526_v34  ;;  %9181 = vmatpush3.bf16.msra.mxu0 %v9180_v57  ;;  %v3985_v11 = vand.u32 4294901760, %v11524_v17  ;;  %v14045_v57 = vld [vmem:[#allocation37_spill] sm:$0xff]  ;;  %v3605_v48 = vand.u32 4294901760, %v3512_v0 }
 0x26c   : > { %14046 = vst [vmem:[#allocation37_spill] sm:$0xff] %v11557_v8 }
 0x26d   : > { %v11545_v43 = vpack.c.bf16 %v3602_v10, %v3599_v13  ;;  %v11547_v30 = vsub.f32 %v3511_v9, %v3602_v10  ;;  %v3369_v53 = vpop.permute.xlu1 %3368  ;;  %v9182_v32 = vpack.c.bf16 %v3985_v11, %v13665_v51  ;;  %v11555_v56 = vsub.f32 %v11524_v17, %v3985_v11  ;;  %v11570_v12 = vpop.permute.xlu0 %3378 }
 0x26e   : > { %v3529_v34 = vsel %vm1238_vm1, %v14045_v57, %v3369_v53  ;;  %v14049_v53 = vand.u32 4294901760, %v11530_v46  ;;  %v14050_v57 = vld [vmem:[#allocation38_spill] sm:$0xff]  ;;  %v11574_v21 = vsub.f32 %v3512_v0, %v3605_v48 }
 0x26f   : > { %14043 = vst [vmem:[#allocation15_spill] sm:$0xff] %v11545_v43  ;;  %14044 = vst [vmem:[#allocation75_spill] sm:$0xff] %v11547_v30  ;;  %v3873_v13 = vand.u32 4294901760, %v11547_v30  ;;  %v3656_v60 = vand.u32 4294901760, %v3529_v34  ;;  %9057 = vmatpush3.bf16.msra.mxu1 %v11545_v43  ;;  %9183 = vmatprep.subr.bf16.mxu0 %v9182_v32 }
 0x270   : > { %14051 = vst [vmem:[#allocation38_spill] sm:$0xff] %v11574_v21 }
 0x271   : > { %v11562_v9 = vsub.f32 %v11547_v30, %v3873_v13  ;;  %v11564_v10 = vsub.f32 %v3529_v34, %v3656_v60  ;;  %v3337_v51 = vpop.permute.xlu1 %3336  ;;  %v11566_v16 = vpack.c.bf16 %v3656_v60, %v3653_v59  ;;  %v9184_v11 = vpack.c.bf16 %v3873_v13, %v14049_v53  ;;  %v14052_v59 = vld [vmem:[#allocation4_spill] sm:$0xff]  ;;  %v14055_v30 = vld [vmem:[#allocation10_spill] sm:$0xff] }
 0x272   : > { %v3513_v17 = vsel %vm1238_vm1, %v14050_v57, %v3337_v51  ;;  %v13673_v34 = vand.u32 4294901760, %v11557_v8  ;;  %v11582_v60 = vsel %vm1238_vm1, %v14052_v59, %v11452_v62 }
 0x273   : > { %14047 = vst [vmem:[#allocation76_spill] sm:$0xff] %v11564_v10  ;;  %14048 = vst [vmem:[#allocation77_spill] sm:$0xff] %v11566_v16  ;;  %v3608_v43 = vand.u32 4294901760, %v3513_v17  ;;  %9059 = vmatprep.subr.bf16.mxu1 %v11566_v16  ;;  %9185 = vmatpush3.bf16.msra.mxu0 %v9184_v11  ;;  %v3999_v32 = vand.u32 4294901760, %v11564_v10  ;;  %v13677_v11 = vand.u32 4294901760, %v11574_v21  ;;  %v13678_v62 = vand.u32 4294901760, %v11582_v60 }
 0x275   : > { %v11584_v13 = vpack.c.bf16 %v3608_v43, %v3605_v48  ;;  %v11586_v53 = vsub.f32 %v3513_v17, %v3608_v43  ;;  %v9186_v51 = vpack.c.bf16 %v3999_v32, %v13673_v34  ;;  %v11591_v57 = vsub.f32 %v11564_v10, %v3999_v32  ;;  %v3415_v43 = vpop.permute.xlu0 %3414  ;;  %v14056_v48 = vld [vmem:[#allocation5_spill] sm:$0xff] }
 0x276   : > { %v3405_v0 = vpop.permute.xlu1 %3404  ;;  %v11603_v32 = vsel %vm1238_vm1, %v14056_v48, %v11466_v28 }
 0x277   : > { %14053 = vst [vmem:[#allocation4_spill] sm:$0xff] %v11584_v13  ;;  %14054 = vst [vmem:[#allocation78_spill] sm:$0xff] %v11586_v53  ;;  %v3887_v16 = vand.u32 4294901760, %v11586_v53  ;;  %v3547_v55 = vsel %vm1238_vm1, %v14055_v30, %v3405_v0  ;;  %9061 = vmatpush3.bf16.msra.mxu1 %v11584_v13  ;;  %9187 = vmatprep.subr.bf16.mxu0 %v9186_v51  ;;  %v14058_v13 = vld [vmem:[#allocation11_spill] sm:$0xff]  ;;  %v13682_v28 = vand.u32 4294901760, %v11603_v32 }
 0x278   : > { %v4868_v17 = vand.u32 4294901760, %v3547_v55  ;;  %9063 = vmatprep.subr.bf16.mxu1 %v11105_v7 }
 0x279   : > { %v11606_v59 = vsub.f32 %v11586_v53, %v3887_v16  ;;  %v9188_v30 = vpack.c.bf16 %v3887_v16, %v13677_v11  ;;  %v14059_v16 = vld [vmem:[#allocation21_spill] sm:$0xff]  ;;  %v3383_v11 = vpop.permute.xlu0 %3382 }
 0x27a   : > { %v11610_v0 = vsub.f32 %v3547_v55, %v4868_v17  ;;  %v11614_v34 = vpack.c.bf16 %v4868_v17, %v13678_v62  ;;  %v11624_v55 = vsel %vm1238_vm1, %v14059_v16, %v11480_v15 }
 0x27b   : > { %v3373_v51 = vpop.permute.xlu1 %3372  ;;  %9189 = vmatpush3.bf16.msra.mxu0 %v9188_v30  ;;  %v13685_v10 = vand.u32 4294901760, %v11624_v55 }
 0x27c   : > { %14057 = vst [vmem:[#allocation10_spill] sm:$0xff] %v11614_v34  ;;  %v3531_v7 = vsel %vm1238_vm1, %v14058_v13, %v3373_v51  ;;  %9223 = vmatprep.subr.bf16.mxu0 %v11614_v34  ;;  %v13683_v53 = vand.u32 4294901760, %v11610_v0  ;;  %v14063_v51 = vld [vmem:[#allocation12_spill] sm:$0xff] }
 0x27d   : > { %v4820_v48 = vand.u32 4294901760, %v3531_v7  ;;  %v3419_v47 = vpop.permute.xlu0 %3418 }
 0x27e   : > { %v11635_v30 = vsub.f32 %v11610_v0, %v13683_v53 }
 0x27f   : > { %v11628_v17 = vpack.c.bf16 %v4820_v48, %v13682_v28  ;;  %v11630_v62 = vsub.f32 %v3531_v7, %v4820_v48  ;;  %v3409_v13 = vpop.permute.xlu1 %3408  ;;  %v11644_v28 = vsel %vm1238_vm1, %v14064_v20, %v11511_v2 }
 0x280   : > { %14062 = vst [vmem:[#allocation21_spill] sm:$0xff] %v11635_v30  ;;  %v3549_v34 = vsel %vm1238_vm1, %v14063_v51, %v3409_v13  ;;  %v14068_v51 = vld [vmem:[#allocation13_spill] sm:$0xff]  ;;  %v13686_v5 = vand.u32 4294901760, %v11644_v28 }
 0x281   : > { %14060 = vst [vmem:[#allocation5_spill] sm:$0xff] %v11628_v17  ;;  %14061 = vst [vmem:[#allocation11_spill] sm:$0xff] %v11630_v62  ;;  %v13684_v15 = vand.u32 4294901760, %v11630_v62  ;;  %v4874_v16 = vand.u32 4294901760, %v3549_v34 }
 0x283   : > { %v11649_v7 = vsub.f32 %v11630_v62, %v13684_v15  ;;  %v11651_v48 = vsub.f32 %v3549_v34, %v4874_v16  ;;  %v3377_v53 = vpop.permute.xlu1 %3376  ;;  %v11655_v13 = vpack.c.bf16 %v4874_v16, %v13685_v10  ;;  %v11664_v15 = vsel %vm1238_vm1, %v14069_v1, %v11543_v42 }
 0x284   : > { %v3533_v30 = vsel %vm1238_vm1, %v14068_v51, %v3377_v53  ;;  %v13691_v36 = vand.u32 4294901760, %v11664_v15 }
 0x285   : > { %14065 = vst [vmem:[#allocation12_spill] sm:$0xff] %v11649_v7  ;;  %14066 = vst [vmem:[#allocation25_spill] sm:$0xff] %v11651_v48  ;;  %v4826_v20 = vand.u32 4294901760, %v3533_v30  ;;  %v13687_v2 = vand.u32 4294901760, %v11651_v48  ;;  %v14072_v7 = vld [vmem:[#allocation17_spill] sm:$0xff] }
 0x286   : > { %14067 = vst [vmem:[#allocation79_spill] sm:$0xff] %v11655_v13 }
 0x287   : > { %v11668_v34 = vpack.c.bf16 %v4826_v20, %v13686_v5  ;;  %v11670_v16 = vsub.f32 %v3533_v30, %v4826_v20  ;;  %v3413_v10 = vpop.permute.xlu1 %3412  ;;  %v11677_v51 = vsub.f32 %v11651_v48, %v13687_v2  ;;  %v11684_v5 = vsel %vm1238_vm1, %v14074_v18, %v11570_v12  ;;  %v3387_v30 = vpop.permute.xlu0 %3386  ;;  %v14079_v12 = vld [vmem:[#allocation18_spill] sm:$0xff] }
 0x288   : > { %v3551_v53 = vsel %vm1238_vm1, %v14072_v7, %v3413_v10  ;;  %14075 = vst [vmem:[#allocation27_spill] sm:$0xff] %v11684_v5  ;;  %v13696_v48 = vand.u32 4294901760, %v11684_v5 }
 0x289   : > { %14070 = vst [vmem:[#allocation13_spill] sm:$0xff] %v11668_v34  ;;  %14071 = vst [vmem:[#allocation26_spill] sm:$0xff] %v11670_v16  ;;  %v13690_v1 = vand.u32 4294901760, %v11670_v16  ;;  %v4880_v42 = vand.u32 4294901760, %v3551_v53 }
 0x28a   : > { %14073 = vst [vmem:[#allocation17_spill] sm:$0xff] %v11677_v51  ;;  %v9859_v51 = vld [vmem:[%s13590_s3 + $0x1b0] sm:$0xff] }
 0x28b   : > { %v11689_v10 = vsub.f32 %v11670_v16, %v13690_v1  ;;  %v11691_v7 = vsub.f32 %v3551_v53, %v4880_v42  ;;  %v3381_v20 = vpop.permute.xlu1 %3380  ;;  %v11695_v2 = vpack.c.bf16 %v4880_v42, %v13691_v36  ;;  %v3232_v18 = vmul.f32 %v9859_v51, %v11219_v45  ;;  %v9860_v51 = vld [vmem:[%s13590_s3 + $0x130] sm:$0xff] }
 0x28c   : > { %v3535_v54 = vsel %vm1238_vm1, %v14079_v12, %v3381_v20  ;;  %v3216_v20 = vmul.f32 %v9860_v51, %v11219_v45  ;;  %v14083_v12 = vld [vmem:[#allocation41_spill] sm:$0xff] }
 0x28d   : > { %14076 = vst [vmem:[#allocation80_spill] sm:$0xff] %v11689_v10  ;;  %14077 = vst [vmem:[#allocation81_spill] sm:$0xff] %v11691_v7  ;;  %v4832_v1 = vand.u32 4294901760, %v3535_v54  ;;  %v13699_v53 = vand.u32 4294901760, %v11691_v7  ;;  %v11706_v10 = vsel %vm1238_vm1, %v3232_v18, %v3415_v43 }
 0x28e   : > { %14078 = vst [vmem:[#allocation82_spill] sm:$0xff] %v11695_v2  ;;  %14080 = vst [vmem:[#allocation18_spill] sm:$0xff] %v11706_v10  ;;  %v13704_v18 = vand.u32 4294901760, %v11706_v10  ;;  %v11728_v5 = vsel %vm1238_vm1, %v3216_v20, %v3383_v11  ;;  %v3235_v20 = vmul.f32 %v10802_v6, %v11381_v25 }
 0x28f   : > { %v11710_v42 = vpack.c.bf16 %v4832_v1, %v13696_v48  ;;  %v11712_v36 = vsub.f32 %v3535_v54, %v4832_v1  ;;  %v3417_v16 = vpop.permute.xlu1 %3416  ;;  %v11723_v43 = vsub.f32 %v11691_v7, %v13699_v53  ;;  %v3423_v48 = vpop.permute.xlu0 %3422  ;;  %14085 = vst [vmem:[#allocation85_spill] sm:$0xff] %v11728_v5  ;;  %v14089_v53 = vld [vmem:[#allocation42_spill] sm:$0xff]  ;;  %v13709_v7 = vand.u32 4294901760, %v11728_v5 }
 0x290   : > { %v3553_v62 = vsel %vm1238_vm1, %v14083_v12, %v3417_v16  ;;  %v3219_v5 = vmul.f32 %v10802_v6, %v11388_v31 }
 0x291   : > { %14081 = vst [vmem:[#allocation83_spill] sm:$0xff] %v11710_v42  ;;  %14082 = vst [vmem:[#allocation84_spill] sm:$0xff] %v11712_v36  ;;  %v13703_v54 = vand.u32 4294901760, %v11712_v36  ;;  %v4886_v1 = vand.u32 4294901760, %v3553_v62 }
 0x292   : > { %14084 = vst [vmem:[#allocation41_spill] sm:$0xff] %v11723_v43 }
 0x293   : > { %v11733_v45 = vsub.f32 %v11712_v36, %v13703_v54  ;;  %v11735_v16 = vsub.f32 %v3553_v62, %v4886_v1  ;;  %v3385_v51 = vpop.permute.xlu1 %3384  ;;  %v11739_v12 = vpack.c.bf16 %v4886_v1, %v13704_v18  ;;  %v14090_v54 = vld [vmem:[#allocation6_spill] sm:$0xff] }
 0x294   : > { %v3537_v43 = vsel %vm1238_vm1, %v14089_v53, %v3385_v51  ;;  %v11749_v62 = vsel %vm1238_vm1, %v14090_v54, %v3419_v47 }
 0x295   : > { %14086 = vst [vmem:[#allocation86_spill] sm:$0xff] %v11733_v45  ;;  %14087 = vst [vmem:[#allocation87_spill] sm:$0xff] %v11735_v16  ;;  %v4838_v42 = vand.u32 4294901760, %v3537_v43  ;;  %v13710_v11 = vand.u32 4294901760, %v11735_v16  ;;  %v3391_v45 = vpop.permute.xlu0 %3390  ;;  %v13716_v25 = vand.u32 4294901760, %v11749_v62 }
 0x296   : > { %14088 = vst [vmem:[#allocation88_spill] sm:$0xff] %v11739_v12  ;;  %14091 = vst [vmem:[#allocation42_spill] sm:$0xff] %v11749_v62 }
 0x297   : > { %v11753_v1 = vpack.c.bf16 %v4838_v42, %v13709_v7  ;;  %v11755_v18 = vsub.f32 %v3537_v43, %v4838_v42  ;;  %v3421_v53 = vpop.permute.xlu1 %3420  ;;  %v11761_v36 = vsub.f32 %v11735_v16, %v13710_v11  ;;  %v14095_v7 = vld [vmem:[#allocation3_spill] sm:$0xff] }
 0x298   : > { %v3555_v51 = vsel %vm1238_vm1, %v3235_v20, %v3421_v53  ;;  %v11769_v42 = vsel %vm1238_vm1, %v14095_v7, %v3387_v30  ;;  %v14100_v7 = vld [vmem:[#allocation7_spill] sm:$0xff] }
 0x299   : > { %14092 = vst [vmem:[#allocation6_spill] sm:$0xff] %v11753_v1  ;;  %14093 = vst [vmem:[#allocation89_spill] sm:$0xff] %v11755_v18  ;;  %v13715_v47 = vand.u32 4294901760, %v11755_v18  ;;  %v4892_v54 = vand.u32 4294901760, %v3555_v51  ;;  %v13719_v6 = vand.u32 4294901760, %v11769_v42  ;;  %v3427_v31 = vpop.permute.xlu0 %3426  ;;  %v3237_v10 = vmul.f32 %v14100_v7, %v11401_v26 }
 0x29a   : > { %14094 = vst [vmem:[#allocation90_spill] sm:$0xff] %v11761_v36  ;;  %14096 = vst [vmem:[#allocation3_spill] sm:$0xff] %v11769_v42  ;;  %v14111_v42 = vld [vmem:[#allocation22_spill] sm:$0xff] }
 0x29b   : > { %v11774_v43 = vsub.f32 %v11755_v18, %v13715_v47  ;;  %v11776_v20 = vsub.f32 %v3555_v51, %v4892_v54  ;;  %v3389_v53 = vpop.permute.xlu1 %3388  ;;  %v11780_v11 = vpack.c.bf16 %v4892_v54, %v13716_v25  ;;  %v14101_v47 = vld [vmem:[#allocation28_spill] sm:$0xff] }
 0x29c   : > { %v3539_v36 = vsel %vm1238_vm1, %v3219_v5, %v3389_v53  ;;  %v11789_v51 = vsel %vm1238_vm1, %v14101_v47, %v3423_v48  ;;  %v3221_v47 = vmul.f32 %v14100_v7, %v11412_v41 }
 0x29d   : > { %14097 = vst [vmem:[#allocation91_spill] sm:$0xff] %v11774_v43  ;;  %14098 = vst [vmem:[#allocation92_spill] sm:$0xff] %v11776_v20  ;;  %v4844_v16 = vand.u32 4294901760, %v3539_v36  ;;  %v13720_v30 = vand.u32 4294901760, %v11776_v20  ;;  %v13726_v26 = vand.u32 4294901760, %v11789_v51 }
 0x29e   : > { %14099 = vst [vmem:[#allocation93_spill] sm:$0xff] %v11780_v11  ;;  %14102 = vst [vmem:[#allocation7_spill] sm:$0xff] %v11789_v51 }
 0x29f   : > { %v11793_v43 = vpack.c.bf16 %v4844_v16, %v13719_v6  ;;  %v11795_v54 = vsub.f32 %v3539_v36, %v4844_v16  ;;  %v3425_v5 = vpop.permute.xlu1 %3424  ;;  %v11801_v25 = vsub.f32 %v11776_v20, %v13720_v30  ;;  %v14106_v6 = vld [vmem:[#allocation16_spill] sm:$0xff]  ;;  %v3395_v16 = vpop.permute.xlu0 %3394 }
 0x2a0   : > { %v3557_v53 = vsel %vm1238_vm1, %v3237_v10, %v3425_v5  ;;  %v11809_v36 = vsel %vm1238_vm1, %v14106_v6, %v3391_v45  ;;  %v3239_v6 = vmul.f32 %v10844_v35, %v11423_v3 }
 0x2a1   : > { %14103 = vst [vmem:[#allocation28_spill] sm:$0xff] %v11793_v43  ;;  %14104 = vst [vmem:[#allocation94_spill] sm:$0xff] %v11795_v54  ;;  %v13725_v18 = vand.u32 4294901760, %v11795_v54  ;;  %v4898_v48 = vand.u32 4294901760, %v3557_v53  ;;  %v13727_v41 = vand.u32 4294901760, %v11809_v36 }
 0x2a2   : > { %14105 = vst [vmem:[#allocation95_spill] sm:$0xff] %v11801_v25  ;;  %14107 = vst [vmem:[#allocation16_spill] sm:$0xff] %v11809_v36  ;;  %v14116_v36 = vld [vmem:[#allocation23_spill] sm:$0xff] }
 0x2a3   : > { %v11814_v10 = vsub.f32 %v11795_v54, %v13725_v18  ;;  %v11816_v5 = vsub.f32 %v3557_v53, %v4898_v48  ;;  %v3393_v30 = vpop.permute.xlu1 %3392  ;;  %v11820_v25 = vpack.c.bf16 %v4898_v48, %v13726_v26  ;;  %v11829_v18 = vsel %vm1238_vm1, %v14111_v42, %v3427_v31 }
 0x2a4   : > { %v3541_v20 = vsel %vm1238_vm1, %v3221_v47, %v3393_v30  ;;  %14112 = vst [vmem:[#allocation22_spill] sm:$0xff] %v11829_v18  ;;  %v13732_v3 = vand.u32 4294901760, %v11829_v18 }
 0x2a5   : > { %14108 = vst [vmem:[#allocation96_spill] sm:$0xff] %v11814_v10  ;;  %14109 = vst [vmem:[#allocation97_spill] sm:$0xff] %v11816_v5  ;;  %v4850_v7 = vand.u32 4294901760, %v3541_v20  ;;  %v13730_v45 = vand.u32 4294901760, %v11816_v5  ;;  %v3431_v10 = vpop.permute.xlu0 %3430 }
 0x2a6   : > { %14110 = vst [vmem:[#allocation98_spill] sm:$0xff] %v11820_v25 }
 0x2a7   : > { %v11833_v53 = vpack.c.bf16 %v4850_v7, %v13727_v41  ;;  %v11835_v48 = vsub.f32 %v3541_v20, %v4850_v7  ;;  %v3429_v26 = vpop.permute.xlu1 %3428  ;;  %v11841_v47 = vsub.f32 %v11816_v5, %v13730_v45  ;;  %v3223_v41 = vmul.f32 %v10844_v35, %v11430_v49 }
 0x2a8   : > { %v3559_v30 = vsel %vm1238_vm1, %v3239_v6, %v3429_v26  ;;  %v11849_v20 = vsel %vm1238_vm1, %v14116_v36, %v3395_v16  ;;  %v3241_v16 = vmul.f32 %v11047_v23, %v11437_v38 }
 0x2a9   : > { %14113 = vst [vmem:[#allocation99_spill] sm:$0xff] %v11833_v53  ;;  %14114 = vst [vmem:[#allocation100_spill] sm:$0xff] %v11835_v48  ;;  %v13731_v42 = vand.u32 4294901760, %v11835_v48  ;;  %v4904_v31 = vand.u32 4294901760, %v3559_v30  ;;  %v13736_v35 = vand.u32 4294901760, %v11849_v20 }
 0x2aa   : > { %14115 = vst [vmem:[#allocation101_spill] sm:$0xff] %v11841_v47  ;;  %14117 = vst [vmem:[#allocation23_spill] sm:$0xff] %v11849_v20  ;;  %v3225_v20 = vmul.f32 %v11047_v23, %v11444_v29 }
 0x2ab   : > { %v11854_v26 = vsub.f32 %v11835_v48, %v13731_v42  ;;  %v11856_v7 = vsub.f32 %v3559_v30, %v4904_v31  ;;  %v3397_v6 = vpop.permute.xlu1 %3396  ;;  %v11860_v45 = vpack.c.bf16 %v4904_v31, %v13732_v3  ;;  %v11869_v42 = vsel %vm1238_vm1, %v11288_v39, %v3431_v10  ;;  %v3399_v30 = vpop.permute.xlu0 %3398 }
 0x2ac   : > { %v3543_v47 = vsel %vm1238_vm1, %v3223_v41, %v3397_v6  ;;  %14121 = vst [vmem:[#allocation105_spill] sm:$0xff] %v11869_v42  ;;  %v13738_v38 = vand.u32 4294901760, %v11869_v42 }
 0x2ad   : > { %14118 = vst [vmem:[#allocation102_spill] sm:$0xff] %v11854_v26  ;;  %14119 = vst [vmem:[#allocation103_spill] sm:$0xff] %v11856_v7  ;;  %v4856_v49 = vand.u32 4294901760, %v3543_v47  ;;  %v13735_v36 = vand.u32 4294901760, %v11856_v7 }
 0x2ae   : > { %14120 = vst [vmem:[#allocation104_spill] sm:$0xff] %v11860_v45 }
 0x2af   : > { %v11873_v26 = vpack.c.bf16 %v4856_v49, %v13736_v35  ;;  %v11875_v31 = vsub.f32 %v3543_v47, %v4856_v49  ;;  %v3433_v41 = vpop.permute.xlu1 %3432  ;;  %v11881_v3 = vsub.f32 %v11856_v7, %v13735_v36  ;;  %v11889_v47 = vsel %vm1238_vm1, %v11298_v50, %v3399_v30 }
 0x2b0   : > { %v3561_v6 = vsel %vm1238_vm1, %v3241_v16, %v3433_v41  ;;  %14125 = vst [vmem:[#allocation109_spill] sm:$0xff] %v11889_v47  ;;  %v13739_v23 = vand.u32 4294901760, %v11889_v47 }
 0x2b1   : > { %14122 = vst [vmem:[#allocation106_spill] sm:$0xff] %v11873_v26  ;;  %14123 = vst [vmem:[#allocation107_spill] sm:$0xff] %v11875_v31  ;;  %v13737_v39 = vand.u32 4294901760, %v11875_v31  ;;  %v4910_v10 = vand.u32 4294901760, %v3561_v6 }
 0x2b2   : > { %14124 = vst [vmem:[#allocation108_spill] sm:$0xff] %v11881_v3  ;;  %v14137_v3 = vand.u32 4294901760, %v11574_v21 }
 0x2b3   : > { %v11894_v49 = vsub.f32 %v11875_v31, %v13737_v39  ;;  %v11896_v16 = vsub.f32 %v3561_v6, %v4910_v10  ;;  %v3401_v41 = vpop.permute.xlu1 %3400  ;;  %v11900_v36 = vpack.c.bf16 %v4910_v10, %v13738_v38 }
 0x2b4   : > { %v3545_v35 = vsel %vm1238_vm1, %v3225_v20, %v3401_v41  ;;  %v14133_v41 = vand.u32 4294901760, %v11473_v24 }
 0x2b5   : > { %14126 = vst [vmem:[#allocation110_spill] sm:$0xff] %v11894_v49  ;;  %14127 = vst [vmem:[#allocation111_spill] sm:$0xff] %v11896_v16  ;;  %v4862_v29 = vand.u32 4294901760, %v3545_v35  ;;  %v13740_v50 = vand.u32 4294901760, %v11896_v16 }
 0x2b6   : > { %14128 = vst [vmem:[#allocation112_spill] sm:$0xff] %v11900_v36  ;;  %v3965_v38 = vsub.f32 %v11473_v24, %v14133_v41 }
 0x2b7   : > { %v11907_v30 = vpack.c.bf16 %v4862_v29, %v13739_v23  ;;  %v11909_v39 = vsub.f32 %v3545_v35, %v4862_v29  ;;  %v11914_v6 = vsub.f32 %v11896_v16, %v13740_v50  ;;  %v14134_v23 = vand.u32 4294901760, %v11495_v52 }
 0x2b8   : > { %v14135_v29 = vand.u32 4294901760, %v11530_v46  ;;  %v3966_v16 = vand.u32 4294901760, %v3965_v38  ;;  %v14142_v38 = vand.u32 4294901760, %v11624_v55 }
 0x2b9   : > { %14129 = vst [vmem:[#allocation113_spill] sm:$0xff] %v11907_v30  ;;  %14130 = vst [vmem:[#allocation114_spill] sm:$0xff] %v11909_v39  ;;  %v13741_v10 = vand.u32 4294901760, %v11909_v39  ;;  %v3853_v35 = vsub.f32 %v11495_v52, %v14134_v23 }
 0x2ba   : > { %14131 = vst [vmem:[#allocation115_spill] sm:$0xff] %v11914_v6  ;;  %v3867_v50 = vsub.f32 %v11530_v46, %v14135_v29  ;;  %v14136_v6 = vand.u32 4294901760, %v11516_v37 }
 0x2bb   : > { %v11920_v20 = vsub.f32 %v11909_v39, %v13741_v10  ;;  %v11937_v10 = vsub.f32 %v11574_v21, %v14137_v3  ;;  %v3854_v29 = vand.u32 4294901760, %v3853_v35  ;;  %v14139_v3 = vand.u32 4294901760, %v11582_v60 }
 0x2bc   : > { %v3979_v49 = vsub.f32 %v11516_v37, %v14136_v6  ;;  %v3868_v46 = vand.u32 4294901760, %v3867_v50 }
 0x2bd   : > { %14132 = vst [vmem:[#allocation116_spill] sm:$0xff] %v11920_v20  ;;  %v14138_v20 = vand.u32 4294901760, %v11557_v8  ;;  %v11950_v21 = vsub.f32 %v11582_v60, %v14139_v3  ;;  %v3861_v3 = vand.u32 4294901760, %v11522_v22 }
 0x2be   : > { %v3980_v6 = vand.u32 4294901760, %v3979_v49 }
 0x2bf   : > { %v11942_v41 = vsub.f32 %v11557_v8, %v14138_v20  ;;  %v2009_v39 = vpop.f32.mrb[10].mxu1  ;;  %v14140_v8 = vand.u32 4294901760, %v11603_v32 }
 0x2c0   : > { %v9464_v23 = vadd.f32 %v2009_v39, %v11390_v27  ;;  %v2011_v52 = vpop.f32.mrb[11].mxu1 }
 0x2c1   : > { %v9465_v24 = vadd.f32 %v2011_v52, %v11394_v58  ;;  %v11956_v27 = vsub.f32 %v11603_v32, %v14140_v8  ;;  %v11961_v58 = vsub.f32 %v11624_v55, %v14142_v38  ;;  %v3973_v8 = vand.u32 4294901760, %v11501_v14 }
 0x2c2   : > { %vm2876_vm12 = vcmp.ge.f32.partialorder %v9464_v23, 0.0  ;;  %v14144_v32 = vand.u32 4294901760, %v11644_v28 }
 0x2c3   : > { %14141 = vst [vmem:[#allocation117_spill] sm:$0xff] %v11956_v27  ;;  %14143 = vst [vmem:[#allocation118_spill] sm:$0xff] %v11961_v58  ;;  %v2918_v52 = vsel %vm2876_vm12, %v11450_v63, %v11396_v4  ;;  %vm2877_vm13 = vcmp.ge.f32.partialorder %v9465_v24, 0.0  ;;  %v2016_v39 = vpop.f32.mrb[12].mxu1  ;;  %v14173_v58 = vld [vmem:[#allocation51_spill] sm:$0xff] }
 0x2c4   : > { %v2954_v60 = vsub.f32 %v11468_v61, %v2918_v52  ;;  %v2919_v49 = vsel %vm2877_vm13, %v11450_v63, %v11396_v4  ;;  %v9466_v50 = vadd.f32 %v2016_v39, %v11403_v19  ;;  %v2018_v35 = vpop.f32.mrb[13].mxu1  ;;  %v11973_v55 = vsub.f32 %v11644_v28, %v14144_v32 }
 0x2c5   : > { %v2955_v38 = vsub.f32 %v11468_v61, %v2919_v49  ;;  %v9467_v37 = vadd.f32 %v2018_v35, %v11407_v33  ;;  %v3875_v52 = vand.u32 4294901760, %v11562_v9  ;;  %v3987_v19 = vand.u32 4294901760, %v11555_v56 }
 0x2c6   : > { %14145 = vst [vmem:[#allocation119_spill] sm:$0xff] %v11973_v55  ;;  %v2986_v20 = vmul.f32 %v9464_v23, %v2954_v60  ;;  %vm2880_vm14 = vcmp.ge.f32.partialorder %v9466_v50, 0.0  ;;  %v14146_v39 = vand.u32 4294901760, %v11664_v15  ;;  %v11991_v56 = vpack.c.bf16 %v3973_v8, %v3966_v16 }
 0x2c7   : > { %v2987_v47 = vmul.f32 %v9465_v24, %v2955_v38  ;;  %v2922_v28 = vsel %vm2880_vm14, %v11450_v63, %v11396_v4  ;;  %vm2881_vm15 = vcmp.ge.f32.partialorder %v9467_v37, 0.0  ;;  %v2023_v22 = vpop.f32.mrb[14].mxu1  ;;  %v11995_v35 = vpack.c.bf16 %v3861_v3, %v3854_v29 }
 0x2c8   : > { %v11983_v14 = vsub.f32 %v11664_v15, %v14146_v39  ;;  %v2958_v49 = vsub.f32 %v11468_v61, %v2922_v28  ;;  %v2923_v33 = vsel %vm2881_vm15, %v11450_v63, %v11396_v4  ;;  %v9468_v9 = vadd.f32 %v2023_v22, %v11414_v44  ;;  %v2025_v23 = vpop.f32.mrb[15].mxu1 }
 0x2c9   : > { %v3018_v60 = vmul.f32 1.442695, %v2986_v20  ;;  %v2959_v15 = vsub.f32 %v11468_v61, %v2923_v33  ;;  %v9469_v24 = vadd.f32 %v2025_v23, %v11418_v40  ;;  %v11997_v38 = vpack.c.bf16 %v3987_v19, %v3980_v6 }
 0x2ca   : > { %14147 = vst [vmem:[#allocation120_spill] sm:$0xff] %v11983_v14  ;;  %v2990_v32 = vmul.f32 %v9466_v50, %v2958_v49  ;;  %vm2884_vm2 = vcmp.ge.f32.partialorder %v9468_v9, 0.0  ;;  %v11999_v39 = vpack.c.bf16 %v3875_v52, %v3868_v46  ;;  %v3020_v28 = vmul.f32 1.442695, %v2987_v47  ;;  %v14159_v14 = vld [vmem:[#allocation83_spill] sm:$0xff] }
 0x2cb   : > { %v2991_v42 = vmul.f32 %v9467_v37, %v2959_v15  ;;  %v2926_v44 = vsel %vm2884_vm2, %v11450_v63, %v11396_v4  ;;  %vm2885_vm3 = vcmp.ge.f32.partialorder %v9469_v24, 0.0  ;;  %v2030_v16 = vpop.f32.mrb[0].mxu1  ;;  %9773 = vpow2.f32 %v3018_v60 }
 0x2cc   : > { %v3026_v20 = vmul.f32 1.442695, %v2990_v32  ;;  %v2962_v8 = vsub.f32 %v11468_v61, %v2926_v44  ;;  %v2927_v40 = vsel %vm2885_vm3, %v11450_v63, %v11396_v4  ;;  %vm2888_vm4 = vcmp.ge.f32.partialorder %v2030_v16, 0.0  ;;  %v2032_v29 = vpop.f32.mrb[1].mxu1 }
 0x2cd   : > { %v2963_v6 = vsub.f32 %v11468_v61, %v2927_v40  ;;  %v2930_v46 = vsel %vm2888_vm4, %v11450_v63, %v11396_v4  ;;  %vm2889_vm5 = vcmp.ge.f32.partialorder %v2032_v29, 0.0  ;;  %v3028_v37 = vmul.f32 1.442695, %v2991_v42 }
 0x2ce   : > { %v2994_v47 = vmul.f32 %v9468_v9, %v2962_v8  ;;  %v2966_v50 = vsub.f32 %v11468_v61, %v2930_v46  ;;  %v2931_v3 = vsel %vm2889_vm5, %v11450_v63, %v11396_v4  ;;  %9775 = vpow2.f32 %v3020_v28 }
 0x2cf   : > { %v2995_v52 = vmul.f32 %v9469_v24, %v2963_v6  ;;  %v2967_v19 = vsub.f32 %v11468_v61, %v2931_v3  ;;  %v2037_v22 = vpop.f32.mrb[2].mxu1  ;;  %v4001_v49 = vand.u32 4294901760, %v11591_v57  ;;  %9777 = vpow2.f32 %v3026_v20 }
 0x2d0   : > { %v3034_v33 = vmul.f32 1.442695, %v2994_v47  ;;  %v2998_v23 = vmul.f32 %v2966_v50, %v2030_v16  ;;  %vm2892_vm6 = vcmp.ge.f32.partialorder %v2037_v22, 0.0  ;;  %v2039_v60 = vpop.f32.mrb[3].mxu1  ;;  %9779 = vpow2.f32 %v3028_v37 }
 0x2d1   : > { %v3036_v15 = vmul.f32 1.442695, %v2995_v52  ;;  %v2999_v42 = vmul.f32 %v2967_v19, %v2032_v29  ;;  %v2934_v9 = vsel %vm2892_vm6, %v11450_v63, %v11396_v4  ;;  %vm2893_vm7 = vcmp.ge.f32.partialorder %v2039_v60, 0.0 }
 0x2d2   : > { %v3042_v32 = vmul.f32 1.442695, %v2998_v23  ;;  %v2970_v24 = vsub.f32 %v11468_v61, %v2934_v9  ;;  %v2935_v28 = vsel %vm2893_vm7, %v11450_v63, %v11396_v4  ;;  %9781 = vpow2.f32 %v3034_v33 }
 0x2d3   : > { %v3044_v57 = vmul.f32 1.442695, %v2999_v42  ;;  %v2971_v44 = vsub.f32 %v11468_v61, %v2935_v28  ;;  %v2044_v16 = vpop.f32.mrb[4].mxu1  ;;  %v14148_v20 = vand.u32 4294901760, %v11942_v41  ;;  %9783 = vpow2.f32 %v3036_v15 }
 0x2d4   : > { %v3002_v29 = vmul.f32 %v2970_v24, %v2037_v22  ;;  %vm2896_vm8 = vcmp.ge.f32.partialorder %v2044_v16, 0.0  ;;  %v2817_v6 = vpop.f32.mrb[14].mxu0  ;;  %v2046_v46 = vpop.f32.mrb[5].mxu1  ;;  %9785 = vpow2.f32 %v3042_v32 }
 0x2d5   : > { %v12022_v8 = vpack.c.bf16 %v4001_v49, %v14148_v20  ;;  %v3003_v37 = vmul.f32 %v2971_v44, %v2039_v60  ;;  %v2938_v47 = vsel %vm2896_vm8, %v11450_v63, %v11396_v4  ;;  %vm2878_vm9 = vcmp.ge.f32.partialorder %v2817_v6, 0.0  ;;  %v2819_v50 = vpop.f32.mrb[15].mxu0  ;;  %v12030_v19 = vpop.eup %9773 }
 0x2d6   : > { %v3050_v3 = vmul.f32 1.442695, %v3002_v29  ;;  %v2974_v52 = vsub.f32 %v11468_v61, %v2938_v47  ;;  %v2920_v41 = vsel %vm2878_vm9, %v11450_v63, %v11396_v4  ;;  %vm2897_vm10 = vcmp.ge.f32.partialorder %v2046_v46, 0.0 }
 0x2d7   : > { %9787 = vpow2.f32 %v3044_v57  ;;  %v2956_v22 = vsub.f32 %v11468_v61, %v2920_v41  ;;  %v2939_v49 = vsel %vm2897_vm10, %v11450_v63, %v11396_v4  ;;  %vm2879_vm11 = vcmp.ge.f32.partialorder %v2819_v50, 0.0  ;;  %v2051_v33 = vpop.f32.mrb[6].mxu1 }
 0x2d8   : > { %v3052_v23 = vmul.f32 1.442695, %v3003_v37  ;;  %v3006_v60 = vmul.f32 %v2974_v52, %v2044_v16  ;;  %v2975_v15 = vsub.f32 %v11468_v61, %v2939_v49  ;;  %v2921_v42 = vsel %vm2879_vm11, %v11450_v63, %v11396_v4  ;;  %v2824_v9 = vpop.f32.mrb[16].mxu0  ;;  %v2053_v32 = vpop.f32.mrb[7].mxu1 }
 0x2d9   : > { %v12038_v24 = vpop.eup %9775  ;;  %9789 = vpow2.f32 %v3050_v3  ;;  %v2988_v28 = vmul.f32 %v2956_v22, %v2817_v6  ;;  %v2957_v57 = vsub.f32 %v11468_v61, %v2921_v42  ;;  %vm2900_vm12 = vcmp.ge.f32.partialorder %v2051_v33, 0.0  ;;  %v2826_v44 = vpop.f32.mrb[17].mxu0 }
 0x2da   : > { %v12041_v20 = vpop.eup %9777  ;;  %v3058_v29 = vmul.f32 1.442695, %v3006_v60  ;;  %v3007_v37 = vmul.f32 %v2975_v15, %v2046_v46  ;;  %v2942_v16 = vsel %vm2900_vm12, %v11450_v63, %v11396_v4  ;;  %vm2882_vm13 = vcmp.ge.f32.partialorder %v2824_v9, 0.0 }
 0x2db   : > { %v3022_v47 = vmul.f32 1.442695, %v2988_v28  ;;  %v2989_v52 = vmul.f32 %v2957_v57, %v2819_v50  ;;  %v2978_v41 = vsub.f32 %v11468_v61, %v2942_v16  ;;  %v2924_v3 = vsel %vm2882_vm13, %v11450_v63, %v11396_v4  ;;  %v2058_v6 = vpop.f32.mrb[8].mxu1  ;;  %v12048_v22 = vpop.eup %9779 }
 0x2dc   : > { %9791 = vpow2.f32 %v3052_v23  ;;  %v3060_v49 = vmul.f32 1.442695, %v3007_v37  ;;  %v2960_v42 = vsub.f32 %v11468_v61, %v2924_v3  ;;  %vm2901_vm14 = vcmp.ge.f32.partialorder %v2053_v32, 0.0  ;;  %v2831_v46 = vpop.f32.mrb[18].mxu0  ;;  %v2060_v60 = vpop.f32.mrb[9].mxu1 }
 0x2dd   : > { %v12051_v15 = vpop.eup %9781  ;;  %9793 = vpow2.f32 %v3022_v47  ;;  %v3024_v28 = vmul.f32 1.442695, %v2989_v52  ;;  %v3010_v50 = vmul.f32 %v2978_v41, %v2051_v33  ;;  %v2943_v57 = vsel %vm2901_vm14, %v11450_v63, %v11396_v4  ;;  %v2833_v16 = vpop.f32.mrb[19].mxu0 }
 0x2de   : > { %v12055_v40 = vpop.eup %9783  ;;  %9795 = vpow2.f32 %v3058_v29  ;;  %v2992_v31 = vmul.f32 %v2960_v42, %v2824_v9  ;;  %v2979_v23 = vsub.f32 %v11468_v61, %v2943_v57  ;;  %vm2883_vm15 = vcmp.ge.f32.partialorder %v2826_v44, 0.0 }
 0x2df   : > { %v12058_v37 = vpop.eup %9785  ;;  %9797 = vpow2.f32 %v3060_v49  ;;  %v3066_v3 = vmul.f32 1.442695, %v3010_v50  ;;  %v2925_v47 = vsel %vm2883_vm15, %v11450_v63, %v11396_v4  ;;  %v12063_v33 = vand.u32 4294901760, %v12038_v24 }
 0x2e0   : > { %v3030_v52 = vmul.f32 1.442695, %v2992_v31  ;;  %v3011_v41 = vmul.f32 %v2979_v23, %v2053_v32  ;;  %v2961_v7 = vsub.f32 %v11468_v61, %v2925_v47  ;;  %v12067_v29 = vand.u32 4294901760, %v12030_v19  ;;  %v12069_v9 = vpop.f32.mrb[20].mxu0 }
 0x2e1   : > { %14149 = vst [vmem:[#allocation121_spill] sm:$0xff] %v12063_v33  ;;  %v12071_v42 = vpop.eup %9787  ;;  %9799 = vpow2.f32 %v3024_v28  ;;  %4607 = vmatprep.mubr.f32.mxu0 %v12063_v33  ;;  %vm2904_vm2 = vcmp.ge.f32.partialorder %v2058_v6, 0.0  ;;  %vm2886_vm3 = vcmp.ge.f32.partialorder %v2831_v46, 0.0  ;;  %vm2905_vm4 = vcmp.ge.f32.partialorder %v2060_v60, 0.0  ;;  %v12074_v49 = vpop.f32.mrb[21].mxu0 }
 0x2e2   : > { %14150 = vst [vmem:[#allocation122_spill] sm:$0xff] %v12067_v29  ;;  %9801 = vpow2.f32 %v3066_v3  ;;  %v2993_v31 = vmul.f32 %v2961_v7, %v2826_v44  ;;  %4609 = vmatmul.mubr.f32.vlgmr.msra.gmra.mrb[30].mxu0 %v12067_v29  ;;  %v2946_v32 = vsel %vm2904_vm2, %v11450_v63, %v11396_v4  ;;  %v2928_v23 = vsel %vm2886_vm3, %v11450_v63, %v11396_v4 }
 0x2e3   : > { %v12081_v57 = vpop.eup %9789  ;;  %9225 = vmatpush3.bf16.msra.mxu0 %v11628_v17  ;;  %v2982_v28 = vsub.f32 %v11468_v61, %v2946_v32  ;;  %v2947_v7 = vsel %vm2905_vm4, %v11450_v63, %v11396_v4  ;;  %vm2887_vm5 = vcmp.ge.f32.partialorder %v2833_v16, 0.0  ;;  %9803 = vpow2.f32 %v3030_v52 }
 0x2e4   : > { %v3068_v44 = vmul.f32 1.442695, %v3011_v41  ;;  %9227 = vmatprep.subr.bf16.mxu0 %v11655_v13  ;;  %v2964_v3 = vsub.f32 %v11468_v61, %v2928_v23  ;;  %v2983_v47 = vsub.f32 %v11468_v61, %v2947_v7  ;;  %v12092_v50 = vpop.f32.mrb[22].mxu0  ;;  %v3032_v17 = vmul.f32 1.442695, %v2993_v31 }
 0x2e5   : > { %v3014_v18 = vmul.f32 %v2982_v28, %v2058_v6  ;;  %v2929_v32 = vsel %vm2887_vm5, %v11450_v63, %v11396_v4  ;;  %v12097_v48 = vand.u32 4294901760, %v12048_v22  ;;  %v12099_v5 = vpop.f32.mrb[23].mxu0  ;;  %v12105_v7 = vand.u32 4294901760, %v12041_v20 }
 0x2e6   : > { %v12101_v52 = vpop.eup %9791  ;;  %v2996_v41 = vmul.f32 %v2964_v3, %v2831_v46  ;;  %v3015_v13 = vmul.f32 %v2983_v47, %v2060_v60  ;;  %v2965_v23 = vsub.f32 %v11468_v61, %v2929_v32  ;;  %vm2890_vm6 = vcmp.ge.f32.partialorder %v12069_v9, 0.0 }
 0x2e7   : > { %14151 = vst [vmem:[#allocation123_spill] sm:$0xff] %v12097_v48  ;;  %14152 = vst [vmem:[#allocation124_spill] sm:$0xff] %v12105_v7  ;;  %v9794_v51 = vpop.eup %9793  ;;  %v3074_v31 = vmul.f32 1.442695, %v3014_v18  ;;  %4614 = vmatprep.mubr.f32.mxu0 %v12097_v48  ;;  %9229 = vmatpush3.bf16.msra.mxu0 %v11668_v34  ;;  %vm2891_vm7 = vcmp.ge.f32.partialorder %v12074_v49, 0.0  ;;  %v12113_v6 = vsub.f32 %v12038_v24, %v12063_v33  ;;  %9805 = vpow2.f32 %v3068_v44 }
 0x2e8   : > { %v12115_v46 = vpop.eup %9795  ;;  %v3038_v60 = vmul.f32 1.442695, %v2996_v41  ;;  %v2997_v28 = vmul.f32 %v2965_v23, %v2833_v16  ;;  %4616 = vmatmul.mubr.f32.gmra.mrb[32].mxu0 %v12105_v7  ;;  %9231 = vmatprep.subr.bf16.mxu0 %v11695_v2  ;;  %v12119_v18 = vpop.f32.mrb[24].mxu0  ;;  %v14154_v3 = vand.u32 4294901760, %v11937_v10  ;;  %v14155_v47 = vand.u32 4294901760, %v11606_v59  ;;  %v14156_v23 = vld [vmem:[#allocation11_spill] sm:$0xff] }
 0x2e9   : > { %14153 = vst [vmem:[#allocation125_spill] sm:$0xff] %v12113_v6  ;;  %v12127_v34 = vpop.eup %9797  ;;  %9807 = vpow2.f32 %v3032_v17  ;;  %v2932_v24 = vsel %vm2890_vm6, %v11450_v63, %v11396_v4  ;;  %v2933_v16 = vsel %vm2891_vm7, %v11450_v63, %v11396_v4  ;;  %v13784_v44 = vand.u32 4294901760, %v12113_v6  ;;  %v12134_v41 = vpop.f32.mrb[25].mxu0 }
 0x2ea   : > { %v12125_v32 = vpack.c.bf16 %v14155_v47, %v14154_v3  ;;  %v12138_v2 = vand.u32 4294901760, %v9794_v51  ;;  %9809 = vpow2.f32 %v3074_v31  ;;  %v3040_v47 = vmul.f32 1.442695, %v2997_v28 }
 0x2eb   : > { %v12142_v17 = vpop.eup %9799  ;;  %v2968_v54 = vsub.f32 %v11468_v61, %v2932_v24  ;;  %v2969_v62 = vsub.f32 %v11468_v61, %v2933_v16  ;;  %v3661_v33 = vsub.f32 %v12113_v6, %v13784_v44  ;;  %9233 = vmatpush3.bf16.msra.mxu0 %v14159_v14  ;;  %9811 = vpow2.f32 %v3038_v60 }
 0x2ec   : > { %14157 = vst [vmem:[#allocation11_spill] sm:$0xff] %v12138_v2  ;;  %v12150_v10 = vpop.eup %9801  ;;  %v3076_v31 = vmul.f32 1.442695, %v3015_v13  ;;  %v12153_v55 = vand.u32 4294901760, %v12055_v40  ;;  %v12157_v28 = vsub.f32 %v12030_v19, %v12067_v29  ;;  %9235 = vmatprep.subr.bf16.mxu0 %v11739_v12  ;;  %v12160_v24 = vpop.f32.mrb[26].mxu0  ;;  %v12165_v14 = vand.u32 4294901760, %v12051_v15 }
 0x2ed   : > { %v3000_v16 = vmul.f32 %v2968_v54, %v12069_v9  ;;  %v3001_v44 = vmul.f32 %v2969_v62, %v12074_v49  ;;  %v3662_v3 = vand.u32 4294901760, %v3661_v33  ;;  %v12167_v13 = vpop.f32.mrb[27].mxu0  ;;  %v12169_v60 = vpop.eup %9803  ;;  %v12174_v12 = vand.u32 4294901760, %v12071_v42 }
 0x2ee   : > { %14160 = vst [vmem:[#allocation126_spill] sm:$0xff] %v12153_v55  ;;  %14161 = vst [vmem:[#allocation127_spill] sm:$0xff] %v12157_v28  ;;  %4621 = vmatprep.mubr.f32.mxu0 %v12153_v55  ;;  %v13791_v19 = vand.u32 4294901760, %v12157_v28  ;;  %vm2894_vm8 = vcmp.ge.f32.partialorder %v12092_v50, 0.0  ;;  %vm2895_vm9 = vcmp.ge.f32.partialorder %v12099_v5, 0.0  ;;  %9813 = vpow2.f32 %v3040_v47 }
 0x2ef   : > { %14162 = vst [vmem:[#allocation128_spill] sm:$0xff] %v12165_v14  ;;  %14163 = vst [vmem:[#allocation129_spill] sm:$0xff] %v12174_v12  ;;  %v3046_v62 = vmul.f32 1.442695, %v3000_v16  ;;  %3663 = vmatprep.mubr.f32.mxu1 %v3662_v3  ;;  %4623 = vmatmul.mubr.f32.gmra.mrb[34].mxu0 %v12165_v14  ;;  %v2936_v54 = vsel %vm2894_vm8, %v11450_v63, %v11396_v4  ;;  %v2937_v33 = vsel %vm2895_vm9, %v11450_v63, %v11396_v4 }
 0x2f0   : > { %v3667_v9 = vsub.f32 %v12157_v28, %v13791_v19  ;;  %4628 = vmatprep.mubr.f32.mxu0 %v12174_v12  ;;  %v2972_v49 = vsub.f32 %v11468_v61, %v2936_v54  ;;  %v2973_v47 = vsub.f32 %v11468_v61, %v2937_v33  ;;  %v12191_v3 = vsub.f32 %v12048_v22, %v12097_v48  ;;  %v12193_v16 = vpop.f32.mrb[28].mxu0 }
 0x2f1   : > { %v12196_v6 = vsub.f32 %v9794_v51, %v12138_v2  ;;  %9815 = vpow2.f32 %v3076_v31  ;;  %v12200_v29 = vsub.f32 %v12041_v20, %v12105_v7  ;;  %v12203_v19 = vand.u32 4294901760, %v12058_v37  ;;  %9237 = vmatpush3.bf16.msra.mxu0 %v11753_v1  ;;  %v12206_v54 = vpop.f32.mrb[29].mxu0  ;;  %v12208_v33 = vpop.eup %9805 }
 0x2f2   : > { %14164 = vst [vmem:[#allocation130_spill] sm:$0xff] %v12191_v3  ;;  %v3048_v22 = vmul.f32 1.442695, %v3001_v44  ;;  %v3668_v28 = vand.u32 4294901760, %v3667_v9  ;;  %v3004_v48 = vmul.f32 %v2972_v49, %v12092_v50  ;;  %v3005_v51 = vmul.f32 %v2973_v47, %v12099_v5  ;;  %9239 = vmatprep.subr.bf16.mxu0 %v11780_v11  ;;  %v14171_v49 = vld [vmem:[#allocation45_spill] sm:$0xff] }
 0x2f3   : > { %14165 = vst [vmem:[#allocation131_spill] sm:$0xff] %v12196_v6  ;;  %14166 = vst [vmem:[#allocation132_spill] sm:$0xff] %v12200_v29  ;;  %v12213_v31 = vpop.eup %9807  ;;  %v13806_v20 = vand.u32 4294901760, %v12191_v3  ;;  %v13807_v2 = vand.u32 4294901760, %v12200_v29  ;;  %4630 = vmatmul.mubr.f32.gmra.mrb[36].mxu0 %v12203_v19  ;;  %v12219_v1 = vand.u32 4294901760, %v12101_v52  ;;  %vm2898_vm10 = vcmp.ge.f32.partialorder %v12119_v18, 0.0 }
 0x2f4   : > { %14167 = vst [vmem:[#allocation133_spill] sm:$0xff] %v12203_v19  ;;  %v12222_v44 = vpop.eup %9809  ;;  %v12225_v50 = vand.u32 4294901760, %v12142_v17  ;;  %9817 = vpow2.f32 %v3046_v62  ;;  %3669 = vmatmul.mubr.f32.vlgmr.msra.gmra.mrb[16].mxu1 %v3668_v28  ;;  %v2940_v5 = vsel %vm2898_vm10, %v11450_v63, %v11396_v4  ;;  %vm2899_vm11 = vcmp.ge.f32.partialorder %v12134_v41, 0.0 }
 0x2f5   : > { %14168 = vst [vmem:[#allocation134_spill] sm:$0xff] %v12219_v1  ;;  %v12231_v9 = vand.u32 4294901760, %v12169_v60  ;;  %9065 = vmatpush3.bf16.msra.mxu1 %v14171_v49  ;;  %v3676_v47 = vsub.f32 %v12191_v3, %v13806_v20  ;;  %v3682_v11 = vsub.f32 %v12200_v29, %v13807_v2  ;;  %4635 = vmatprep.mubr.f32.mxu0 %v12219_v1  ;;  %v12242_v62 = vpop.eup %9811  ;;  %v12245_v7 = vand.u32 4294901760, %v12213_v31 }
 0x2f6   : > { %14169 = vst [vmem:[#allocation135_spill] sm:$0xff] %v12225_v50  ;;  %v2976_v28 = vsub.f32 %v11468_v61, %v2940_v5  ;;  %9067 = vmatprep.subr.bf16.mxu1 %v14173_v58  ;;  %v2941_v49 = vsel %vm2899_vm11, %v11450_v63, %v11396_v4  ;;  %v12252_v20 = vsub.f32 %v12055_v40, %v12153_v55  ;;  %9819 = vpow2.f32 %v3048_v22 }
 0x2f7   : > { %14170 = vst [vmem:[#allocation136_spill] sm:$0xff] %v12231_v9  ;;  %14172 = vst [vmem:[#allocation45_spill] sm:$0xff] %v12245_v7  ;;  %v12256_v2 = vsub.f32 %v12051_v15, %v12165_v14  ;;  %9241 = vmatpush3.bf16.msra.mxu0 %v11793_v43  ;;  %v3054_v5 = vmul.f32 1.442695, %v3004_v48  ;;  %v3677_v29 = vand.u32 4294901760, %v3676_v47  ;;  %v3683_v3 = vand.u32 4294901760, %v3682_v11 }
 0x2f8   : > { %9243 = vmatprep.subr.bf16.mxu0 %v11820_v25  ;;  %v3008_v58 = vmul.f32 %v2976_v28, %v12119_v18  ;;  %v2977_v59 = vsub.f32 %v11468_v61, %v2941_v49  ;;  %v13817_v27 = vand.u32 4294901760, %v12252_v20  ;;  %v12264_v55 = vpop.eup %9813  ;;  %v14175_v15 = vld [vmem:[#allocation61_spill] sm:$0xff]  ;;  %v12268_v22 = vand.u32 4294901760, %v12081_v57 }
 0x2f9   : > { %14174 = vst [vmem:[#allocation51_spill] sm:$0xff] %v12256_v2  ;;  %v13816_v40 = vand.u32 4294901760, %v12256_v2  ;;  %3678 = vmatprep.mubr.f32.mxu1 %v3677_v29  ;;  %9069 = vmatpush3.bf16.msra.mxu1 %v14175_v15  ;;  %v12272_v11 = vsub.f32 %v12071_v42, %v12174_v12  ;;  %v12275_v48 = vand.u32 4294901760, %v12127_v34  ;;  %vm2902_vm12 = vcmp.ge.f32.partialorder %v12160_v24, 0.0  ;;  %v14178_v47 = vld [vmem:[#allocation65_spill] sm:$0xff]  ;;  %v14182_v15 = vld [vmem:[#allocation62_spill] sm:$0xff] }
 0x2fa   : > { %14176 = vst [vmem:[#allocation61_spill] sm:$0xff] %v12268_v22  ;;  %v3056_v18 = vmul.f32 1.442695, %v3005_v51  ;;  %3684 = vmatmul.mubr.f32.gmra.mrb[18].mxu1 %v3683_v3  ;;  %9071 = vmatprep.subr.bf16.mxu1 %v14178_v47  ;;  %v3009_v29 = vmul.f32 %v2977_v59, %v12134_v41  ;;  %v3691_v28 = vsub.f32 %v12252_v20, %v13817_v27  ;;  %vm2903_vm13 = vcmp.ge.f32.partialorder %v12167_v13, 0.0 }
 0x2fb   : > { %14177 = vst [vmem:[#allocation137_spill] sm:$0xff] %v12272_v11  ;;  %v3697_v42 = vsub.f32 %v12256_v2, %v13816_v40  ;;  %v12286_v49 = vpop.eup %9815  ;;  %4637 = vmatmul.mubr.f32.gmra.mrb[38].mxu0 %v12268_v22  ;;  %v2944_v3 = vsel %vm2902_vm12, %v11450_v63, %v11396_v4  ;;  %v12295_v41 = vsub.f32 %v12058_v37, %v12203_v19  ;;  %v12298_v59 = vand.u32 4294901760, %v12242_v62 }
 0x2fc   : > { %v12301_v51 = vand.u32 4294901760, %v12264_v55  ;;  %9821 = vpow2.f32 %v3054_v5  ;;  %v3692_v47 = vand.u32 4294901760, %v3691_v28  ;;  %4642 = vmatprep.mubr.f32.mxu0 %v12275_v48  ;;  %9245 = vmatpush3.bf16.msra.mxu0 %v11833_v53  ;;  %v3062_v40 = vmul.f32 1.442695, %v3008_v58  ;;  %v14184_v28 = vld [vmem:[#allocation68_spill] sm:$0xff] }
 0x2fd   : > { %14179 = vst [vmem:[#allocation65_spill] sm:$0xff] %v12295_v41  ;;  %14180 = vst [vmem:[#allocation138_spill] sm:$0xff] %v12298_v59  ;;  %v3698_v27 = vand.u32 4294901760, %v3697_v42  ;;  %9073 = vmatpush3.bf16.msra.mxu1 %v14182_v15  ;;  %v14183_v25 = vand.u32 4294901760, %v12272_v11  ;;  %v2980_v43 = vsub.f32 %v11468_v61, %v2944_v3  ;;  %9247 = vmatprep.subr.bf16.mxu0 %v11860_v45  ;;  %v3064_v5 = vmul.f32 1.442695, %v3009_v29 }
 0x2fe   : > { %14181 = vst [vmem:[#allocation139_spill] sm:$0xff] %v12301_v51  ;;  %v12311_v2 = vpop.eup %9817  ;;  %3693 = vmatprep.mubr.f32.mxu1 %v3692_v47  ;;  %9075 = vmatprep.subr.bf16.mxu1 %v14184_v28  ;;  %v2945_v58 = vsel %vm2903_vm13, %v11450_v63, %v11396_v4  ;;  %v13826_v42 = vand.u32 4294901760, %v12295_v41  ;;  %v12320_v15 = vand.u32 4294901760, %v12115_v46  ;;  %v12326_v29 = vsub.f32 %v12101_v52, %v12219_v1 }
 0x2ff   : > { %v3706_v37 = vsub.f32 %v12272_v11, %v14183_v25  ;;  %3699 = vmatmul.mubr.f32.gmra.mrb[20].mxu1 %v3698_v27  ;;  %v3012_v3 = vmul.f32 %v2980_v43, %v12160_v24  ;;  %v2981_v45 = vsub.f32 %v11468_v61, %v2945_v58  ;;  %v12333_v28 = vand.u32 4294901760, %v12208_v33  ;;  %v14187_v24 = vld [vmem:[#allocation69_spill] sm:$0xff]  ;;  %v14256_v11 = vld [vmem:[#allocation43_spill] sm:$0xff] }
 0x300   : > { %14185 = vst [vmem:[#allocation62_spill] sm:$0xff] %v12326_v29  ;;  %v3712_v47 = vsub.f32 %v12295_v41, %v13826_v42  ;;  %4644 = vmatmul.mubr.f32.gmra.mrb[40].mxu0 %v12320_v15  ;;  %vm2906_vm14 = vcmp.ge.f32.partialorder %v12193_v16, 0.0  ;;  %vm2907_vm15 = vcmp.ge.f32.partialorder %v12206_v54, 0.0  ;;  %v12337_v43 = vpop.eup %9819  ;;  %v12340_v27 = vand.u32 4294901760, %v12311_v2  ;;  %v14188_v42 = vld [vmem:[#allocation70_spill] sm:$0xff] }
 0x301   : > { %v3707_v25 = vand.u32 4294901760, %v3706_v37  ;;  %9823 = vpow2.f32 %v3056_v18  ;;  %v3013_v52 = vmul.f32 %v2981_v45, %v12167_v13  ;;  %9077 = vmatpush3.bf16.msra.mxu1 %v14187_v24  ;;  %v13840_v37 = vand.u32 4294901760, %v12326_v29  ;;  %4649 = vmatprep.mubr.f32.mxu0 %v12333_v28 }
 0x302   : > { %14186 = vst [vmem:[#allocation68_spill] sm:$0xff] %v12340_v27  ;;  %9825 = vpow2.f32 %v3062_v40  ;;  %v3713_v58 = vand.u32 4294901760, %v3712_v47  ;;  %9079 = vmatprep.subr.bf16.mxu1 %v14188_v42  ;;  %v2948_v53 = vsel %vm2906_vm14, %v11450_v63, %v11396_v4  ;;  %v2949_v41 = vsel %vm2907_vm15, %v11450_v63, %v11396_v4  ;;  %9249 = vmatpush3.bf16.msra.mxu0 %v11873_v26 }
 0x303   : > { %3708 = vmatprep.mubr.f32.mxu1 %v3707_v25  ;;  %9827 = vpow2.f32 %v3064_v5  ;;  %v3070_v18 = vmul.f32 1.442695, %v3012_v3  ;;  %v3721_v45 = vsub.f32 %v12326_v29, %v13840_v37  ;;  %v2984_v13 = vsub.f32 %v11468_v61, %v2948_v53  ;;  %9251 = vmatprep.subr.bf16.mxu0 %v11900_v36  ;;  %v14191_v3 = vld [vmem:[#allocation71_spill] sm:$0xff] }
 0x304   : > { %3714 = vmatmul.mubr.f32.gmra.mrb[22].mxu1 %v3713_v58  ;;  %v2985_v40 = vsub.f32 %v11468_v61, %v2949_v41  ;;  %v12359_v42 = vsub.f32 %v12081_v57, %v12268_v22  ;;  %v12362_v25 = vand.u32 4294901760, %v12150_v10  ;;  %v12366_v63 = vsub.f32 %v12127_v34, %v12275_v48 }
 0x305   : > { %v3072_v4 = vmul.f32 1.442695, %v3013_v52  ;;  %v3722_v53 = vand.u32 4294901760, %v3721_v45  ;;  %v3016_v5 = vmul.f32 %v2984_v13, %v12193_v16  ;;  %9081 = vmatpush3.bf16.msra.mxu1 %v14191_v3  ;;  %v12372_v61 = vand.u32 4294901760, %v12286_v49 }
 0x306   : > { %14189 = vst [vmem:[#allocation69_spill] sm:$0xff] %v12359_v42  ;;  %14190 = vst [vmem:[#allocation70_spill] sm:$0xff] %v12366_v63  ;;  %v12374_v57 = vpop.eup %9821  ;;  %v3017_v41 = vmul.f32 %v2985_v40, %v12206_v54  ;;  %v13836_v47 = vand.u32 4294901760, %v12359_v42  ;;  %4651 = vmatmul.mubr.f32.gmra.mrb[42].mxu0 %v12362_v25  ;;  %v13835_v34 = vand.u32 4294901760, %v12366_v63  ;;  %9083 = vmatprep.subr.bf16.mxu1 %v11991_v56  ;;  %9829 = vpow2.f32 %v3070_v18 }
 0x307   : > { %v12383_v16 = vsub.f32 %v12115_v46, %v12320_v15  ;;  %3723 = vmatprep.mubr.f32.mxu1 %v3722_v53  ;;  %v3078_v52 = vmul.f32 1.442695, %v3016_v5  ;;  %4656 = vmatprep.mubr.f32.mxu0 %v12372_v61  ;;  %v12387_v24 = vand.u32 4294901760, %v12222_v44  ;;  %v12391_v54 = vsub.f32 %v12208_v33, %v12333_v28 }
 0x308   : > { %v3080_v58 = vmul.f32 1.442695, %v3017_v41  ;;  %v3727_v56 = vsub.f32 %v12359_v42, %v13836_v47  ;;  %v3736_v46 = vsub.f32 %v12366_v63, %v13835_v34  ;;  %9253 = vmatpush3.bf16.msra.mxu0 %v11907_v30  ;;  %v12402_v45 = vand.u32 4294901760, %v12337_v43  ;;  %v14210_v30 = vld [vmem:[#allocation24_spill] sm:$0xff]  ;;  %v14249_v63 = vld [vmem:[#allocation33_spill] sm:$0xff] }
 0x309   : > { %14192 = vst [vmem:[#allocation71_spill] sm:$0xff] %v12383_v16  ;;  %14193 = vst [vmem:[#allocation140_spill] sm:$0xff] %v12391_v54  ;;  %v13832_v18 = vand.u32 4294901760, %v12383_v16  ;;  %9831 = vpow2.f32 %v3072_v4  ;;  %9085 = vmatpush3.bf16.msra.mxu1 %v11995_v35  ;;  %v13831_v33 = vand.u32 4294901760, %v12391_v54  ;;  %v12408_v13 = vsub.f32 %v12142_v17, %v12225_v50 }
 0x30a   : > { %14194 = vst [vmem:[#allocation141_spill] sm:$0xff] %v12402_v45  ;;  %v14196_v40 = vpack.c.bf16 %v11610_v0, %v11950_v21  ;;  %9833 = vpow2.f32 %v3078_v52  ;;  %v3728_v53 = vand.u32 4294901760, %v3727_v56  ;;  %v3737_v5 = vand.u32 4294901760, %v3736_v46  ;;  %4658 = vmatmul.mubr.f32.gmra.mrb[44].mxu0 %v12387_v24  ;;  %9087 = vmatprep.subr.bf16.mxu1 %v11997_v38 }
 0x30b   : > { %14195 = vst [vmem:[#allocation142_spill] sm:$0xff] %v12408_v13  ;;  %v3742_v3 = vsub.f32 %v12383_v16, %v13832_v18  ;;  %v9824_v35 = vpop.eup %9823  ;;  %v3751_v17 = vsub.f32 %v12391_v54, %v13831_v33  ;;  %v13833_v4 = vand.u32 4294901760, %v12408_v13  ;;  %v12424_v41 = vsub.f32 %v12150_v10, %v12362_v25  ;;  %v14248_v16 = vld [vmem:[#allocation36_spill] sm:$0xff] }
 0x30c   : > { %9287 = vmatprep.subr.bf16.mxu0 %v14196_v40  ;;  %v13834_v52 = vand.u32 4294901760, %v12196_v6  ;;  %v12427_v56 = vpop.eup %9825  ;;  %9835 = vpow2.f32 %v3080_v58  ;;  %3729 = vmatmul.mubr.f32.gmra.mrb[24].mxu1 %v3728_v53  ;;  %v12431_v38 = vsub.f32 %v12286_v49, %v12372_v61  ;;  %v12435_v46 = vsub.f32 %v12213_v31, %v12245_v7 }
 0x30d   : > { %14197 = vst [vmem:[#allocation143_spill] sm:$0xff] %v12424_v41  ;;  %v12439_v40 = vsub.f32 %v12222_v44, %v12387_v24  ;;  %v12441_v10 = vpop.eup %9827  ;;  %3738 = vmatprep.mubr.f32.mxu1 %v3737_v5  ;;  %v3752_v33 = vand.u32 4294901760, %v3751_v17  ;;  %v4915_v58 = vsub.f32 %v12408_v13, %v13833_v4  ;;  %v13837_v53 = vand.u32 4294901760, %v12424_v41  ;;  %9089 = vmatpush3.bf16.msra.mxu1 %v11999_v39 }
 0x30e   : > { %14198 = vst [vmem:[#allocation144_spill] sm:$0xff] %v12431_v38  ;;  %14199 = vst [vmem:[#allocation145_spill] sm:$0xff] %v12435_v46  ;;  %v4921_v31 = vsub.f32 %v12196_v6, %v13834_v52  ;;  %v3743_v49 = vand.u32 4294901760, %v3742_v3  ;;  %v13838_v44 = vand.u32 4294901760, %v12431_v38  ;;  %9091 = vmatprep.subr.bf16.mxu1 %v12022_v8  ;;  %v13839_v5 = vand.u32 4294901760, %v12435_v46 }
 0x30f   : > { %14200 = vst [vmem:[#allocation146_spill] sm:$0xff] %v12439_v40  ;;  %v13841_v17 = vand.u32 4294901760, %v12439_v40  ;;  %v12456_v18 = vand.u32 4294901760, %v12374_v57  ;;  %v4916_v4 = vand.u32 4294901760, %v4915_v58  ;;  %v3757_v39 = vsub.f32 %v12424_v41, %v13837_v53 }
 0x310   : > { %v12463_v52 = vsub.f32 %v12169_v60, %v12231_v9  ;;  %v12465_v3 = vand.u32 4294901760, %v9824_v35  ;;  %3744 = vmatmul.mubr.f32.gmra.mrb[26].mxu1 %v3743_v49  ;;  %v4922_v8 = vand.u32 4294901760, %v4921_v31  ;;  %v3766_v34 = vsub.f32 %v12431_v38, %v13838_v44  ;;  %v12473_v47 = vpop.eup %9829  ;;  %v14229_v9 = vld [vmem:[#allocation120_spill] sm:$0xff]  ;;  %v14230_v38 = vld [vmem:[#allocation81_spill] sm:$0xff] }
 0x311   : > { %14201 = vst [vmem:[#allocation147_spill] sm:$0xff] %v12456_v18  ;;  %v4930_v58 = vsub.f32 %v12435_v46, %v13839_v5  ;;  %3753 = vmatprep.mubr.f32.mxu1 %v3752_v33  ;;  %4917 = vmatprep.mubr.f32.mxu0 %v4916_v4  ;;  %v3772_v60 = vsub.f32 %v12439_v40, %v13841_v17  ;;  %v3758_v44 = vand.u32 4294901760, %v3757_v39  ;;  %v14207_v17 = vld [vmem:[#allocation117_spill] sm:$0xff]  ;;  %v14211_v39 = vld [vmem:[#allocation30_spill] sm:$0xff]  ;;  %v12513_v36 = vand.u32 4294901760, %v12441_v10 }
 0x312   : > { %14202 = vst [vmem:[#allocation148_spill] sm:$0xff] %v12463_v52  ;;  %14203 = vst [vmem:[#allocation149_spill] sm:$0xff] %v12465_v3  ;;  %v12481_v31 = vsub.f32 %v12264_v55, %v12301_v51  ;;  %v12485_v49 = vsub.f32 %v12242_v62, %v12298_v59  ;;  %4923 = vmatmul.mubr.f32.vlgmr.msra.gmra.mrb[46].mxu0 %v4922_v8  ;;  %v3767_v5 = vand.u32 4294901760, %v3766_v34  ;;  %9093 = vmatpush3.bf16.msra.mxu1 %v12125_v32  ;;  %v14226_v51 = vld [vmem:[#allocation18_spill] sm:$0xff] }
 0x313   : > { %v4931_v37 = vand.u32 4294901760, %v4930_v58  ;;  %v12490_v33 = vsub.f32 %v12337_v43, %v12402_v45  ;;  %v9832_v4 = vpop.eup %9831  ;;  %v14208_v53 = vpack.c.bf16 %v14156_v23, %v14207_v17  ;;  %v14209_v55 = vand.u32 4294901760, %v12463_v52  ;;  %14215 = vst [vmem:[#allocation30_spill] sm:$0xff] %v12513_v36 }
 0x314   : > { %14204 = vst [vmem:[#allocation150_spill] sm:$0xff] %v12481_v31  ;;  %14205 = vst [vmem:[#allocation151_spill] sm:$0xff] %v12485_v49  ;;  %v14212_v8 = vpack.c.bf16 %v14210_v30, %v14211_v39  ;;  %v13856_v34 = vand.u32 4294901760, %v12481_v31  ;;  %v12505_v43 = vsub.f32 %v12311_v2, %v12340_v27  ;;  %v12507_v58 = vpop.eup %9833  ;;  %3759 = vmatmul.mubr.f32.gmra.mrb[28].mxu1 %v3758_v44  ;;  %v14217_v39 = vld [vmem:[#allocation25_spill] sm:$0xff]  ;;  %v14220_v27 = vand.u32 4294901760, %v12485_v49  ;;  %v14222_v30 = vld [vmem:[#allocation27_spill] sm:$0xff] }
 0x315   : > { %14206 = vst [vmem:[#allocation152_spill] sm:$0xff] %v12490_v33  ;;  %9289 = vmatpush3.bf16.msra.mxu0 %v14208_v53  ;;  %v4936_v62 = vsub.f32 %v12463_v52, %v14209_v55  ;;  %v12510_v53 = vand.u32 4294901760, %v12427_v56  ;;  %4932 = vmatprep.mubr.f32.mxu0 %v4931_v37  ;;  %v12517_v55 = vsub.f32 %v9824_v35, %v12465_v3  ;;  %v3773_v59 = vand.u32 4294901760, %v3772_v60 }
 0x316   : > { %9095 = vmatprep.subr.bf16.mxu1 %v14212_v8  ;;  %14213 = vst [vmem:[#allocation117_spill] sm:$0xff] %v12505_v43  ;;  %3768 = vmatprep.mubr.f32.mxu1 %v3767_v5  ;;  %v14218_v8 = vld [vmem:[#allocation118_spill] sm:$0xff]  ;;  %v4945_v26 = vsub.f32 %v12481_v31, %v13856_v34  ;;  %v4951_v44 = vsub.f32 %v12485_v49, %v14220_v27  ;;  %v9836_v35 = vpop.eup %9835  ;;  %v14223_v5 = vand.u32 4294901760, %v14222_v30  ;;  %v14227_v40 = vand.u32 4294901760, %v14226_v51 }
 0x317   : > { %14214 = vst [vmem:[#allocation24_spill] sm:$0xff] %v12510_v53  ;;  %14216 = vst [vmem:[#allocation153_spill] sm:$0xff] %v12517_v55  ;;  %v14219_v2 = vpack.c.bf16 %v14217_v39, %v14218_v8  ;;  %v4937_v32 = vand.u32 4294901760, %v4936_v62  ;;  %v12530_v37 = vsub.f32 %v12374_v57, %v12456_v18  ;;  %v14225_v62 = vld [vmem:[#allocation26_spill] sm:$0xff]  ;;  %v12546_v57 = vand.u32 4294901760, %v12473_v47 }
 0x318   : > { %v12535_v3 = vsub.f32 %v14222_v30, %v14223_v5  ;;  %v12543_v27 = vsub.f32 %v14226_v51, %v14227_v40  ;;  %v4946_v18 = vand.u32 4294901760, %v4945_v26  ;;  %v9294_v30 = vpack.c.bf16 %v14230_v38, %v14229_v9  ;;  %3774 = vmatmul.mubr.f32.gmra.mrb[30].mxu1 %v3773_v59  ;;  %v14234_v40 = vld [vmem:[#allocation121_spill] sm:$0xff] }
 0x319   : > { %9291 = vmatprep.subr.bf16.mxu0 %v14219_v2  ;;  %14221 = vst [vmem:[#allocation25_spill] sm:$0xff] %v12530_v37  ;;  %v14224_v2 = vld [vmem:[#allocation119_spill] sm:$0xff]  ;;  %14228 = vst [vmem:[#allocation118_spill] sm:$0xff] %v12546_v57  ;;  %4938 = vmatmul.mubr.f32.gmra.mrb[48].mxu0 %v4937_v32  ;;  %v12550_v5 = vand.u32 4294901760, %v9832_v4  ;;  %v14232_v60 = vand.u32 4294901760, %v12490_v33  ;;  %v12558_v51 = vsub.f32 %v12441_v10, %v12513_v36  ;;  %v4952_v26 = vand.u32 4294901760, %v4951_v44 }
 0x31a   : > { %v9292_v45 = vpack.c.bf16 %v14225_v62, %v14224_v2  ;;  %4004 = vmatprep.mubr.f32.mxu1 %v14234_v40  ;;  %4947 = vmatprep.mubr.f32.mxu0 %v4946_v18  ;;  %v14235_v32 = vand.u32 4294901760, %v12505_v43  ;;  %v14239_v10 = vld [vmem:[#allocation84_spill] sm:$0xff]  ;;  %v14240_v18 = vld [vmem:[#allocation42_spill] sm:$0xff]  ;;  %v12584_v59 = vand.u32 4294901760, %v9836_v35  ;;  %v14250_v42 = vpack.c.bf16 %v14248_v16, %v14249_v63 }
 0x31b   : > { %14231 = vst [vmem:[#allocation27_spill] sm:$0xff] %v12550_v5  ;;  %v4960_v34 = vsub.f32 %v12490_v33, %v14232_v60  ;;  %14233 = vst [vmem:[#allocation119_spill] sm:$0xff] %v12558_v51  ;;  %v14237_v60 = vld [vmem:[#allocation85_spill] sm:$0xff]  ;;  %v9296_v40 = vpack.c.bf16 %v14239_v10, %v12535_v3  ;;  %v14241_v44 = vand.u32 4294901760, %v14240_v18 }
 0x31c   : > { %9293 = vmatpush3.bf16.msra.mxu0 %v9292_v45  ;;  %v4966_v41 = vsub.f32 %v12505_v43, %v14235_v32  ;;  %v12567_v45 = vsub.f32 %v12427_v56, %v12510_v53  ;;  %v14238_v7 = vand.u32 4294901760, %v14237_v60  ;;  %v12582_v32 = vand.u32 4294901760, %v12507_v58  ;;  %14243 = vst [vmem:[#allocation120_spill] sm:$0xff] %v12584_v59  ;;  %v14244_v56 = vld [vmem:[#allocation87_spill] sm:$0xff] }
 0x31d   : > { %9295 = vmatprep.subr.bf16.mxu0 %v9294_v30  ;;  %v12579_v36 = vsub.f32 %v14240_v18, %v14241_v44  ;;  %4953 = vmatmul.mubr.f32.gmra.mrb[50].mxu0 %v4952_v26  ;;  %v9298_v53 = vpack.c.bf16 %v14244_v56, %v12543_v27  ;;  %v14246_v30 = vand.u32 4294901760, %v12517_v55  ;;  %v12594_v44 = vsub.f32 %v9832_v4, %v12550_v5  ;;  %v14251_v26 = vld [vmem:[#allocation123_spill] sm:$0xff]  ;;  %v14254_v4 = vld [vmem:[#allocation89_spill] sm:$0xff] }
 0x31e   : > { %14236 = vst [vmem:[#allocation26_spill] sm:$0xff] %v12567_v45  ;;  %v12572_v50 = vsub.f32 %v14237_v60, %v14238_v7  ;;  %14242 = vst [vmem:[#allocation18_spill] sm:$0xff] %v12582_v32  ;;  %v14245_v7 = vld [vmem:[#allocation122_spill] sm:$0xff]  ;;  %v4961_v60 = vand.u32 4294901760, %v4960_v34  ;;  %v4967_v29 = vand.u32 4294901760, %v4966_v41  ;;  %v14255_v5 = vld [vmem:[#allocation29_spill] sm:$0xff] }
 0x31f   : > { %4006 = vmatmul.mubr.f32.vlgmr.msra.gmra.mrb[32].mxu1 %v14245_v7  ;;  %v4975_v54 = vsub.f32 %v12517_v55, %v14246_v30  ;;  %14247 = vst [vmem:[#allocation81_spill] sm:$0xff] %v12594_v44  ;;  %v14252_v7 = vand.u32 4294901760, %v12530_v37  ;;  %v12606_v30 = vsub.f32 %v12473_v47, %v12546_v57  ;;  %v14257_v63 = vpack.c.bf16 %v14255_v5, %v14256_v11  ;;  %v14261_v47 = vld [vmem:[#allocation124_spill] sm:$0xff] }
 0x320   : > { %9297 = vmatpush3.bf16.msra.mxu0 %v9296_v40  ;;  %9097 = vmatpush3.bf16.msra.mxu1 %v14250_v42  ;;  %v9300_v18 = vpack.c.bf16 %v14254_v4, %v12572_v50  ;;  %v14258_v42 = vld [vmem:[#allocation3_spill] sm:$0xff]  ;;  %v14262_v57 = vand.u32 4294901760, %v12558_v51 }
 0x321   : > { %4011 = vmatprep.mubr.f32.mxu1 %v14251_v26  ;;  %v4981_v34 = vsub.f32 %v12530_v37, %v14252_v7  ;;  %14253 = vst [vmem:[#allocation85_spill] sm:$0xff] %v12606_v30  ;;  %9099 = vmatprep.subr.bf16.mxu1 %v14257_v63  ;;  %v14259_v16 = vand.u32 4294901760, %v14258_v42  ;;  %v14260_v7 = vld [vmem:[#allocation92_spill] sm:$0xff]  ;;  %v4976_v26 = vand.u32 4294901760, %v4975_v54 }
 0x322   : > { %4962 = vmatprep.mubr.f32.mxu0 %v4961_v60  ;;  %9299 = vmatprep.subr.bf16.mxu0 %v9298_v53  ;;  %v9302_v40 = vpack.c.bf16 %v14260_v7, %v12579_v36  ;;  %v4990_v11 = vsub.f32 %v12558_v51, %v14262_v57  ;;  %v12626_v60 = vsub.f32 %v9836_v35, %v12584_v59  ;;  %v14264_v63 = vld [vmem:[#allocation32_spill] sm:$0xff]  ;;  %v14270_v35 = vld [vmem:[#allocation94_spill] sm:$0xff] }
 0x323   : > { %v12616_v41 = vsub.f32 %v14258_v42, %v14259_v16  ;;  %4968 = vmatmul.mubr.f32.gmra.mrb[52].mxu0 %v4967_v29  ;;  %4013 = vmatmul.mubr.f32.gmra.mrb[34].mxu1 %v14261_v47  ;;  %v14265_v42 = vld [vmem:[#allocation47_spill] sm:$0xff]  ;;  %v14267_v29 = vld [vmem:[#allocation126_spill] sm:$0xff]  ;;  %v4982_v16 = vand.u32 4294901760, %v4981_v34  ;;  %v14268_v47 = vand.u32 4294901760, %v12567_v45  ;;  %v12638_v57 = vsub.f32 %v12507_v58, %v12582_v32  ;;  %v14271_v59 = vld [vmem:[#allocation48_spill] sm:$0xff] }
 0x324   : > { %9301 = vmatpush3.bf16.msra.mxu0 %v9300_v18  ;;  %14263 = vst [vmem:[#allocation84_spill] sm:$0xff] %v12626_v60  ;;  %v14266_v53 = vpack.c.bf16 %v14264_v63, %v14265_v42  ;;  %4018 = vmatprep.mubr.f32.mxu1 %v14267_v29  ;;  %v14272_v51 = vld [vmem:[#allocation34_spill] sm:$0xff]  ;;  %v14274_v42 = vld [vmem:[#allocation7_spill] sm:$0xff]  ;;  %v4991_v29 = vand.u32 4294901760, %v4990_v11 }
 0x325   : > { %v4996_v54 = vsub.f32 %v12567_v45, %v14268_v47  ;;  %14269 = vst [vmem:[#allocation42_spill] sm:$0xff] %v12638_v57  ;;  %v9304_v5 = vpack.c.bf16 %v14270_v35, %v12616_v41  ;;  %v14273_v63 = vpack.c.bf16 %v14271_v59, %v14272_v51  ;;  %4977 = vmatprep.mubr.f32.mxu0 %v4976_v26  ;;  %v14275_v34 = vand.u32 4294901760, %v14274_v42  ;;  %v14276_v47 = vld [vmem:[#allocation16_spill] sm:$0xff]  ;;  %v14285_v26 = vld [vmem:[#allocation55_spill] sm:$0xff]  ;;  %v14286_v32 = vld [vmem:[#allocation58_spill] sm:$0xff] }
 0x326   : > { %9101 = vmatpush3.bf16.msra.mxu1 %v14266_v53  ;;  %9303 = vmatprep.subr.bf16.mxu0 %v9302_v40  ;;  %v14277_v18 = vand.u32 4294901760, %v14276_v47  ;;  %v14278_v51 = vand.u32 4294901760, %v12594_v44  ;;  %v14282_v40 = vld [vmem:[#allocation97_spill] sm:$0xff] }
 0x327   : > { %9103 = vmatprep.subr.bf16.mxu1 %v14273_v63  ;;  %v12648_v53 = vsub.f32 %v14274_v42, %v14275_v34  ;;  %4983 = vmatmul.mubr.f32.gmra.mrb[54].mxu0 %v4982_v16  ;;  %v14279_v63 = vld [vmem:[#allocation53_spill] sm:$0xff]  ;;  %v14280_v42 = vld [vmem:[#allocation40_spill] sm:$0xff] }
 0x328   : > { %v12653_v58 = vsub.f32 %v14276_v47, %v14277_v18  ;;  %4020 = vmatmul.mubr.f32.gmra.mrb[36].mxu1 %v12165_v14  ;;  %9305 = vmatpush3.bf16.msra.mxu0 %v9304_v5  ;;  %v5005_v59 = vsub.f32 %v12594_v44, %v14278_v51  ;;  %v14281_v34 = vpack.c.bf16 %v14279_v63, %v14280_v42  ;;  %v4997_v18 = vand.u32 4294901760, %v4996_v54  ;;  %v14284_v51 = vld [vmem:[#allocation100_spill] sm:$0xff]  ;;  %v14288_v63 = vld [vmem:[#allocation22_spill] sm:$0xff]  ;;  %v14290_v54 = vld [vmem:[#allocation23_spill] sm:$0xff] }
 0x329   : > { %4025 = vmatprep.mubr.f32.mxu1 %v12174_v12  ;;  %v9306_v16 = vpack.c.bf16 %v14282_v40, %v12648_v53  ;;  %v14283_v47 = vand.u32 4294901760, %v12606_v30  ;;  %v14287_v44 = vpack.c.bf16 %v14285_v26, %v14286_v32  ;;  %4992 = vmatprep.mubr.f32.mxu0 %v4991_v29  ;;  %v14289_v42 = vand.u32 4294901760, %v14288_v63  ;;  %v14293_v29 = vld [vmem:[#allocation60_spill] sm:$0xff] }
 0x32a   : > { %9105 = vmatpush3.bf16.msra.mxu1 %v14281_v34  ;;  %v9308_v14 = vpack.c.bf16 %v14284_v51, %v12653_v58  ;;  %v14291_v12 = vand.u32 4294901760, %v14290_v54  ;;  %v5006_v5 = vand.u32 4294901760, %v5005_v59  ;;  %v14292_v32 = vand.u32 4294901760, %v12626_v60  ;;  %v14294_v26 = vld [vmem:[#allocation56_spill] sm:$0xff] }
 0x32b   : > { %v5011_v11 = vsub.f32 %v12606_v30, %v14283_v47  ;;  %9107 = vmatprep.subr.bf16.mxu1 %v14287_v44  ;;  %v12678_v34 = vsub.f32 %v14288_v63, %v14289_v42  ;;  %9307 = vmatprep.subr.bf16.mxu0 %v9306_v16  ;;  %v14295_v30 = vpack.c.bf16 %v14293_v29, %v14294_v26  ;;  %v14296_v16 = vld [vmem:[#allocation103_spill] sm:$0xff]  ;;  %v14302_v29 = vld [vmem:[#allocation105_spill] sm:$0xff] }
 0x32c   : > { %4998 = vmatmul.mubr.f32.gmra.mrb[56].mxu0 %v4997_v18  ;;  %v12683_v47 = vsub.f32 %v14290_v54, %v14291_v12  ;;  %4027 = vmatmul.mubr.f32.gmra.mrb[38].mxu1 %v12203_v19  ;;  %v5020_v44 = vsub.f32 %v12626_v60, %v14292_v32  ;;  %v14297_v12 = vand.u32 4294901760, %v12638_v57  ;;  %v14299_v54 = vld [vmem:[#allocation63_spill] sm:$0xff]  ;;  %v14300_v19 = vld [vmem:[#allocation54_spill] sm:$0xff] }
 0x32d   : > { %9309 = vmatpush3.bf16.msra.mxu0 %v9308_v14  ;;  %4032 = vmatprep.mubr.f32.mxu1 %v12219_v1  ;;  %v9310_v18 = vpack.c.bf16 %v14296_v16, %v12678_v34  ;;  %v5012_v63 = vand.u32 4294901760, %v5011_v11  ;;  %v14298_v14 = vld [vmem:[#allocation107_spill] sm:$0xff]  ;;  %v14301_v32 = vpack.c.bf16 %v14299_v54, %v14300_v19  ;;  %v14304_v11 = vld [vmem:[#allocation109_spill] sm:$0xff] }
 0x32e   : > { %9109 = vmatpush3.bf16.msra.mxu1 %v14295_v30  ;;  %v5026_v42 = vsub.f32 %v12638_v57, %v14297_v12  ;;  %v9312_v59 = vpack.c.bf16 %v14298_v14, %v12683_v47  ;;  %5007 = vmatprep.mubr.f32.mxu0 %v5006_v5  ;;  %v14303_v30 = vand.u32 4294901760, %v14302_v29  ;;  %v14305_v1 = vand.u32 4294901760, %v14304_v11  ;;  %v14306_v12 = vld [vmem:[#allocation39_spill] sm:$0xff]  ;;  %v14307_v57 = vld [vmem:[#allocation2_spill] sm:$0xff] }
 0x32f   : > { %9111 = vmatprep.subr.bf16.mxu1 %v14301_v32  ;;  %9311 = vmatprep.subr.bf16.mxu0 %v9310_v18  ;;  %v9114_v19 = vpack.c.bf16 %v14307_v57, %v14306_v12  ;;  %v5021_v54 = vand.u32 4294901760, %v5020_v44  ;;  %v14308_v5 = vld [vmem:[#allocation67_spill] sm:$0xff]  ;;  %v14309_v32 = vld [vmem:[#allocation50_spill] sm:$0xff]  ;;  %v13923_v57 = vand.u32 4294901760, %v11950_v21  ;;  %v13922_v44 = vand.u32 4294901760, %v14207_v17  ;;  %v14316_v12 = vld [vmem:[#allocation72_spill] sm:$0xff] }
 0x330   : > { %v12706_v26 = vsub.f32 %v14302_v29, %v14303_v30  ;;  %5013 = vmatmul.mubr.f32.gmra.mrb[58].mxu0 %v5012_v63  ;;  %v12711_v60 = vsub.f32 %v14304_v11, %v14305_v1  ;;  %4034 = vmatmul.mubr.f32.gmra.mrb[40].mxu1 %v12268_v22  ;;  %v14310_v14 = vpack.c.bf16 %v14308_v5, %v14309_v32  ;;  %v14311_v18 = vld [vmem:[#allocation111_spill] sm:$0xff]  ;;  %v5027_v29 = vand.u32 4294901760, %v5026_v42  ;;  %v14312_v1 = vld [vmem:[#allocation114_spill] sm:$0xff]  ;;  %v14314_v11 = vld [vmem:[#allocation9_spill] sm:$0xff] }
 0x331   : > { %9313 = vmatpush3.bf16.msra.mxu0 %v9312_v59  ;;  %4039 = vmatprep.mubr.f32.mxu1 %v12275_v48  ;;  %v14313_v59 = vld [vmem:[#allocation8_spill] sm:$0xff]  ;;  %v14318_v5 = vand.u32 4294901760, %v14156_v23  ;;  %v14323_v23 = vand.u32 4294901760, %v14217_v39  ;;  %v14327_v39 = vld [vmem:[#allocation125_spill] sm:$0xff] }
 0x332   : > { %9113 = vmatpush3.bf16.msra.mxu1 %v14310_v14  ;;  %v9314_v63 = vpack.c.bf16 %v14311_v18, %v12706_v26  ;;  %v9316_v30 = vpack.c.bf16 %v14312_v1, %v12711_v60  ;;  %5022 = vmatprep.mubr.f32.mxu0 %v5021_v54  ;;  %v9116_v22 = vpack.c.bf16 %v14314_v11, %v14313_v59  ;;  %v14315_v14 = vld [vmem:[#allocation14_spill] sm:$0xff]  ;;  %v13918_v59 = vand.u32 4294901760, %v14224_v2  ;;  %v14322_v11 = vld [vmem:[#allocation76_spill] sm:$0xff] }
 0x333   : > { %9115 = vmatprep.subr.bf16.mxu1 %v9114_v19  ;;  %v9118_v42 = vpack.c.bf16 %v14316_v12, %v14315_v14  ;;  %v14317_v19 = vand.u32 4294901760, %v11610_v0  ;;  %v9352_v32 = vpack.c.bf16 %v14318_v5, %v13922_v44  ;;  %v14321_v0 = vld [vmem:[#allocation37_spill] sm:$0xff]  ;;  %v14326_v5 = vld [vmem:[#allocation78_spill] sm:$0xff] }
 0x334   : > { %9315 = vmatprep.subr.bf16.mxu0 %v9314_v63  ;;  %5028 = vmatmul.mubr.f32.gmra.mrb[60].mxu0 %v5027_v29  ;;  %v14319_v63 = vld [vmem:[#allocation74_spill] sm:$0xff]  ;;  %v14320_v29 = vld [vmem:[#allocation75_spill] sm:$0xff]  ;;  %v9122_v14 = vpack.c.bf16 %v14322_v11, %v14321_v0  ;;  %v14330_v11 = vand.u32 4294901760, %v14239_v10 }
 0x335   : > { %4041 = vmatmul.mubr.f32.gmra.mrb[42].mxu1 %v12320_v15  ;;  %9317 = vmatpush3.bf16.msra.mxu0 %v9316_v30  ;;  %v9350_v54 = vpack.c.bf16 %v14317_v19, %v13923_v57  ;;  %v9120_v30 = vpack.c.bf16 %v14320_v29, %v14319_v63  ;;  %v13917_v63 = vand.u32 4294901760, %v14229_v9  ;;  %v13914_v29 = vand.u32 4294901760, %v12535_v3  ;;  %v14329_v0 = vld [vmem:[#allocation31_spill] sm:$0xff] }
 0x336   : > { %9117 = vmatpush3.bf16.msra.mxu1 %v9116_v22  ;;  %4046 = vmatprep.mubr.f32.mxu1 %v12333_v28  ;;  %v13919_v22 = vand.u32 4294901760, %v14218_v8 }
 0x337   : > { %9119 = vmatprep.subr.bf16.mxu1 %v9118_v42  ;;  %5444 = vmatprep.mubr.f32.mxu0 %v12408_v13  ;;  %v14324_v42 = vand.u32 4294901760, %v14225_v62  ;;  %v14328_v62 = vand.u32 4294901760, %v14230_v38  ;;  %v14332_v38 = vld [vmem:[#allocation35_spill] sm:$0xff] }
 0x338   : > { %9351 = vmatprep.subr.bf16.mxu0 %v9350_v54  ;;  %5447 = vmatmul.mubr.f32.vlgmr.msra.gmra.mrb[62].mxu0 %v12196_v6  ;;  %v9354_v12 = vpack.c.bf16 %v14323_v23, %v13919_v22  ;;  %v14325_v54 = vld [vmem:[#allocation38_spill] sm:$0xff]  ;;  %v13913_v23 = vand.u32 4294901760, %v12543_v27  ;;  %v14349_v22 = vld [vmem:[#allocation65_spill] sm:$0xff] }
 0x339   : > { %4048 = vmatmul.mubr.f32.gmra.mrb[44].mxu1 %v12362_v25  ;;  %9353 = vmatpush3.bf16.msra.mxu0 %v9352_v32  ;;  %v9356_v19 = vpack.c.bf16 %v14324_v42, %v13918_v59  ;;  %v9124_v32 = vpack.c.bf16 %v14326_v5, %v14325_v54  ;;  %v14331_v42 = vld [vmem:[#allocation127_spill] sm:$0xff]  ;;  %v14334_v54 = vand.u32 4294901760, %v14244_v56  ;;  %v14335_v5 = vld [vmem:[#allocation44_spill] sm:$0xff]  ;;  %v14338_v56 = vld [vmem:[#allocation46_spill] sm:$0xff]  ;;  %v13927_v59 = vand.u32 4294901760, %v12683_v47 }
 0x33a   : > { %9121 = vmatpush3.bf16.msra.mxu1 %v9120_v30  ;;  %4053 = vmatprep.mubr.f32.mxu1 %v12372_v61  ;;  %v9358_v30 = vpack.c.bf16 %v14328_v62, %v13917_v63  ;;  %v14384_v6 = vld [vmem:[#allocation141_spill] sm:$0xff] }
 0x33b   : > { %9123 = vmatprep.subr.bf16.mxu1 %v9122_v14  ;;  %5453 = vmatprep.mubr.f32.mxu0 %v12435_v46  ;;  %v9360_v14 = vpack.c.bf16 %v14330_v11, %v13914_v29  ;;  %v9362_v10 = vpack.c.bf16 %v14334_v54, %v13913_v23  ;;  %v13916_v11 = vand.u32 4294901760, %v12616_v41  ;;  %v14339_v54 = vand.u32 4294901760, %v14260_v7  ;;  %v14342_v29 = vld [vmem:[#allocation51_spill] sm:$0xff]  ;;  %v14343_v7 = vld [vmem:[#allocation52_spill] sm:$0xff] }
 0x33c   : > { %9355 = vmatprep.subr.bf16.mxu0 %v9354_v12  ;;  %5456 = vmatmul.mubr.f32.gmra.mrb[64].mxu0 %v12463_v52  ;;  %v13912_v12 = vand.u32 4294901760, %v12572_v50  ;;  %v13921_v23 = vand.u32 4294901760, %v12653_v58  ;;  %v14382_v52 = vld [vmem:[#allocation138_spill] sm:$0xff]  ;;  %v14383_v46 = vand.u32 4294901760, %v14331_v42 }
 0x33d   : > { %4055 = vmatmul.mubr.f32.gmra.mrb[46].mxu1 %v12387_v24  ;;  %9357 = vmatpush3.bf16.msra.mxu0 %v9356_v19  ;;  %v14333_v19 = vld [vmem:[#allocation130_spill] sm:$0xff] }
 0x33e   : > { %9125 = vmatpush3.bf16.msra.mxu1 %v9124_v32  ;;  %4190 = vmatprep.mubr.f32.mxu1 %v14327_v39  ;;  %v14336_v32 = vand.u32 4294901760, %v14254_v4  ;;  %v14385_v13 = vand.u32 4294901760, %v14333_v19 }
 0x33f   : > { %9127 = vmatprep.subr.bf16.mxu1 %v14329_v0  ;;  %5462 = vmatprep.mubr.f32.mxu0 %v12481_v31  ;;  %v14381_v31 = vand.u32 4294901760, %v14327_v39  ;;  %v14388_v39 = vld [vmem:[#allocation149_spill] sm:$0xff] }
 0x340   : > { %9359 = vmatprep.subr.bf16.mxu0 %v9358_v30  ;;  %5465 = vmatmul.mubr.f32.gmra.mrb[66].mxu0 %v12485_v49  ;;  %v9364_v62 = vpack.c.bf16 %v14336_v32, %v13912_v12  ;;  %v13915_v30 = vand.u32 4294901760, %v12579_v36  ;;  %v14340_v32 = vld [vmem:[#allocation49_spill] sm:$0xff]  ;;  %v14380_v49 = vld [vmem:[#allocation4_spill] sm:$0xff] }
 0x341   : > { %4193 = vmatmul.mubr.f32.vlgmr.msra.gmra.mrb[48].mxu1 %v14331_v42  ;;  %9361 = vmatpush3.bf16.msra.mxu0 %v9360_v14  ;;  %v14337_v14 = vld [vmem:[#allocation132_spill] sm:$0xff]  ;;  %v14392_v42 = vld [vmem:[#allocation30_spill] sm:$0xff] }
 0x342   : > { %9129 = vmatpush3.bf16.msra.mxu1 %v14332_v38  ;;  %4199 = vmatprep.mubr.f32.mxu1 %v14333_v19  ;;  %v9366_v4 = vpack.c.bf16 %v14339_v54, %v13915_v30  ;;  %v14344_v54 = vld [vmem:[#allocation137_spill] sm:$0xff]  ;;  %v14345_v30 = vand.u32 4294901760, %v14282_v40  ;;  %v14350_v40 = vld [vmem:[#allocation59_spill] sm:$0xff]  ;;  %v14394_v19 = vld [vmem:[#allocation24_spill] sm:$0xff] }
 0x343   : > { %9131 = vmatprep.subr.bf16.mxu1 %v14335_v5  ;;  %5471 = vmatprep.mubr.f32.mxu0 %v12490_v33  ;;  %v14379_v33 = vld [vmem:[#allocation139_spill] sm:$0xff] }
 0x344   : > { %9363 = vmatprep.subr.bf16.mxu0 %v9362_v10  ;;  %5474 = vmatmul.mubr.f32.gmra.mrb[68].mxu0 %v12505_v43  ;;  %v14341_v10 = vand.u32 4294901760, %v14270_v35  ;;  %v14368_v43 = vld [vmem:[#allocation140_spill] sm:$0xff] }
 0x345   : > { %4202 = vmatmul.mubr.f32.gmra.mrb[50].mxu1 %v14337_v14  ;;  %9365 = vmatpush3.bf16.msra.mxu0 %v9364_v62  ;;  %v13920_v62 = vand.u32 4294901760, %v12648_v53 }
 0x346   : > { %9133 = vmatpush3.bf16.msra.mxu1 %v14338_v56  ;;  %4208 = vmatprep.mubr.f32.mxu1 %v12252_v20  ;;  %v9368_v12 = vpack.c.bf16 %v14341_v10, %v13916_v11  ;;  %v14346_v10 = vld [vmem:[#allocation57_spill] sm:$0xff]  ;;  %v14348_v11 = vand.u32 4294901760, %v14284_v51 }
 0x347   : > { %9135 = vmatprep.subr.bf16.mxu1 %v14340_v32  ;;  %5480 = vmatprep.mubr.f32.mxu0 %v12517_v55  ;;  %v9370_v35 = vpack.c.bf16 %v14345_v30, %v13920_v62  ;;  %v14351_v30 = vld [vmem:[#allocation62_spill] sm:$0xff]  ;;  %v14352_v62 = vand.u32 4294901760, %v14296_v16  ;;  %v14367_v55 = vld [vmem:[#allocation19_spill] sm:$0xff] }
 0x348   : > { %9367 = vmatprep.subr.bf16.mxu0 %v9366_v4  ;;  %5483 = vmatmul.mubr.f32.gmra.mrb[70].mxu0 %v12530_v37  ;;  %v14347_v4 = vld [vmem:[#allocation119_spill] sm:$0xff]  ;;  %v9372_v63 = vpack.c.bf16 %v14348_v11, %v13921_v23  ;;  %v14353_v11 = vld [vmem:[#allocation64_spill] sm:$0xff]  ;;  %v14358_v37 = vld [vmem:[#allocation69_spill] sm:$0xff] }
 0x349   : > { %4211 = vmatmul.mubr.f32.gmra.mrb[52].mxu1 %v14342_v29  ;;  %9369 = vmatpush3.bf16.msra.mxu0 %v9368_v12  ;;  %v13926_v12 = vand.u32 4294901760, %v12678_v34  ;;  %v14355_v23 = vld [vmem:[#allocation107_spill] sm:$0xff]  ;;  %v14359_v16 = vld [vmem:[#allocation66_spill] sm:$0xff] }
 0x34a   : > { %9137 = vmatpush3.bf16.msra.mxu1 %v14343_v7  ;;  %4217 = vmatprep.mubr.f32.mxu1 %v14344_v54  ;;  %v14356_v44 = vand.u32 4294901760, %v14355_v23 }
 0x34b   : > { %9139 = vmatprep.subr.bf16.mxu1 %v14346_v10  ;;  %5489 = vmatprep.mubr.f32.mxu0 %v14347_v4  ;;  %v9374_v51 = vpack.c.bf16 %v14352_v62, %v13926_v12  ;;  %v13931_v4 = vand.u32 4294901760, %v12711_v60  ;;  %v14360_v62 = vld [vmem:[#allocation70_spill] sm:$0xff]  ;;  %v14361_v12 = vand.u32 4294901760, %v14311_v18  ;;  %v14369_v18 = vld [vmem:[#allocation73_spill] sm:$0xff] }
 0x34c   : > { %9371 = vmatprep.subr.bf16.mxu0 %v9370_v35  ;;  %5492 = vmatmul.mubr.f32.gmra.mrb[72].mxu0 %v12567_v45  ;;  %v14354_v35 = vld [vmem:[#allocation81_spill] sm:$0xff]  ;;  %v9376_v57 = vpack.c.bf16 %v14356_v44, %v13927_v59  ;;  %v13930_v45 = vand.u32 4294901760, %v12706_v26  ;;  %v14362_v44 = vld [vmem:[#allocation20_spill] sm:$0xff]  ;;  %v14364_v59 = vand.u32 4294901760, %v14312_v1 }
 0x34d   : > { %4220 = vmatmul.mubr.f32.gmra.mrb[54].mxu1 %v14349_v22  ;;  %9373 = vmatpush3.bf16.msra.mxu0 %v9372_v63  ;;  %v14357_v63 = vld [vmem:[#allocation85_spill] sm:$0xff] }
 0x34e   : > { %9141 = vmatpush3.bf16.msra.mxu1 %v14350_v40  ;;  %4226 = vmatprep.mubr.f32.mxu1 %v14351_v30  ;;  %v9378_v23 = vpack.c.bf16 %v14361_v12, %v13930_v45  ;;  %v14370_v12 = vld [vmem:[#allocation135_spill] sm:$0xff]  ;;  %v14373_v1 = vld [vmem:[#allocation45_spill] sm:$0xff] }
 0x34f   : > { %9143 = vmatprep.subr.bf16.mxu1 %v14353_v11  ;;  %5498 = vmatprep.mubr.f32.mxu0 %v14354_v35  ;;  %v14366_v35 = vld [vmem:[#allocation71_spill] sm:$0xff] }
 0x350   : > { %9375 = vmatprep.subr.bf16.mxu0 %v9374_v51  ;;  %5501 = vmatmul.mubr.f32.gmra.mrb[74].mxu0 %v14357_v63  ;;  %v14363_v51 = vld [vmem:[#allocation84_spill] sm:$0xff]  ;;  %v9380_v63 = vpack.c.bf16 %v14364_v59, %v13931_v4  ;;  %v14371_v45 = vld [vmem:[#allocation11_spill] sm:$0xff]  ;;  %v14376_v4 = vld [vmem:[#allocation77_spill] sm:$0xff] }
 0x351   : > { %4229 = vmatmul.mubr.f32.gmra.mrb[56].mxu1 %v14358_v37  ;;  %9377 = vmatpush3.bf16.msra.mxu0 %v9376_v57  ;;  %v14365_v57 = vld [vmem:[#allocation42_spill] sm:$0xff]  ;;  %v14374_v59 = vld [vmem:[#allocation15_spill] sm:$0xff] }
 0x352   : > { %9145 = vmatpush3.bf16.msra.mxu1 %v14359_v16  ;;  %4235 = vmatprep.mubr.f32.mxu1 %v14360_v62 }
 0x353   : > { %9147 = vmatprep.subr.bf16.mxu1 %v14362_v44  ;;  %5507 = vmatprep.mubr.f32.mxu0 %v14363_v51  ;;  %v14372_v51 = vld [vmem:[#allocation143_spill] sm:$0xff] }
 0x354   : > { %9379 = vmatprep.subr.bf16.mxu0 %v9378_v23  ;;  %5510 = vmatmul.mubr.f32.gmra.mrb[76].mxu0 %v14365_v57  ;;  %v14375_v23 = vld [vmem:[#allocation144_spill] sm:$0xff]  ;;  %v14378_v57 = vld [vmem:[#allocation146_spill] sm:$0xff] }
 0x355   : > { %4238 = vmatmul.mubr.f32.gmra.mrb[58].mxu1 %v14366_v35  ;;  %9381 = vmatpush3.bf16.msra.mxu0 %v9380_v63  ;;  %v14377_v63 = vld [vmem:[#allocation136_spill] sm:$0xff] }
 0x356   : > { %9149 = vmatpush3.bf16.msra.mxu1 %v14367_v55  ;;  %4244 = vmatprep.mubr.f32.mxu1 %v14368_v43 }
 0x357   : > { %9151 = vmatprep.subr.bf16.mxu1 %v14369_v18  ;;  %5861 = vmatprep.mubr.f32.mxu0 %v14370_v12 }
 0x358   : > { %5863 = vmatmul.mubr.f32.vlgmr.msra.gmra.mrb[78].mxu0 %v14371_v45 }
 0x359   : > { %4247 = vmatmul.mubr.f32.gmra.mrb[60].mxu1 %v14372_v51  ;;  %5868 = vmatprep.mubr.f32.mxu0 %v14373_v1 }
 0x35a   : > { %9153 = vmatpush3.bf16.msra.mxu1 %v14374_v59  ;;  %4253 = vmatprep.mubr.f32.mxu1 %v14375_v23 }
 0x35b   : > { %9155 = vmatprep.subr.bf16.mxu1 %v14376_v4 }
 0x35c   : > { %5870 = vmatmul.mubr.f32.gmra.mrb[80].mxu0 %v14377_v63 }
 0x35d   : > { %4256 = vmatmul.mubr.f32.gmra.mrb[62].mxu1 %v14378_v57  ;;  %5875 = vmatprep.mubr.f32.mxu0 %v14379_v33  ;;  %v14386_v33 = vld [vmem:[#allocation68_spill] sm:$0xff] }
 0x35e   : > { %9157 = vmatpush3.bf16.msra.mxu1 %v14380_v49  ;;  %4360 = vmatprep.mubr.f32.mxu1 %v14381_v31  ;;  %v14387_v31 = vand.u32 4294901760, %v14337_v14  ;;  %v14398_v14 = vld [vmem:[#allocation118_spill] sm:$0xff] }
 0x35f   : > { %9191 = vmatprep.subr.bf16.mxu1 %v14329_v0  ;;  %v14390_v0 = vld [vmem:[#allocation147_spill] sm:$0xff] }
 0x360   : > { %5877 = vmatmul.mubr.f32.gmra.mrb[82].mxu0 %v14382_v52 }
 0x361   : > { %4364 = vmatmul.mubr.f32.vlgmr.msra.gmra.mrb[64].mxu1 %v14383_v46  ;;  %5882 = vmatprep.mubr.f32.mxu0 %v14384_v6  ;;  %v14389_v46 = vand.u32 4294901760, %v12252_v20  ;;  %v14395_v20 = vand.u32 4294901760, %v14349_v22  ;;  %v14401_v22 = vand.u32 4294901760, %v14360_v62  ;;  %v14408_v62 = vand.u32 4294901760, %v14207_v17 }
 0x362   : > { %9193 = vmatpush3.bf16.msra.mxu1 %v14332_v38  ;;  %4371 = vmatprep.mubr.f32.mxu1 %v14385_v13  ;;  %v14391_v13 = vand.u32 4294901760, %v14342_v29  ;;  %v14393_v38 = vand.u32 4294901760, %v14344_v54  ;;  %v14397_v29 = vand.u32 4294901760, %v14351_v30  ;;  %v14403_v54 = vand.u32 4294901760, %v14366_v35 }
 0x363   : > { %9195 = vmatprep.subr.bf16.mxu1 %v14335_v5  ;;  %v14396_v5 = vld [vmem:[#allocation27_spill] sm:$0xff]  ;;  %v14406_v30 = vand.u32 4294901760, %v14372_v51  ;;  %v5037_v35 = vsub.f32 %v14207_v17, %v14408_v62  ;;  %v14411_v51 = vld [vmem:[#allocation12_spill] sm:$0xff] }
 0x364   : > { %5884 = vmatmul.mubr.f32.gmra.mrb[84].mxu0 %v14386_v33 }
 0x365   : > { %4375 = vmatmul.mubr.f32.gmra.mrb[66].mxu1 %v14387_v31  ;;  %5889 = vmatprep.mubr.f32.mxu0 %v14388_v39  ;;  %v14412_v31 = vand.u32 4294901760, %v14378_v57  ;;  %v14417_v57 = vld [vmem:[#allocation80_spill] sm:$0xff] }
 0x366   : > { %9197 = vmatpush3.bf16.msra.mxu1 %v14338_v56  ;;  %4382 = vmatprep.mubr.f32.mxu1 %v14389_v46  ;;  %v14399_v56 = vand.u32 4294901760, %v14358_v37  ;;  %v14405_v37 = vand.u32 4294901760, %v11950_v21 }
 0x367   : > { %9199 = vmatprep.subr.bf16.mxu1 %v14340_v32  ;;  %v14400_v32 = vld [vmem:[#allocation120_spill] sm:$0xff] }
 0x368   : > { %5891 = vmatmul.mubr.f32.gmra.mrb[86].mxu0 %v14390_v0 }
 0x369   : > { %4386 = vmatmul.mubr.f32.gmra.mrb[68].mxu1 %v14391_v13  ;;  %5896 = vmatprep.mubr.f32.mxu0 %v14392_v42  ;;  %v14413_v13 = vld [vmem:[#allocation17_spill] sm:$0xff] }
 0x36a   : > { %9201 = vmatpush3.bf16.msra.mxu1 %v14343_v7  ;;  %4393 = vmatprep.mubr.f32.mxu1 %v14393_v38  ;;  %v14402_v7 = vld [vmem:[#allocation18_spill] sm:$0xff]  ;;  %v5171_v17 = vand.u32 4294901760, %v14413_v13  ;;  %v5038_v38 = vand.u32 4294901760, %v5037_v35 }
 0x36b   : > { %9203 = vmatprep.subr.bf16.mxu1 %v14346_v10  ;;  %v14404_v10 = vand.u32 4294901760, %v14368_v43  ;;  %v14409_v43 = vand.u32 4294901760, %v14375_v23  ;;  %v14423_v35 = vld [vmem:[#allocation86_spill] sm:$0xff] }
 0x36c   : > { %5898 = vmatmul.mubr.f32.gmra.mrb[88].mxu0 %v14394_v19  ;;  %v14427_v13 = vld [vmem:[#allocation126_spill] sm:$0xff] }
 0x36d   : > { %4397 = vmatmul.mubr.f32.gmra.mrb[70].mxu1 %v14395_v20  ;;  %5903 = vmatprep.mubr.f32.mxu0 %v14396_v5 }
 0x36e   : > { %9205 = vmatpush3.bf16.msra.mxu1 %v14350_v40  ;;  %4404 = vmatprep.mubr.f32.mxu1 %v14397_v29  ;;  %v5149_v40 = vsub.f32 %v11950_v21, %v14405_v37  ;;  %v14419_v37 = vld [vmem:[#allocation41_spill] sm:$0xff] }
 0x36f   : > { %9207 = vmatprep.subr.bf16.mxu1 %v14353_v11  ;;  %v14407_v11 = vld [vmem:[#allocation21_spill] sm:$0xff] }
 0x370   : > { %5905 = vmatmul.mubr.f32.gmra.mrb[90].mxu0 %v14398_v14 }
 0x371   : > { %4408 = vmatmul.mubr.f32.gmra.mrb[72].mxu1 %v14399_v56  ;;  %5910 = vmatprep.mubr.f32.mxu0 %v14400_v32  ;;  %v5059_v56 = vand.u32 4294901760, %v14417_v57 }
 0x372   : > { %9209 = vmatpush3.bf16.msra.mxu1 %v14359_v16  ;;  %4415 = vmatprep.mubr.f32.mxu1 %v14401_v22  ;;  %v5157_v16 = vand.u32 4294901760, %v14407_v11  ;;  %v14421_v11 = vld [vmem:[#allocation123_spill] sm:$0xff] }
 0x373   : > { %9211 = vmatprep.subr.bf16.mxu1 %v14362_v44  ;;  %v14410_v44 = vand.u32 4294901760, %v14218_v8 }
 0x374   : > { %5912 = vmatmul.mubr.f32.gmra.mrb[92].mxu0 %v14402_v7 }
 0x375   : > { %4419 = vmatmul.mubr.f32.gmra.mrb[74].mxu1 %v14403_v54  ;;  %v5163_v21 = vsub.f32 %v14218_v8, %v14410_v44  ;;  %v14416_v8 = vand.u32 4294901760, %v14229_v9  ;;  %v14418_v54 = vld [vmem:[#allocation122_spill] sm:$0xff]  ;;  %v14424_v44 = vld [vmem:[#allocation124_spill] sm:$0xff] }
 0x376   : > { %9213 = vmatpush3.bf16.msra.mxu1 %v14367_v55  ;;  %4426 = vmatprep.mubr.f32.mxu1 %v14404_v10  ;;  %v5150_v55 = vand.u32 4294901760, %v5149_v40  ;;  %v5185_v40 = vand.u32 4294901760, %v14419_v37 }
 0x377   : > { %9215 = vmatprep.subr.bf16.mxu1 %v14369_v18  ;;  %v5045_v18 = vand.u32 4294901760, %v14411_v51  ;;  %v5164_v20 = vand.u32 4294901760, %v5163_v21  ;;  %v5177_v29 = vsub.f32 %v14229_v9, %v14416_v8  ;;  %v14422_v9 = vand.u32 4294901760, %v12543_v27  ;;  %v14425_v51 = vld [vmem:[#allocation90_spill] sm:$0xff] }
 0x378   : > { %v9254_v46 = vpack.c.bf16 %v5157_v16, %v5150_v55 }
 0x379   : > { %4430 = vmatmul.mubr.f32.gmra.mrb[76].mxu1 %v14406_v30  ;;  %v9256_v22 = vpack.c.bf16 %v5045_v18, %v5038_v38  ;;  %v9258_v10 = vpack.c.bf16 %v5171_v17, %v5164_v20  ;;  %v5178_v16 = vand.u32 4294901760, %v5177_v29  ;;  %v5191_v62 = vsub.f32 %v12543_v27, %v14422_v9  ;;  %v14430_v20 = vld [vmem:[#allocation128_spill] sm:$0xff]  ;;  %v14431_v29 = vld [vmem:[#allocation95_spill] sm:$0xff] }
 0x37a   : > { %9217 = vmatpush3.bf16.msra.mxu1 %v14374_v59  ;;  %4437 = vmatprep.mubr.f32.mxu1 %v14409_v43  ;;  %v14414_v59 = vand.u32 4294901760, %v14224_v2  ;;  %v5073_v43 = vand.u32 4294901760, %v14423_v35  ;;  %v5199_v18 = vand.u32 4294901760, %v14425_v51  ;;  %v14428_v27 = vand.u32 4294901760, %v12579_v36 }
 0x37b   : > { %9219 = vmatprep.subr.bf16.mxu1 %v14376_v4  ;;  %v14415_v4 = vld [vmem:[#allocation121_spill] sm:$0xff]  ;;  %v9262_v21 = vpack.c.bf16 %v5185_v40, %v5178_v16  ;;  %v5192_v17 = vand.u32 4294901760, %v5191_v62  ;;  %v5213_v57 = vand.u32 4294901760, %v14431_v29  ;;  %v14435_v40 = vld [vmem:[#allocation96_spill] sm:$0xff]  ;;  %v14447_v29 = vld [vmem:[#allocation115_spill] sm:$0xff] }
 0x37c   : > { %v5051_v23 = vsub.f32 %v14224_v2, %v14414_v59  ;;  %v14420_v2 = vand.u32 4294901760, %v12535_v3  ;;  %v5205_v38 = vsub.f32 %v12579_v36, %v14428_v27  ;;  %v14429_v59 = vld [vmem:[#allocation91_spill] sm:$0xff]  ;;  %v14434_v36 = vand.u32 4294901760, %v12648_v53  ;;  %v14437_v16 = vld [vmem:[#allocation101_spill] sm:$0xff] }
 0x37d   : > { %4441 = vmatmul.mubr.f32.gmra.mrb[78].mxu1 %v14412_v31  ;;  %v9266_v8 = vpack.c.bf16 %v5199_v18, %v5192_v17  ;;  %v5227_v9 = vand.u32 4294901760, %v14437_v16  ;;  %v14461_v16 = vld [vmem:[#allocation98_spill] sm:$0xff] }
 0x37e   : > { %9221 = vmatpush3.bf16.msra.mxu1 %v14380_v49  ;;  %4760 = vmatprep.mubr.f32.mxu1 %v14415_v4  ;;  %v5052_v30 = vand.u32 4294901760, %v5051_v23  ;;  %v5065_v49 = vsub.f32 %v12535_v3, %v14420_v2  ;;  %v14426_v3 = vand.u32 4294901760, %v12572_v50  ;;  %v5087_v23 = vand.u32 4294901760, %v14429_v59 }
 0x37f   : > { %9255 = vmatprep.subr.bf16.mxu1 %v9254_v46  ;;  %v5219_v37 = vsub.f32 %v12648_v53, %v14434_v36  ;;  %v14440_v53 = vand.u32 4294901760, %v12678_v34 }
 0x380   : > { %v9260_v55 = vpack.c.bf16 %v5059_v56, %v5052_v30  ;;  %v5066_v31 = vand.u32 4294901760, %v5065_v49  ;;  %v5079_v46 = vsub.f32 %v12572_v50, %v14426_v3  ;;  %v14432_v50 = vand.u32 4294901760, %v12616_v41  ;;  %v14436_v49 = vld [vmem:[#allocation133_spill] sm:$0xff] }
 0x381   : > { %4762 = vmatmul.mubr.f32.vlgmr.msra.gmra.mrb[80].mxu1 %v14418_v54  ;;  %v14433_v54 = vld [vmem:[#allocation129_spill] sm:$0xff]  ;;  %v5101_v30 = vand.u32 4294901760, %v14435_v40  ;;  %v14456_v40 = vld [vmem:[#allocation83_spill] sm:$0xff] }
 0x382   : > { %9257 = vmatpush3.bf16.msra.mxu1 %v9256_v22  ;;  %4767 = vmatprep.mubr.f32.mxu1 %v14421_v11  ;;  %v9264_v4 = vpack.c.bf16 %v5073_v43, %v5066_v31  ;;  %v5080_v56 = vand.u32 4294901760, %v5079_v46  ;;  %v5093_v22 = vsub.f32 %v12616_v41, %v14432_v50  ;;  %v14438_v41 = vand.u32 4294901760, %v12653_v58  ;;  %v14439_v43 = vld [vmem:[#allocation134_spill] sm:$0xff]  ;;  %v14442_v31 = vld [vmem:[#allocation61_spill] sm:$0xff]  ;;  %v14443_v46 = vld [vmem:[#allocation108_spill] sm:$0xff] }
 0x383   : > { %9259 = vmatprep.subr.bf16.mxu1 %v9258_v10  ;;  %v5206_v10 = vand.u32 4294901760, %v5205_v38 }
 0x384   : > { %v9268_v2 = vpack.c.bf16 %v5087_v23, %v5080_v56  ;;  %v5094_v62 = vand.u32 4294901760, %v5093_v22  ;;  %v5107_v35 = vsub.f32 %v12653_v58, %v14438_v41  ;;  %v14444_v58 = vand.u32 4294901760, %v12683_v47  ;;  %v14446_v23 = vld [vmem:[#allocation110_spill] sm:$0xff]  ;;  %v14449_v22 = vld [vmem:[#allocation116_spill] sm:$0xff] }
 0x385   : > { %4769 = vmatmul.mubr.f32.gmra.mrb[82].mxu1 %v14424_v44  ;;  %v9270_v11 = vpack.c.bf16 %v5213_v57, %v5206_v10  ;;  %v5233_v44 = vsub.f32 %v12678_v34, %v14440_v53  ;;  %v14445_v34 = vand.u32 4294901760, %v12706_v26  ;;  %v5255_v57 = vand.u32 4294901760, %v14447_v29  ;;  %v14464_v41 = vld [vmem:[#allocation106_spill] sm:$0xff] }
 0x386   : > { %9261 = vmatpush3.bf16.msra.mxu1 %v9260_v55  ;;  %4774 = vmatprep.mubr.f32.mxu1 %v14427_v13  ;;  %v5220_v55 = vand.u32 4294901760, %v5219_v37  ;;  %v9272_v18 = vpack.c.bf16 %v5101_v30, %v5094_v62  ;;  %v5241_v13 = vand.u32 4294901760, %v14443_v46  ;;  %v5108_v17 = vand.u32 4294901760, %v5107_v35  ;;  %v14454_v37 = vld [vmem:[#allocation139_spill] sm:$0xff]  ;;  %v14457_v30 = vld [vmem:[#allocation88_spill] sm:$0xff] }
 0x387   : > { %9263 = vmatprep.subr.bf16.mxu1 %v9262_v21  ;;  %v14441_v21 = vld [vmem:[#allocation102_spill] sm:$0xff]  ;;  %v5121_v27 = vsub.f32 %v12683_v47, %v14444_v58  ;;  %v5234_v38 = vand.u32 4294901760, %v5233_v44  ;;  %v5247_v59 = vsub.f32 %v12706_v26, %v14445_v34  ;;  %v14448_v47 = vand.u32 4294901760, %v12711_v60  ;;  %v14463_v62 = vld [vmem:[#allocation104_spill] sm:$0xff]  ;;  %v14466_v44 = vld [vmem:[#allocation113_spill] sm:$0xff] }
 0x388   : > { %v5115_v51 = vand.u32 4294901760, %v14441_v21  ;;  %v9274_v3 = vpack.c.bf16 %v5227_v9, %v5220_v55  ;;  %v5143_v26 = vand.u32 4294901760, %v14449_v22  ;;  %v14462_v9 = vld [vmem:[#allocation99_spill] sm:$0xff]  ;;  %v14467_v21 = vld [vmem:[#allocation142_spill] sm:$0xff]  ;;  %v14481_v22 = vld [vmem:[#allocation117_spill] sm:$0xff] }
 0x389   : > { %4776 = vmatmul.mubr.f32.gmra.mrb[84].mxu1 %v14430_v20  ;;  %v5122_v56 = vand.u32 4294901760, %v5121_v27  ;;  %v5135_v50 = vsub.f32 %v12711_v60, %v14448_v47  ;;  %v14451_v60 = vld [vmem:[#allocation5_spill] sm:$0xff]  ;;  %v14473_v27 = vld [vmem:[#allocation148_spill] sm:$0xff]  ;;  %v14475_v34 = vld [vmem:[#allocation150_spill] sm:$0xff] }
 0x38a   : > { %9265 = vmatpush3.bf16.msra.mxu1 %v9264_v4  ;;  %4781 = vmatprep.mubr.f32.mxu1 %v14433_v54  ;;  %v5129_v4 = vand.u32 4294901760, %v14446_v23  ;;  %v9276_v20 = vpack.c.bf16 %v5115_v51, %v5108_v17  ;;  %v14468_v51 = vand.u32 4294901760, %v14467_v21  ;;  %v14489_v21 = vld [vmem:[#allocation26_spill] sm:$0xff] }
 0x38b   : > { %9267 = vmatprep.subr.bf16.mxu1 %v9266_v8  ;;  %v9278_v8 = vpack.c.bf16 %v5241_v13, %v5234_v38  ;;  %v14471_v13 = vld [vmem:[#allocation145_spill] sm:$0xff]  ;;  %v14474_v38 = vand.u32 4294901760, %v14473_v27 }
 0x38c   : > { %v9280_v54 = vpack.c.bf16 %v5129_v4, %v5122_v56  ;;  %v14472_v17 = vand.u32 4294901760, %v14471_v13 }
 0x38d   : > { %4783 = vmatmul.mubr.f32.gmra.mrb[86].mxu1 %v14436_v49  ;;  %v14459_v49 = vld [vmem:[#allocation93_spill] sm:$0xff] }
 0x38e   : > { %9269 = vmatpush3.bf16.msra.mxu1 %v9268_v2  ;;  %4788 = vmatprep.mubr.f32.mxu1 %v14439_v43  ;;  %v14458_v2 = vld [vmem:[#allocation6_spill] sm:$0xff]  ;;  %v14465_v43 = vld [vmem:[#allocation112_spill] sm:$0xff] }
 0x38f   : > { %9271 = vmatprep.subr.bf16.mxu1 %v9270_v11  ;;  %v14460_v11 = vld [vmem:[#allocation28_spill] sm:$0xff] }
 0x391   : > { %4790 = vmatmul.mubr.f32.gmra.mrb[88].mxu1 %v14442_v31  ;;  %v14469_v31 = vld [vmem:[#allocation131_spill] sm:$0xff] }
 0x392   : > { %9273 = vmatpush3.bf16.msra.mxu1 %v9272_v18  ;;  %4795 = vmatprep.mubr.f32.mxu1 %v12275_v48  ;;  %v5248_v48 = vand.u32 4294901760, %v5247_v59  ;;  %v14476_v59 = vand.u32 4294901760, %v14475_v34 }
 0x393   : > { %9275 = vmatprep.subr.bf16.mxu1 %v9274_v3  ;;  %v14470_v3 = vand.u32 4294901760, %v14469_v31 }
 0x394   : > { %v9282_v10 = vpack.c.bf16 %v5255_v57, %v5248_v48  ;;  %v14479_v57 = vld [vmem:[#allocation152_spill] sm:$0xff] }
 0x395   : > { %4797 = vmatmul.mubr.f32.gmra.mrb[90].mxu1 %v12320_v15  ;;  %v5136_v15 = vand.u32 4294901760, %v5135_v50  ;;  %v14480_v56 = vand.u32 4294901760, %v14479_v57 }
 0x396   : > { %9277 = vmatpush3.bf16.msra.mxu1 %v9276_v20  ;;  %4802 = vmatprep.mubr.f32.mxu1 %v12333_v28  ;;  %v14450_v28 = vld [vmem:[#allocation10_spill] sm:$0xff]  ;;  %v14477_v20 = vld [vmem:[#allocation151_spill] sm:$0xff] }
 0x397   : > { %9279 = vmatprep.subr.bf16.mxu1 %v9278_v8  ;;  %v9284_v36 = vpack.c.bf16 %v5143_v26, %v5136_v15  ;;  %v14478_v8 = vand.u32 4294901760, %v14477_v20  ;;  %v14482_v26 = vand.u32 4294901760, %v14481_v22  ;;  %v14483_v15 = vld [vmem:[#allocation153_spill] sm:$0xff] }
 0x399   : > { %4804 = vmatmul.mubr.f32.gmra.mrb[92].mxu1 %v12362_v25  ;;  %v14452_v25 = vld [vmem:[#allocation79_spill] sm:$0xff] }
 0x39a   : > { %9281 = vmatpush3.bf16.msra.mxu1 %v9280_v54  ;;  %4809 = vmatprep.mubr.f32.mxu1 %v12372_v61  ;;  %v14453_v61 = vld [vmem:[#allocation13_spill] sm:$0xff] }
 0x39b   : > { %9283 = vmatprep.subr.bf16.mxu1 %v9282_v10 }
 0x39d   : > { %4811 = vmatmul.mubr.f32.gmra.mrb[94].mxu1 %v12387_v24  ;;  %v14455_v24 = vld [vmem:[#allocation82_spill] sm:$0xff] }
 0x39e   : > { %9285 = vmatpush3.bf16.msra.mxu1 %v9284_v36  ;;  %5258 = vmatprep.mubr.f32.mxu1 %v14370_v12  ;;  %v14484_v36 = vand.u32 4294901760, %v14483_v15 }
 0x39f   : > { %9319 = vmatprep.subr.bf16.mxu1 %v14450_v28 }
 0x3a1   : > { %5260 = vmatmul.mubr.f32.vlgmr.msra.gmra.mrb[96].mxu1 %v14371_v45 }
 0x3a2   : > { %9321 = vmatpush3.bf16.msra.mxu1 %v14451_v60  ;;  %5265 = vmatprep.mubr.f32.mxu1 %v14373_v1 }
 0x3a3   : > { %9323 = vmatprep.subr.bf16.mxu1 %v14452_v25 }
 0x3a5   : > { %5267 = vmatmul.mubr.f32.gmra.mrb[98].mxu1 %v14377_v63 }
 0x3a6   : > { %9325 = vmatpush3.bf16.msra.mxu1 %v14453_v61  ;;  %5272 = vmatprep.mubr.f32.mxu1 %v14454_v37 }
 0x3a7   : > { %9327 = vmatprep.subr.bf16.mxu1 %v14455_v24 }
 0x3a9   : > { %5274 = vmatmul.mubr.f32.gmra.mrb[100].mxu1 %v14382_v52 }
 0x3aa   : > { %9329 = vmatpush3.bf16.msra.mxu1 %v14456_v40  ;;  %5279 = vmatprep.mubr.f32.mxu1 %v14384_v6 }
 0x3ab   : > { %9331 = vmatprep.subr.bf16.mxu1 %v14457_v30 }
 0x3ad   : > { %5281 = vmatmul.mubr.f32.gmra.mrb[102].mxu1 %v14386_v33 }
 0x3ae   : > { %9333 = vmatpush3.bf16.msra.mxu1 %v14458_v2  ;;  %5286 = vmatprep.mubr.f32.mxu1 %v14388_v39 }
 0x3af   : > { %9335 = vmatprep.subr.bf16.mxu1 %v14459_v49 }
 0x3b1   : > { %5288 = vmatmul.mubr.f32.gmra.mrb[104].mxu1 %v14390_v0 }
 0x3b2   : > { %9337 = vmatpush3.bf16.msra.mxu1 %v14460_v11  ;;  %5293 = vmatprep.mubr.f32.mxu1 %v14392_v42 }
 0x3b3   : > { %9339 = vmatprep.subr.bf16.mxu1 %v14461_v16 }
 0x3b5   : > { %5295 = vmatmul.mubr.f32.gmra.mrb[106].mxu1 %v14394_v19  ;;  %v8116_v35 = vpop.f32.mrb[30].mxu0 }
 0x3b6   : > { %9341 = vmatpush3.bf16.msra.mxu1 %v14462_v9  ;;  %5300 = vmatprep.mubr.f32.mxu1 %v14396_v5  ;;  %v8117_v55 = vpop.f32.mrb[31].mxu0 }
 0x3b7   : > { %9343 = vmatprep.subr.bf16.mxu1 %v14463_v62  ;;  %v13041_v53 = vadd.f32 %v8117_v55, %v8116_v35 }
 0x3b9   : > { %5302 = vmatmul.mubr.f32.gmra.mrb[108].mxu1 %v14398_v14 }
 0x3ba   : > { %9345 = vmatpush3.bf16.msra.mxu1 %v14464_v41  ;;  %5307 = vmatprep.mubr.f32.mxu1 %v14400_v32 }
 0x3bb   : > { %9347 = vmatprep.subr.bf16.mxu1 %v14465_v43  ;;  %v8119_v18 = vpop.f32.mrb[32].mxu0 }
 0x3bc   : > { %v8120_v46 = vpop.f32.mrb[33].mxu0 }
 0x3bd   : > { %5309 = vmatmul.mubr.f32.gmra.mrb[110].mxu1 %v14402_v7  ;;  %v13053_v58 = vadd.f32 %v8120_v46, %v8119_v18  ;;  %v14491_v18 = vld [vmem:[#allocation81_spill] sm:$0xff] }
 0x3be   : > { %9349 = vmatpush3.bf16.msra.mxu1 %v14466_v44  ;;  %5614 = vmatprep.mubr.f32.mxu1 %v14468_v51  ;;  %v14490_v51 = vand.u32 4294901760, %v14489_v21  ;;  %v14493_v46 = vld [vmem:[#allocation85_spill] sm:$0xff] }
 0x3bf   : > { %9383 = vmatprep.subr.bf16.mxu1 %v14450_v28  ;;  %v14494_v13 = vand.u32 4294901760, %v14493_v46 }
 0x3c1   : > { %5618 = vmatmul.mubr.f32.vlgmr.msra.gmra.mrb[112].mxu1 %v14470_v3 }
 0x3c2   : > { %9385 = vmatpush3.bf16.msra.mxu1 %v14451_v60  ;;  %5625 = vmatprep.mubr.f32.mxu1 %v14472_v17  ;;  %v8122_v23 = vpop.f32.mrb[34].mxu0  ;;  %v14485_v60 = vld [vmem:[#allocation25_spill] sm:$0xff] }
 0x3c3   : > { %9387 = vmatprep.subr.bf16.mxu1 %v14452_v25  ;;  %v8123_v4 = vpop.f32.mrb[35].mxu0  ;;  %v14486_v25 = vand.u32 4294901760, %v14485_v60 }
 0x3c4   : > { %v13064_v29 = vadd.f32 %v8123_v4, %v8122_v23 }
 0x3c5   : > { %5629 = vmatmul.mubr.f32.gmra.mrb[114].mxu1 %v14474_v38  ;;  %v14495_v38 = vld [vmem:[#allocation84_spill] sm:$0xff] }
 0x3c6   : > { %9389 = vmatpush3.bf16.msra.mxu1 %v14453_v61  ;;  %5636 = vmatprep.mubr.f32.mxu1 %v14476_v59  ;;  %v8125_v47 = vpop.f32.mrb[36].mxu0  ;;  %v14487_v61 = vld [vmem:[#allocation119_spill] sm:$0xff]  ;;  %v14496_v34 = vand.u32 4294901760, %v14495_v38 }
 0x3c7   : > { %9391 = vmatprep.subr.bf16.mxu1 %v14455_v24  ;;  %v7892_v50 = vpop.f32.mrb[16].mxu1  ;;  %v8126_v48 = vpop.f32.mrb[37].mxu0  ;;  %v14488_v24 = vand.u32 4294901760, %v14487_v61 }
 0x3c8   : > { %v7893_v54 = vpop.f32.mrb[17].mxu1  ;;  %v13072_v10 = vadd.f32 %v8126_v48, %v8125_v47 }
 0x3c9   : > { %5640 = vmatmul.mubr.f32.gmra.mrb[116].mxu1 %v14478_v8  ;;  %v13077_v28 = vadd.f32 %v7893_v54, %v7892_v50 }
 0x3ca   : > { %9393 = vmatpush3.bf16.msra.mxu1 %v14456_v40  ;;  %5647 = vmatprep.mubr.f32.mxu1 %v14480_v56 }
 0x3cb   : > { %9395 = vmatprep.subr.bf16.mxu1 %v14457_v30 }
 0x3cd   : > { %5651 = vmatmul.mubr.f32.gmra.mrb[118].mxu1 %v14482_v26  ;;  %v7895_v40 = vpop.f32.mrb[18].mxu1 }
 0x3ce   : > { %9397 = vmatpush3.bf16.msra.mxu1 %v14458_v2  ;;  %5658 = vmatprep.mubr.f32.mxu1 %v14484_v36  ;;  %v7896_v30 = vpop.f32.mrb[19].mxu1  ;;  %v8128_v2 = vpop.f32.mrb[38].mxu0 }
 0x3cf   : > { %9399 = vmatprep.subr.bf16.mxu1 %v14459_v49  ;;  %v13086_v35 = vadd.f32 %v7896_v30, %v7895_v40  ;;  %v8129_v55 = vpop.f32.mrb[39].mxu0 }
 0x3d0   : > { %v13090_v49 = vadd.f32 %v8129_v55, %v8128_v2 }
 0x3d1   : > { %5662 = vmatmul.mubr.f32.gmra.mrb[120].mxu1 %v14486_v25 }
 0x3d2   : > { %9401 = vmatpush3.bf16.msra.mxu1 %v14460_v11  ;;  %5669 = vmatprep.mubr.f32.mxu1 %v14488_v24  ;;  %v14492_v11 = vand.u32 4294901760, %v14491_v18  ;;  %v7898_v31 = vpop.f32.mrb[20].mxu1 }
 0x3d3   : > { %9403 = vmatprep.subr.bf16.mxu1 %v14461_v16  ;;  %v7899_v3 = vpop.f32.mrb[21].mxu1  ;;  %v8131_v16 = vpop.f32.mrb[40].mxu0 }
 0x3d4   : > { %v13098_v17 = vadd.f32 %v7899_v3, %v7898_v31  ;;  %v8132_v27 = vpop.f32.mrb[41].mxu0 }
 0x3d5   : > { %5673 = vmatmul.mubr.f32.gmra.mrb[122].mxu1 %v14490_v51 }
 0x3d6   : > { %9405 = vmatpush3.bf16.msra.mxu1 %v14462_v9  ;;  %5680 = vmatprep.mubr.f32.mxu1 %v14492_v11  ;;  %v13103_v9 = vadd.f32 %v8132_v27, %v8131_v16 }
 0x3d7   : > { %9407 = vmatprep.subr.bf16.mxu1 %v14463_v62  ;;  %v7901_v59 = vpop.f32.mrb[22].mxu1  ;;  %v14497_v62 = vld [vmem:[#allocation42_spill] sm:$0xff] }
 0x3d8   : > { %v14498_v23 = vand.u32 4294901760, %v14497_v62  ;;  %v7902_v4 = vpop.f32.mrb[23].mxu1 }
 0x3d9   : > { %5684 = vmatmul.mubr.f32.gmra.mrb[124].mxu1 %v14494_v13  ;;  %v13110_v20 = vadd.f32 %v7902_v4, %v7901_v59  ;;  %v8134_v8 = vpop.f32.mrb[42].mxu0 }
 0x3da   : > { %9409 = vmatpush3.bf16.msra.mxu1 %v14464_v41  ;;  %5691 = vmatprep.mubr.f32.mxu1 %v14496_v34  ;;  %v8135_v41 = vpop.f32.mrb[43].mxu0 }
 0x3db   : > { %9411 = vmatprep.subr.bf16.mxu1 %v14465_v43  ;;  %v13112_v57 = vadd.f32 %v8135_v41, %v8134_v8 }
 0x3dd   : > { %5695 = vmatmul.mubr.f32.gmra.mrb[126].mxu1 %v14498_v23  ;;  %v8137_v43 = vpop.f32.mrb[44].mxu0 }
 0x3de   : > { %9413 = vmatpush3.bf16.msra.mxu1 %v14466_v44  ;;  %6014 = vmatprep.mubr.f32.mxu1 %v14370_v12  ;;  %v8138_v56 = vpop.f32.mrb[45].mxu0 }
 0x3df   : > { %v7904_v47 = vpop.f32.mrb[24].mxu1  ;;  %v13116_v50 = vadd.f32 %v8138_v56, %v8137_v43 }
 0x3e0   : > { %v7905_v48 = vpop.f32.mrb[25].mxu1 }
 0x3e1   : > { %6016 = vmatmul.mubr.f32.vlgmr.msra.gmra.mrb[128].mxu1 %v14371_v45  ;;  %v13119_v44 = vadd.f32 %v7905_v48, %v7904_v47 }
 0x3e2   : > { %6021 = vmatprep.mubr.f32.mxu1 %v14373_v1 }
 0x3e3   : > { %v7907_v12 = vpop.f32.mrb[26].mxu1 }
 0x3e4   : > { %v7908_v22 = vpop.f32.mrb[27].mxu1 }
 0x3e5   : > { %6023 = vmatmul.mubr.f32.gmra.mrb[130].mxu1 %v14377_v63  ;;  %v13123_v26 = vadd.f32 %v7908_v22, %v7907_v12  ;;  %v8228_v45 = vpop.f32.mrb[46].mxu0 }
 0x3e6   : > { %6028 = vmatprep.mubr.f32.mxu1 %v14454_v37  ;;  %v8229_v1 = vpop.f32.mrb[47].mxu0 }
 0x3e7   : > { %v7910_v54 = vpop.f32.mrb[28].mxu1  ;;  %v13126_v15 = vadd.f32 %v8229_v1, %v8228_v45 }
 0x3e8   : > { %v7911_v36 = vpop.f32.mrb[29].mxu1 }
 0x3e9   : > { %6030 = vmatmul.mubr.f32.gmra.mrb[132].mxu1 %v14382_v52  ;;  %v13129_v63 = vadd.f32 %v7911_v36, %v7910_v54 }
 0x3ea   : > { %6035 = vmatprep.mubr.f32.mxu1 %v14384_v6 }
 0x3eb   : > { %v7913_v60 = vpop.f32.mrb[30].mxu1 }
 0x3ec   : > { %v8231_v37 = vpop.f32.mrb[48].mxu0  ;;  %v7914_v52 = vpop.f32.mrb[31].mxu1 }
 0x3ed   : > { %6037 = vmatmul.mubr.f32.gmra.mrb[134].mxu1 %v14386_v33  ;;  %v8232_v25 = vpop.f32.mrb[49].mxu0  ;;  %v13135_v6 = vadd.f32 %v7914_v52, %v7913_v60 }
 0x3ee   : > { %6042 = vmatprep.mubr.f32.mxu1 %v14388_v39  ;;  %v13132_v61 = vadd.f32 %v8232_v25, %v8231_v37 }
 0x3f0   : > { %v8234_v24 = vpop.f32.mrb[50].mxu0 }
 0x3f1   : > { %6044 = vmatmul.mubr.f32.gmra.mrb[136].mxu1 %v14390_v0  ;;  %v8235_v30 = vpop.f32.mrb[51].mxu0 }
 0x3f2   : > { %6049 = vmatprep.mubr.f32.mxu1 %v14392_v42  ;;  %v7948_v40 = vpop.f32.mrb[32].mxu1  ;;  %v13138_v2 = vadd.f32 %v8235_v30, %v8234_v24 }
 0x3f3   : > { %v7949_v33 = vpop.f32.mrb[33].mxu1 }
 0x3f4   : > { %v7950_v39 = vadd.f32 %v7949_v33, %v7948_v40 }
 0x3f5   : > { %6051 = vmatmul.mubr.f32.gmra.mrb[138].mxu1 %v14394_v19 }
 0x3f6   : > { %6056 = vmatprep.mubr.f32.mxu1 %v14396_v5  ;;  %v8237_v55 = vpop.f32.mrb[52].mxu0  ;;  %v4008_v21 = vadd.f32 %v7950_v39, %v13077_v28  ;;  %v7951_v51 = vpop.f32.mrb[34].mxu1 }
 0x3f7   : > { %v8238_v0 = vpop.f32.mrb[53].mxu0  ;;  %v7952_v18 = vpop.f32.mrb[35].mxu1 }
 0x3f8   : > { %v13143_v11 = vadd.f32 %v8238_v0, %v8237_v55  ;;  %v7953_v42 = vadd.f32 %v7952_v18, %v7951_v51 }
 0x3f9   : > { %6058 = vmatmul.mubr.f32.gmra.mrb[140].mxu1 %v14398_v14 }
 0x3fa   : > { %6063 = vmatprep.mubr.f32.mxu1 %v14400_v32  ;;  %v8240_v31 = vpop.f32.mrb[54].mxu0  ;;  %v4015_v3 = vadd.f32 %v7953_v42, %v13086_v35 }
 0x3fb   : > { %v7954_v19 = vpop.f32.mrb[36].mxu1  ;;  %v8241_v16 = vpop.f32.mrb[55].mxu0 }
 0x3fc   : > { %v7955_v46 = vpop.f32.mrb[37].mxu1  ;;  %v13148_v5 = vadd.f32 %v8241_v16, %v8240_v31 }
 0x3fd   : > { %6065 = vmatmul.mubr.f32.gmra.mrb[142].mxu1 %v14402_v7  ;;  %v7956_v28 = vadd.f32 %v7955_v46, %v7954_v19 }
 0x3ff   : > { %v8243_v13 = vpop.f32.mrb[56].mxu0  ;;  %v4022_v27 = vadd.f32 %v7956_v28, %v13098_v17  ;;  %v7957_v38 = vpop.f32.mrb[38].mxu1 }
 0x400   : > { %v8244_v34 = vpop.f32.mrb[57].mxu0  ;;  %v7958_v14 = vpop.f32.mrb[39].mxu1 }
 0x401   : > { %v13152_v59 = vadd.f32 %v8244_v34, %v8243_v13  ;;  %v7959_v32 = vadd.f32 %v7958_v14, %v7957_v38 }
 0x403   : > { %v8246_v62 = vpop.f32.mrb[58].mxu0  ;;  %v4029_v35 = vadd.f32 %v7959_v32, %v13110_v20  ;;  %v7960_v23 = vpop.f32.mrb[40].mxu1 }
 0x404   : > { %v8247_v4 = vpop.f32.mrb[59].mxu0  ;;  %v7961_v8 = vpop.f32.mrb[41].mxu1 }
 0x405   : > { %v13155_v41 = vadd.f32 %v8247_v4, %v8246_v62  ;;  %v7962_v43 = vadd.f32 %v7961_v8, %v7960_v23 }
 0x407   : > { %v8249_v7 = vpop.f32.mrb[60].mxu0  ;;  %v4036_v56 = vadd.f32 %v7962_v43, %v13119_v44 }
 0x408   : > { %v7963_v47 = vpop.f32.mrb[42].mxu1  ;;  %v8250_v17 = vpop.f32.mrb[61].mxu0 }
 0x409   : > { %v7964_v48 = vpop.f32.mrb[43].mxu1  ;;  %v13158_v12 = vadd.f32 %v8250_v17, %v8249_v7 }
 0x40a   : > { %v7965_v22 = vadd.f32 %v7964_v48, %v7963_v47 }
 0x40b   : > { %v8340_v45 = vpop.f32.mrb[62].mxu0 }
 0x40c   : > { %v4043_v1 = vadd.f32 %v7965_v22, %v13123_v26  ;;  %v7966_v54 = vpop.f32.mrb[44].mxu1  ;;  %v8341_v20 = vpop.f32.mrb[63].mxu0 }
 0x40d   : > { %v7967_v36 = vpop.f32.mrb[45].mxu1  ;;  %v13161_v37 = vadd.f32 %v8341_v20, %v8340_v45 }
 0x40e   : > { %v7968_v60 = vadd.f32 %v7967_v36, %v7966_v54 }
 0x40f   : > { %v8343_v25 = vpop.f32.mrb[64].mxu0 }
 0x410   : > { %v4050_v52 = vadd.f32 %v7968_v60, %v13129_v63  ;;  %v7969_v24 = vpop.f32.mrb[46].mxu1  ;;  %v8344_v44 = vpop.f32.mrb[65].mxu0 }
 0x411   : > { %v7970_v40 = vpop.f32.mrb[47].mxu1  ;;  %v13164_v30 = vadd.f32 %v8344_v44, %v8343_v25 }
 0x412   : > { %v7971_v33 = vadd.f32 %v7970_v40, %v7969_v24 }
 0x413   : > { %v8346_v39 = vpop.f32.mrb[66].mxu0 }
 0x414   : > { %v4057_v55 = vadd.f32 %v7971_v33, %v13135_v6  ;;  %v8004_v51 = vpop.f32.mrb[48].mxu1  ;;  %v8347_v26 = vpop.f32.mrb[67].mxu0 }
 0x415   : > { %v8005_v0 = vpop.f32.mrb[49].mxu1  ;;  %v13167_v18 = vadd.f32 %v8347_v26, %v8346_v39 }
 0x416   : > { %v8006_v42 = vadd.f32 %v8005_v0, %v8004_v51 }
 0x417   : > { %v8349_v31 = vpop.f32.mrb[68].mxu0 }
 0x418   : > { %v4195_v19 = vadd.f32 %v8006_v42, %v4008_v21  ;;  %v8007_v16 = vpop.f32.mrb[50].mxu1  ;;  %v8350_v46 = vpop.f32.mrb[69].mxu0 }
 0x419   : > { %v8008_v63 = vpop.f32.mrb[51].mxu1  ;;  %v13169_v28 = vadd.f32 %v8350_v46, %v8349_v31 }
 0x41a   : > { %v8009_v13 = vadd.f32 %v8008_v63, %v8007_v16 }
 0x41b   : > { %v8352_v38 = vpop.f32.mrb[70].mxu0 }
 0x41c   : > { %v4204_v34 = vadd.f32 %v8009_v13, %v4015_v3  ;;  %v8010_v14 = vpop.f32.mrb[52].mxu1  ;;  %v8353_v32 = vpop.f32.mrb[71].mxu0 }
 0x41d   : > { %v8011_v62 = vpop.f32.mrb[53].mxu1  ;;  %v13171_v6 = vadd.f32 %v8353_v32, %v8352_v38 }
 0x41e   : > { %v8012_v23 = vadd.f32 %v8011_v62, %v8010_v14 }
 0x41f   : > { %v8355_v4 = vpop.f32.mrb[72].mxu0 }
 0x420   : > { %v4213_v8 = vadd.f32 %v8012_v23, %v4022_v27  ;;  %v8013_v43 = vpop.f32.mrb[54].mxu1  ;;  %v8356_v7 = vpop.f32.mrb[73].mxu0 }
 0x421   : > { %v8014_v47 = vpop.f32.mrb[55].mxu1  ;;  %v13173_v21 = vadd.f32 %v8356_v7, %v8355_v4 }
 0x422   : > { %v8015_v17 = vadd.f32 %v8014_v47, %v8013_v43 }
 0x423   : > { %v8358_v48 = vpop.f32.mrb[74].mxu0 }
 0x424   : > { %v4222_v22 = vadd.f32 %v8015_v17, %v4029_v35  ;;  %v8016_v45 = vpop.f32.mrb[56].mxu1  ;;  %v8359_v54 = vpop.f32.mrb[75].mxu0 }
 0x425   : > { %v8017_v20 = vpop.f32.mrb[57].mxu1  ;;  %v13175_v3 = vadd.f32 %v8359_v54, %v8358_v48 }
 0x426   : > { %v8018_v36 = vadd.f32 %v8017_v20, %v8016_v45 }
 0x427   : > { %v8361_v60 = vpop.f32.mrb[76].mxu0 }
 0x428   : > { %v4231_v25 = vadd.f32 %v8018_v36, %v4036_v56  ;;  %v8019_v24 = vpop.f32.mrb[58].mxu1  ;;  %v8362_v44 = vpop.f32.mrb[77].mxu0 }
 0x429   : > { %v8020_v40 = vpop.f32.mrb[59].mxu1  ;;  %v13177_v27 = vadd.f32 %v8362_v44, %v8361_v60 }
 0x42a   : > { %v8021_v33 = vadd.f32 %v8020_v40, %v8019_v24 }
 0x42b   : > { %v8452_v39 = vpop.f32.mrb[78].mxu0 }
 0x42c   : > { %v4240_v51 = vadd.f32 %v8021_v33, %v4043_v1  ;;  %v8022_v26 = vpop.f32.mrb[60].mxu1  ;;  %v8453_v0 = vpop.f32.mrb[79].mxu0 }
 0x42d   : > { %v8023_v42 = vpop.f32.mrb[61].mxu1  ;;  %v13179_v35 = vadd.f32 %v8453_v0, %v8452_v39 }
 0x42e   : > { %v8024_v31 = vadd.f32 %v8023_v42, %v8022_v26 }
 0x42f   : > { %v8455_v16 = vpop.f32.mrb[80].mxu0 }
 0x430   : > { %v4249_v46 = vadd.f32 %v8024_v31, %v4050_v52  ;;  %v8025_v63 = vpop.f32.mrb[62].mxu1  ;;  %v8456_v13 = vpop.f32.mrb[81].mxu0 }
 0x431   : > { %v8026_v38 = vpop.f32.mrb[63].mxu1  ;;  %v13181_v56 = vadd.f32 %v8456_v13, %v8455_v16 }
 0x432   : > { %v8027_v14 = vadd.f32 %v8026_v38, %v8025_v63 }
 0x433   : > { %v8458_v32 = vpop.f32.mrb[82].mxu0 }
 0x434   : > { %v4258_v62 = vadd.f32 %v8027_v14, %v4057_v55  ;;  %v8060_v23 = vpop.f32.mrb[64].mxu1  ;;  %v8459_v4 = vpop.f32.mrb[83].mxu0 }
 0x435   : > { %v8061_v43 = vpop.f32.mrb[65].mxu1  ;;  %v13183_v1 = vadd.f32 %v8459_v4, %v8458_v32 }
 0x436   : > { %v8062_v7 = vadd.f32 %v8061_v43, %v8060_v23 }
 0x437   : > { %v8461_v47 = vpop.f32.mrb[84].mxu0 }
 0x438   : > { %v4366_v17 = vadd.f32 %v8062_v7, %v4195_v19  ;;  %v8063_v48 = vpop.f32.mrb[66].mxu1  ;;  %v8462_v45 = vpop.f32.mrb[85].mxu0 }
 0x439   : > { %v8064_v54 = vpop.f32.mrb[67].mxu1  ;;  %v13185_v52 = vadd.f32 %v8462_v45, %v8461_v47 }
 0x43a   : > { %v8065_v20 = vadd.f32 %v8064_v54, %v8063_v48  ;;  %v4611_v36 = vadd.f32 %v13041_v53, %v4366_v17 }
 0x43b   : > { %v8464_v60 = vpop.f32.mrb[86].mxu0 }
 0x43c   : > { %v4377_v24 = vadd.f32 %v8065_v20, %v4204_v34  ;;  %v8066_v44 = vpop.f32.mrb[68].mxu1  ;;  %v8465_v55 = vpop.f32.mrb[87].mxu0 }
 0x43d   : > { %v8067_v40 = vpop.f32.mrb[69].mxu1  ;;  %v13188_v33 = vadd.f32 %v8465_v55, %v8464_v60 }
 0x43e   : > { %v8068_v39 = vadd.f32 %v8067_v40, %v8066_v44  ;;  %v4618_v26 = vadd.f32 %v13053_v58, %v4377_v24 }
 0x43f   : > { %v8467_v0 = vpop.f32.mrb[88].mxu0 }
 0x440   : > { %v4388_v19 = vadd.f32 %v8068_v39, %v4213_v8  ;;  %v8069_v42 = vpop.f32.mrb[70].mxu1  ;;  %v8468_v31 = vpop.f32.mrb[89].mxu0 }
 0x441   : > { %v8070_v16 = vpop.f32.mrb[71].mxu1  ;;  %v13191_v63 = vadd.f32 %v8468_v31, %v8467_v0 }
 0x442   : > { %v8071_v13 = vadd.f32 %v8070_v16, %v8069_v42  ;;  %v4625_v53 = vadd.f32 %v13064_v29, %v4388_v19 }
 0x443   : > { %v8470_v38 = vpop.f32.mrb[90].mxu0 }
 0x444   : > { %v4399_v34 = vadd.f32 %v8071_v13, %v4222_v22  ;;  %v8072_v14 = vpop.f32.mrb[72].mxu1  ;;  %v8471_v32 = vpop.f32.mrb[91].mxu0 }
 0x445   : > { %v8073_v23 = vpop.f32.mrb[73].mxu1  ;;  %v13194_v4 = vadd.f32 %v8471_v32, %v8470_v38 }
 0x446   : > { %v8074_v43 = vadd.f32 %v8073_v23, %v8072_v14  ;;  %v4632_v58 = vadd.f32 %v13072_v10, %v4399_v34 }
 0x447   : > { %v8473_v7 = vpop.f32.mrb[92].mxu0 }
 0x448   : > { %v4410_v8 = vadd.f32 %v8074_v43, %v4231_v25  ;;  %v8075_v47 = vpop.f32.mrb[74].mxu1  ;;  %v8474_v17 = vpop.f32.mrb[93].mxu0 }
 0x449   : > { %v8076_v48 = vpop.f32.mrb[75].mxu1  ;;  %v13197_v45 = vadd.f32 %v8474_v17, %v8473_v7  ;;  %v13208_v7 = vld [vmem:[%s13591_s4] sm:$0xff] }
 0x44a   : > { %v8077_v54 = vadd.f32 %v8076_v48, %v8075_v47  ;;  %v4639_v29 = vadd.f32 %v13090_v49, %v4410_v8  ;;  %v13212_v8 = vand.u32 4294901760, %v13208_v7 }
 0x44c   : > { %v4421_v20 = vadd.f32 %v8077_v54, %v4240_v51  ;;  %v8078_v22 = vpop.f32.mrb[76].mxu1  ;;  %8778 = vmatprep.subr.mxu0 %v13212_v8 }
 0x44d   : > { %v8079_v60 = vpop.f32.mrb[77].mxu1  ;;  %8779 = vmatpush3.msra.mxu0 %v13212_v8 }
 0x44e   : > { %v8080_v24 = vadd.f32 %v8079_v60, %v8078_v22  ;;  %v4646_v44 = vadd.f32 %v13103_v9, %v4421_v20 }
 0x450   : > { %v4432_v55 = vadd.f32 %v8080_v24, %v4249_v46  ;;  %v8081_v40 = vpop.f32.mrb[78].mxu1 }
 0x451   : > { %v8082_v39 = vpop.f32.mrb[79].mxu1 }
 0x452   : > { %v8083_v10 = vadd.f32 %v8082_v39, %v8081_v40  ;;  %v4653_v25 = vadd.f32 %v13112_v57, %v4432_v55 }
 0x454   : > { %v4443_v0 = vadd.f32 %v8083_v10, %v4258_v62  ;;  %v8172_v19 = vpop.f32.mrb[80].mxu1 }
 0x455   : > { %v8173_v42 = vpop.f32.mrb[81].mxu1 }
 0x456   : > { %v8174_v31 = vadd.f32 %v8173_v42, %v8172_v19  ;;  %v4660_v16 = vadd.f32 %v13116_v50, %v4443_v0 }
 0x458   : > { %v4764_v13 = vadd.f32 %v8174_v31, %v4611_v36  ;;  %v8175_v49 = vpop.f32.mrb[82].mxu1 }
 0x459   : > { %v8176_v51 = vpop.f32.mrb[83].mxu1 }
 0x45a   : > { %v8177_v38 = vadd.f32 %v8176_v51, %v8175_v49  ;;  %v4925_v34 = vadd.f32 %v13126_v15, %v4764_v13 }
 0x45c   : > { %v4771_v14 = vadd.f32 %v8177_v38, %v4618_v26  ;;  %v8178_v9 = vpop.f32.mrb[84].mxu1 }
 0x45d   : > { %v8179_v46 = vpop.f32.mrb[85].mxu1 }
 0x45e   : > { %v8180_v32 = vadd.f32 %v8179_v46, %v8178_v9  ;;  %v4940_v23 = vadd.f32 %v13132_v61, %v4771_v14 }
 0x460   : > { %v4778_v43 = vadd.f32 %v8180_v32, %v4625_v53  ;;  %v8181_v57 = vpop.f32.mrb[86].mxu1 }
 0x461   : > { %v8182_v62 = vpop.f32.mrb[87].mxu1 }
 0x462   : > { %v8183_v50 = vadd.f32 %v8182_v62, %v8181_v57  ;;  %v4955_v36 = vadd.f32 %v13138_v2, %v4778_v43 }
 0x464   : > { %v4785_v15 = vadd.f32 %v8183_v50, %v4632_v58  ;;  %v8184_v26 = vpop.f32.mrb[88].mxu1 }
 0x465   : > { %v8185_v47 = vpop.f32.mrb[89].mxu1 }
 0x466   : > { %v8186_v61 = vadd.f32 %v8185_v47, %v8184_v26  ;;  %v4970_v53 = vadd.f32 %v13143_v11, %v4785_v15 }
 0x468   : > { %v4792_v17 = vadd.f32 %v8186_v61, %v4639_v29  ;;  %v8187_v48 = vpop.f32.mrb[90].mxu1 }
 0x469   : > { %v8188_v54 = vpop.f32.mrb[91].mxu1 }
 0x46a   : > { %v8189_v20 = vadd.f32 %v8188_v54, %v8187_v48  ;;  %v4985_v22 = vadd.f32 %v13148_v5, %v4792_v17 }
 0x46c   : > { %v4799_v2 = vadd.f32 %v8189_v20, %v4646_v44  ;;  %v8190_v60 = vpop.f32.mrb[92].mxu1 }
 0x46d   : > { %v8191_v24 = vpop.f32.mrb[93].mxu1 }
 0x46e   : > { %v8192_v55 = vadd.f32 %v8191_v24, %v8190_v60  ;;  %v5000_v58 = vadd.f32 %v13152_v59, %v4799_v2 }
 0x470   : > { %v4806_v40 = vadd.f32 %v8192_v55, %v4653_v25  ;;  %v8193_v39 = vpop.f32.mrb[94].mxu1 }
 0x471   : > { %v8194_v10 = vpop.f32.mrb[95].mxu1 }
 0x472   : > { %v8195_v0 = vadd.f32 %v8194_v10, %v8193_v39  ;;  %v5015_v19 = vadd.f32 %v13155_v41, %v4806_v40 }
 0x474   : > { %v4813_v42 = vadd.f32 %v8195_v0, %v4660_v16  ;;  %v8284_v11 = vpop.f32.mrb[96].mxu1 }
 0x475   : > { %v8285_v29 = vpop.f32.mrb[97].mxu1 }
 0x476   : > { %v8286_v31 = vadd.f32 %v8285_v29, %v8284_v11  ;;  %v5030_v13 = vadd.f32 %v13158_v12, %v4813_v42 }
 0x478   : > { %v5262_v49 = vadd.f32 %v8286_v31, %v4925_v34  ;;  %v8287_v5 = vpop.f32.mrb[98].mxu1 }
 0x479   : > { %v8288_v44 = vpop.f32.mrb[99].mxu1 }
 0x47a   : > { %v8289_v51 = vadd.f32 %v8288_v44, %v8287_v5  ;;  %v5449_v38 = vadd.f32 %v13161_v37, %v5262_v49 }
 0x47c   : > { %v5269_v14 = vadd.f32 %v8289_v51, %v4940_v23  ;;  %v8290_v59 = vpop.f32.mrb[100].mxu1 }
 0x47d   : > { %v8291_v25 = vpop.f32.mrb[101].mxu1 }
 0x47e   : > { %v8292_v9 = vadd.f32 %v8291_v25, %v8290_v59  ;;  %v5458_v46 = vadd.f32 %v13164_v30, %v5269_v14 }
 0x480   : > { %v5276_v32 = vadd.f32 %v8292_v9, %v4955_v36  ;;  %v8293_v41 = vpop.f32.mrb[102].mxu1 }
 0x481   : > { %v8294_v16 = vpop.f32.mrb[103].mxu1 }
 0x482   : > { %v8295_v43 = vadd.f32 %v8294_v16, %v8293_v41  ;;  %v5467_v57 = vadd.f32 %v13167_v18, %v5276_v32 }
 0x484   : > { %v5283_v62 = vadd.f32 %v8295_v43, %v4970_v53  ;;  %v8296_v12 = vpop.f32.mrb[104].mxu1 }
 0x485   : > { %v8297_v34 = vpop.f32.mrb[105].mxu1 }
 0x486   : > { %v8298_v50 = vadd.f32 %v8297_v34, %v8296_v12  ;;  %v5476_v15 = vadd.f32 %v13169_v28, %v5283_v62 }
 0x488   : > { %v5290_v26 = vadd.f32 %v8298_v50, %v4985_v22  ;;  %v8299_v37 = vpop.f32.mrb[106].mxu1 }
 0x489   : > { %v8300_v23 = vpop.f32.mrb[107].mxu1 }
 0x48a   : > { %v8301_v47 = vadd.f32 %v8300_v23, %v8299_v37  ;;  %v5485_v61 = vadd.f32 %v13171_v6, %v5290_v26 }
 0x48c   : > { %v5297_v17 = vadd.f32 %v8301_v47, %v5000_v58  ;;  %v8302_v30 = vpop.f32.mrb[108].mxu1 }
 0x48d   : > { %v8303_v36 = vpop.f32.mrb[109].mxu1 }
 0x48e   : > { %v8304_v48 = vadd.f32 %v8303_v36, %v8302_v30  ;;  %v5494_v54 = vadd.f32 %v13173_v21, %v5297_v17 }
 0x490   : > { %v5304_v20 = vadd.f32 %v8304_v48, %v5015_v19  ;;  %v8305_v18 = vpop.f32.mrb[110].mxu1 }
 0x491   : > { %v8306_v53 = vpop.f32.mrb[111].mxu1 }
 0x492   : > { %v8307_v2 = vadd.f32 %v8306_v53, %v8305_v18  ;;  %v5503_v60 = vadd.f32 %v13175_v3, %v5304_v20 }
 0x494   : > { %v5311_v24 = vadd.f32 %v8307_v2, %v5030_v13  ;;  %v8396_v28 = vpop.f32.mrb[112].mxu1 }
 0x495   : > { %v8397_v22 = vpop.f32.mrb[113].mxu1 }
 0x496   : > { %v8398_v55 = vadd.f32 %v8397_v22, %v8396_v28  ;;  %v5512_v40 = vadd.f32 %v13177_v27, %v5311_v24 }
 0x498   : > { %v5620_v39 = vadd.f32 %v8398_v55, %v5449_v38  ;;  %v8399_v6 = vpop.f32.mrb[114].mxu1 }
 0x499   : > { %v8400_v58 = vpop.f32.mrb[115].mxu1 }
 0x49a   : > { %v8401_v10 = vadd.f32 %v8400_v58, %v8399_v6  ;;  %v5865_v0 = vadd.f32 %v13179_v35, %v5620_v39 }
 0x49c   : > { %v5631_v42 = vadd.f32 %v8401_v10, %v5458_v46  ;;  %v8402_v21 = vpop.f32.mrb[116].mxu1 }
 0x49d   : > { %v8403_v19 = vpop.f32.mrb[117].mxu1 }
 0x49e   : > { %v8404_v11 = vadd.f32 %v8403_v19, %v8402_v21  ;;  %v5872_v29 = vadd.f32 %v13181_v56, %v5631_v42 }
 0x4a0   : > { %v5642_v31 = vadd.f32 %v8404_v11, %v5467_v57  ;;  %v8405_v3 = vpop.f32.mrb[118].mxu1 }
 0x4a1   : > { %v8406_v13 = vpop.f32.mrb[119].mxu1 }
 0x4a2   : > { %v8407_v49 = vadd.f32 %v8406_v13, %v8405_v3  ;;  %v5879_v5 = vadd.f32 %v13183_v1, %v5642_v31 }
 0x4a4   : > { %v5653_v44 = vadd.f32 %v8407_v49, %v5476_v15  ;;  %v8408_v27 = vpop.f32.mrb[120].mxu1  ;;  %v13269_v49 = vsub.f32 %v13208_v7, %v13212_v8  ;;  %v13286_v7 = vld [vmem:[%s13592_s5 + $0x8] sm:$0xff] }
 0x4a5   : > { %v8409_v51 = vpop.f32.mrb[121].mxu1 }
 0x4a6   : > { %v8410_v38 = vadd.f32 %v8409_v51, %v8408_v27  ;;  %v5886_v14 = vadd.f32 %v13185_v52, %v5653_v44 }
 0x4a8   : > { %v5664_v59 = vadd.f32 %v8410_v38, %v5485_v61  ;;  %v8411_v35 = vpop.f32.mrb[122].mxu1 }
 0x4a9   : > { %v8412_v25 = vpop.f32.mrb[123].mxu1 }
 0x4aa   : > { %v8413_v9 = vadd.f32 %v8412_v25, %v8411_v35  ;;  %v5893_v46 = vadd.f32 %v13188_v33, %v5664_v59  ;;  %v13291_v59 = vld [vmem:[%s13592_s5 + $0x10] sm:$0xff]  ;;  %v6929_v25 = vand.u32 4294901760, %v13286_v7 }
 0x4ac   : > { %v5675_v32 = vadd.f32 %v8413_v9, %v5494_v54  ;;  %v8414_v56 = vpop.f32.mrb[124].mxu1  ;;  %v13298_v9 = vld [vmem:[%s13592_s5 + $0x18] sm:$0xff] }
 0x4ad   : > { %v8415_v41 = vpop.f32.mrb[125].mxu1 }
 0x4ae   : > { %v8416_v16 = vadd.f32 %v8415_v41, %v8414_v56  ;;  %v5900_v43 = vadd.f32 %v13191_v63, %v5675_v32  ;;  %v6935_v32 = vand.u32 4294901760, %v13298_v9 }
 0x4b0   : > { %v5686_v57 = vadd.f32 %v8416_v16, %v5503_v60  ;;  %v8417_v1 = vpop.f32.mrb[126].mxu1 }
 0x4b1   : > { %v8418_v62 = vpop.f32.mrb[127].mxu1 }
 0x4b2   : > { %v8419_v12 = vadd.f32 %v8418_v62, %v8417_v1  ;;  %v5907_v34 = vadd.f32 %v13194_v4, %v5686_v57 }
 0x4b4   : > { %v5697_v50 = vadd.f32 %v8419_v12, %v5512_v40  ;;  %v8508_v52 = vpop.f32.mrb[128].mxu1 }
 0x4b5   : > { %v8509_v15 = vpop.f32.mrb[129].mxu1 }
 0x4b6   : > { %v8510_v26 = vadd.f32 %v8509_v15, %v8508_v52  ;;  %v5914_v37 = vadd.f32 %v13197_v45, %v5697_v50 }
 0x4b8   : > { %v13237_v23 = vadd.f32 %v8510_v26, %v5865_v0  ;;  %v8511_v33 = vpop.f32.mrb[130].mxu1 }
 0x4b9   : > { %v8512_v47 = vpop.f32.mrb[131].mxu1 }
 0x4ba   : > { %9837 = vrcp.f32 %v13237_v23  ;;  %v8513_v61 = vadd.f32 %v8512_v47, %v8511_v33 }
 0x4bc   : > { %v13240_v63 = vadd.f32 %v8513_v61, %v5872_v29  ;;  %v8514_v17 = vpop.f32.mrb[132].mxu1 }
 0x4bd   : > { %v8515_v30 = vpop.f32.mrb[133].mxu1 }
 0x4be   : > { %9839 = vrcp.f32 %v13240_v63  ;;  %v8516_v4 = vadd.f32 %v8515_v30, %v8514_v17 }
 0x4c0   : > { %v13243_v36 = vadd.f32 %v8516_v4, %v5879_v5  ;;  %v8517_v48 = vpop.f32.mrb[134].mxu1  ;;  %v13272_v5 = vand.u32 4294901760, %v13269_v49 }
 0x4c1   : > { %v8518_v54 = vpop.f32.mrb[135].mxu1 }
 0x4c2   : > { %9841 = vrcp.f32 %v13243_v36  ;;  %v8519_v45 = vadd.f32 %v8518_v54, %v8517_v48  ;;  %v6293_v27 = vsub.f32 %v13269_v49, %v13272_v5 }
 0x4c4   : > { %v9838_v20 = vpop.eup %9837  ;;  %v13246_v18 = vadd.f32 %v8519_v45, %v5886_v14  ;;  %v8520_v53 = vpop.f32.mrb[136].mxu1  ;;  %v6294_v51 = vand.u32 4294901760, %v6293_v27  ;;  %v13281_v14 = vld [vmem:[%s13592_s5] sm:$0xff] }
 0x4c5   : > { %v8521_v2 = vpop.f32.mrb[137].mxu1  ;;  %6086 = vrot.lane.b32.xlu0 %v9838_v20, %s9874_s17  ;;  %v6926_v35 = vand.u32 4294901760, %v13281_v14 }
 0x4c6   : > { %9843 = vrcp.f32 %v13246_v18  ;;  %v8522_v60 = vadd.f32 %v8521_v2, %v8520_v53  ;;  %8792 = vmatprep.subr.mxu0 %v6294_v51 }
 0x4c7   : > { %v13306_v56 = vpack.c.bf16 %v6929_v25, %v6926_v35 }
 0x4c8   : > { %v9840_v24 = vpop.eup %9839  ;;  %v13250_v28 = vadd.f32 %v8522_v60, %v5893_v46  ;;  %v8523_v22 = vpop.f32.mrb[138].mxu1  ;;  %v6932_v46 = vand.u32 4294901760, %v13291_v59 }
 0x4c9   : > { %v8524_v55 = vpop.f32.mrb[139].mxu1  ;;  %6088 = vrot.lane.b32.xlu1 %v9840_v24, %s9874_s17  ;;  %9415 = vmatprep.subr.bf16.mxu1 %v13306_v56 }
 0x4ca   : > { %9845 = vrcp.f32 %v13250_v28  ;;  %v8525_v40 = vadd.f32 %v8524_v55, %v8523_v22  ;;  %v13312_v41 = vpack.c.bf16 %v6935_v32, %v6932_v46  ;;  %9417 = vmatpush3.bf16.msra.mxu1 %v13306_v56 }
 0x4cc   : > { %v9842_v39 = vpop.eup %9841  ;;  %v13254_v6 = vadd.f32 %v8525_v40, %v5900_v43  ;;  %v8526_v58 = vpop.f32.mrb[140].mxu1  ;;  %9419 = vmatprep.subr.bf16.mxu1 %v13312_v41 }
 0x4cd   : > { %v8527_v10 = vpop.f32.mrb[141].mxu1  ;;  %6090 = vrot.lane.b32.xlu0 %v9842_v39, %s9874_s17 }
 0x4ce   : > { %9847 = vrcp.f32 %v13254_v6  ;;  %v8528_v0 = vadd.f32 %v8527_v10, %v8526_v58  ;;  %9421 = vmatpush3.bf16.msra.mxu1 %v13312_v41 }
 0x4d0   : > { %v9844_v42 = vpop.eup %9843  ;;  %v13258_v21 = vadd.f32 %v8528_v0, %v5907_v34  ;;  %v8529_v19 = vpop.f32.mrb[142].mxu1 }
 0x4d1   : > { %v8530_v11 = vpop.f32.mrb[143].mxu1  ;;  %6092 = vrot.lane.b32.xlu1 %v9844_v42, %s9874_s17 }
 0x4d2   : > { %9849 = vrcp.f32 %v13258_v21  ;;  %v8531_v29 = vadd.f32 %v8530_v11, %v8529_v19 }
 0x4d4   : > { %v9846_v31 = vpop.eup %9845  ;;  %v13262_v3 = vadd.f32 %v8531_v29, %v5914_v37 }
 0x4d5   : > { %6094 = vrot.lane.b32.xlu0 %v9846_v31, %s9874_s17 }
 0x4d6   : > { %9851 = vrcp.f32 %v13262_v3 }
 0x4d8   : > { %v9848_v13 = vpop.eup %9847 }
 0x4d9   : > { %6096 = vrot.lane.b32.xlu1 %v9848_v13, %s9874_s17 }
 0x4dc   : > { %v9850_v44 = vpop.eup %9849 }
 0x4dd   : > { %6098 = vrot.lane.b32.xlu0 %v9850_v44, %s9874_s17 }
 0x4e0   : > { %v9852_v38 = vpop.eup %9851 }
 0x4e1   : > { %6100 = vrot.lane.b32.xlu1 %v9852_v38, %s9874_s17 }
 0x537   : > { %v6087_v16 = vpop.permute.xlu0 %6086 }
 0x538   : > { %v6110_v43 = vmul.f32 %v6087_v16, %v13237_v23 }
 0x53a   : > { %v6120_v57 = vsel %vm1238_vm1, %v6110_v43, 0 }
 0x53b   : > { %v13319_v1 = vand.u32 4294901760, %v6120_v57  ;;  %v6089_v62 = vpop.permute.xlu1 %6088 }
 0x53c   : > { %v6111_v12 = vmul.f32 %v6089_v62, %v13240_v63 }
 0x53d   : > { %v13324_v34 = vsub.f32 %v6120_v57, %v13319_v1 }
 0x53e   : > { %v6123_v50 = vsel %vm1238_vm1, %v6111_v12, 0 }
 0x53f   : > { %v13327_v52 = vand.u32 4294901760, %v6123_v50  ;;  %v6091_v15 = vpop.permute.xlu0 %6090  ;;  %v6211_v26 = vand.u32 4294901760, %v13324_v34 }
 0x540   : > { %v6112_v37 = vmul.f32 %v6091_v15, %v13243_v36 }
 0x541   : > { %v13332_v23 = vsub.f32 %v6123_v50, %v13327_v52  ;;  %v6212_v33 = vsub.f32 %v13324_v34, %v6211_v26 }
 0x542   : > { %v6126_v47 = vsel %vm1238_vm1, %v6112_v37, 0 }
 0x543   : > { %v6221_v61 = vand.u32 4294901760, %v13332_v23  ;;  %v13339_v63 = vand.u32 4294901760, %v6126_v47  ;;  %v6093_v17 = vpop.permute.xlu1 %6092  ;;  %v6213_v30 = vand.u32 4294901760, %v6212_v33 }
 0x544   : > { %v6113_v4 = vmul.f32 %v6093_v17, %v13246_v18 }
 0x545   : > { %v6222_v36 = vsub.f32 %v13332_v23, %v6221_v61  ;;  %v13346_v48 = vsub.f32 %v6126_v47, %v13339_v63  ;;  %8780 = vmatprep.mubr.f32.mxu0 %v6213_v30 }
 0x546   : > { %v6129_v54 = vsel %vm1238_vm1, %v6113_v4, 0 }
 0x547   : > { %v6223_v45 = vand.u32 4294901760, %v6222_v36  ;;  %v13349_v20 = vand.u32 4294901760, %v6129_v54  ;;  %v6095_v53 = vpop.permute.xlu0 %6094  ;;  %v6231_v2 = vand.u32 4294901760, %v13346_v48 }
 0x548   : > { %v6114_v60 = vmul.f32 %v6095_v53, %v13250_v28 }
 0x549   : > { %v13354_v18 = vsub.f32 %v6129_v54, %v13349_v20  ;;  %8781 = vmatmul.mubr.f32.vlgmr.msra.gmra.mrb[94].mxu0 %v6223_v45  ;;  %v6232_v24 = vsub.f32 %v13346_v48, %v6231_v2 }
 0x54a   : > { %v6132_v22 = vsel %vm1238_vm1, %v6114_v60, 0  ;;  %8793 = vmatpush3.msra.mxu0 %v6294_v51 }
 0x54b   : > { %v13360_v55 = vand.u32 4294901760, %v6132_v22  ;;  %v6097_v40 = vpop.permute.xlu1 %6096  ;;  %v6233_v39 = vand.u32 4294901760, %v6232_v24  ;;  %v6241_v58 = vand.u32 4294901760, %v13354_v18  ;;  %8806 = vmatprep.subr.mxu0 %v13269_v49 }
 0x54c   : > { %v6115_v28 = vmul.f32 %v6097_v40, %v13254_v6 }
 0x54d   : > { %v6250_v10 = vsub.f32 %v6132_v22, %v13360_v55  ;;  %8783 = vmatprep.mubr.f32.mxu0 %v6233_v39  ;;  %v6242_v0 = vsub.f32 %v13354_v18, %v6241_v58 }
 0x54e   : > { %v6135_v42 = vsel %vm1238_vm1, %v6115_v28, 0 }
 0x54f   : > { %v13368_v19 = vand.u32 4294901760, %v6135_v42  ;;  %v6099_v11 = vpop.permute.xlu0 %6098  ;;  %v6243_v29 = vand.u32 4294901760, %v6242_v0  ;;  %v6251_v31 = vand.u32 4294901760, %v6250_v10 }
 0x550   : > { %v6116_v13 = vmul.f32 %v6099_v11, %v13258_v21 }
 0x551   : > { %v6260_v44 = vsub.f32 %v6135_v42, %v13368_v19  ;;  %8784 = vmatmul.mubr.f32.gmra.mrb[96].mxu0 %v6243_v29  ;;  %v6252_v27 = vsub.f32 %v6250_v10, %v6251_v31 }
 0x552   : > { %v6138_v6 = vsel %vm1238_vm1, %v6116_v13, 0 }
 0x553   : > { %v13373_v51 = vand.u32 4294901760, %v6138_v6  ;;  %v6101_v38 = vpop.permute.xlu1 %6100  ;;  %v6253_v16 = vand.u32 4294901760, %v6252_v27  ;;  %v6261_v43 = vand.u32 4294901760, %v6260_v44 }
 0x554   : > { %v6117_v57 = vmul.f32 %v6101_v38, %v13262_v3  ;;  %v7083_v3 = vsub.f32 %v13286_v7, %v6929_v25  ;;  %v13434_v7 = vsub.f32 %v13298_v9, %v6935_v32 }
 0x555   : > { %v6270_v62 = vsub.f32 %v6138_v6, %v13373_v51  ;;  %8786 = vmatprep.mubr.f32.mxu0 %v6253_v16  ;;  %v6262_v12 = vsub.f32 %v6260_v44, %v6261_v43 }
 0x556   : > { %v6141_v50 = vsel %vm1238_vm1, %v6117_v57, 0 }
 0x557   : > { %v6279_v21 = vand.u32 4294901760, %v6141_v50  ;;  %v6263_v15 = vand.u32 4294901760, %v6262_v12  ;;  %v6271_v37 = vand.u32 4294901760, %v6270_v62 }
 0x559   : > { %v6280_v33 = vsub.f32 %v6141_v50, %v6279_v21  ;;  %8787 = vmatmul.mubr.f32.gmra.mrb[98].mxu0 %v6263_v15  ;;  %v6272_v47 = vsub.f32 %v6270_v62, %v6271_v37 }
 0x55b   : > { %v6273_v17 = vand.u32 4294901760, %v6272_v47  ;;  %v6281_v30 = vand.u32 4294901760, %v6280_v33 }
 0x55d   : > { %8789 = vmatprep.mubr.f32.mxu0 %v6273_v17  ;;  %v6282_v4 = vsub.f32 %v6280_v33, %v6281_v30 }
 0x55f   : > { %v6283_v36 = vand.u32 4294901760, %v6282_v4 }
 0x561   : > { %8790 = vmatmul.mubr.f32.gmra.mrb[100].mxu0 %v6283_v36 }
 0x562   : > { %8794 = vmatprep.mubr.f32.mxu0 %v13319_v1 }
 0x565   : > { %8795 = vmatmul.mubr.f32.vlgmr.msra.gmra.mrb[94].mxu0 %v13327_v52 }
 0x566   : > { %8807 = vmatpush3.msra.mxu0 %v13269_v49  ;;  %8797 = vmatprep.mubr.f32.mxu0 %v13339_v63 }
 0x567   : > { %8820 = vmatprep.subr.mxu0 %v13212_v8 }
 0x569   : > { %8798 = vmatmul.mubr.f32.gmra.mrb[96].mxu0 %v13349_v20 }
 0x56a   : > { %8800 = vmatprep.mubr.f32.mxu0 %v13360_v55 }
 0x56d   : > { %8801 = vmatmul.mubr.f32.gmra.mrb[98].mxu0 %v13368_v19 }
 0x56e   : > { %8803 = vmatprep.mubr.f32.mxu0 %v13373_v51 }
 0x571   : > { %8804 = vmatmul.mubr.f32.gmra.mrb[100].mxu0 %v6279_v21 }
 0x572   : > { %8808 = vmatprep.mubr.f32.mxu0 %v13324_v34 }
 0x575   : > { %8809 = vmatmul.mubr.f32.vlgmr.msra.gmra.mrb[94].mxu0 %v13332_v23 }
 0x576   : > { %8821 = vmatpush3.msra.mxu0 %v13212_v8  ;;  %8811 = vmatprep.mubr.f32.mxu0 %v13346_v48  ;;  %v7098_v48 = vand.u32 4294901760, %v13434_v7 }
 0x577   : > { %8834 = vmatprep.subr.mxu0 %v13272_v5 }
 0x578   : > { %v7099_v32 = vsub.f32 %v13434_v7, %v7098_v48 }
 0x579   : > { %8812 = vmatmul.mubr.f32.gmra.mrb[96].mxu0 %v13354_v18 }
 0x57a   : > { %8814 = vmatprep.mubr.f32.mxu0 %v6250_v10 }
 0x57d   : > { %8815 = vmatmul.mubr.f32.gmra.mrb[98].mxu0 %v6260_v44 }
 0x57e   : > { %8817 = vmatprep.mubr.f32.mxu0 %v6270_v62 }
 0x581   : > { %8818 = vmatmul.mubr.f32.gmra.mrb[100].mxu0 %v6280_v33 }
 0x582   : > { %8822 = vmatprep.mubr.f32.mxu0 %v6211_v26 }
 0x585   : > { %8823 = vmatmul.mubr.f32.vlgmr.msra.gmra.mrb[94].mxu0 %v6221_v61 }
 0x586   : > { %8835 = vmatpush3.msra.mxu0 %v13272_v5  ;;  %8825 = vmatprep.mubr.f32.mxu0 %v6231_v2  ;;  %v7084_v5 = vand.u32 4294901760, %v7083_v3 }
 0x587   : > { %8848 = vmatprep.subr.mxu0 %v13212_v8 }
 0x588   : > { %v7085_v34 = vsub.f32 %v7083_v3, %v7084_v5 }
 0x589   : > { %8826 = vmatmul.mubr.f32.gmra.mrb[96].mxu0 %v6241_v58 }
 0x58a   : > { %8828 = vmatprep.mubr.f32.mxu0 %v6251_v31  ;;  %v7086_v26 = vand.u32 4294901760, %v7085_v34 }
 0x58d   : > { %8829 = vmatmul.mubr.f32.gmra.mrb[98].mxu0 %v6261_v43 }
 0x58e   : > { %8831 = vmatprep.mubr.f32.mxu0 %v6271_v37 }
 0x591   : > { %8832 = vmatmul.mubr.f32.gmra.mrb[100].mxu0 %v6281_v30 }
 0x592   : > { %8836 = vmatprep.mubr.f32.mxu0 %v13319_v1 }
 0x595   : > { %8837 = vmatmul.mubr.f32.vlgmr.msra.gmra.mrb[94].mxu0 %v13327_v52 }
 0x596   : > { %8849 = vmatpush3.msra.mxu0 %v13212_v8  ;;  %8839 = vmatprep.mubr.f32.mxu0 %v13339_v63  ;;  %v7076_v8 = vsub.f32 %v13281_v14, %v6926_v35  ;;  %v13429_v14 = vsub.f32 %v13291_v59, %v6932_v46 }
 0x598   : > { %v7077_v49 = vand.u32 4294901760, %v7076_v8  ;;  %v13422_v61 = vpack.c.bf16 %v7083_v3, %v7076_v8  ;;  %v7091_v25 = vand.u32 4294901760, %v13429_v14 }
 0x599   : > { %8840 = vmatmul.mubr.f32.gmra.mrb[96].mxu0 %v13349_v20 }
 0x59a   : > { %8842 = vmatprep.mubr.f32.mxu0 %v13360_v55  ;;  %v7092_v9 = vsub.f32 %v13429_v14, %v7091_v25 }
 0x59c   : > { %v7093_v42 = vand.u32 4294901760, %v7092_v9  ;;  %v9434_v9 = vpack.c.bf16 %v13434_v7, %v13429_v14 }
 0x59d   : > { %8843 = vmatmul.mubr.f32.gmra.mrb[98].mxu0 %v13368_v19 }
 0x59e   : > { %8845 = vmatprep.mubr.f32.mxu0 %v13373_v51 }
 0x5a1   : > { %8846 = vmatmul.mubr.f32.gmra.mrb[100].mxu0 %v6279_v21 }
 0x5a2   : > { %8850 = vmatprep.mubr.f32.mxu0 %v13319_v1  ;;  %v7078_v1 = vsub.f32 %v7076_v8, %v7077_v49 }
 0x5a5   : > { %8851 = vmatmul.mubr.f32.vlgmr.msra.gmra.mrb[94].mxu0 %v13327_v52  ;;  %v7079_v52 = vand.u32 4294901760, %v7078_v1 }
 0x5a6   : > { %8853 = vmatprep.mubr.f32.mxu0 %v13339_v63  ;;  %v13424_v63 = vpack.c.bf16 %v7084_v5, %v7077_v49 }
 0x5a7   : > { %v9422_v23 = vpack.c.bf16 %v7086_v26, %v7079_v52 }
 0x5a9   : > { %8854 = vmatmul.mubr.f32.gmra.mrb[96].mxu0 %v13349_v20  ;;  %9423 = vmatprep.subr.bf16.mxu1 %v9422_v23 }
 0x5aa   : > { %8856 = vmatprep.mubr.f32.mxu0 %v13360_v55 }
 0x5ad   : > { %8857 = vmatmul.mubr.f32.gmra.mrb[98].mxu0 %v13368_v19  ;;  %v7100_v19 = vand.u32 4294901760, %v7099_v32 }
 0x5ae   : > { %8859 = vmatprep.mubr.f32.mxu0 %v13373_v51 }
 0x5af   : > { %v9426_v50 = vpack.c.bf16 %v7100_v19, %v7093_v42 }
 0x5b1   : > { %8860 = vmatmul.mubr.f32.gmra.mrb[100].mxu0 %v6279_v21 }
 0x678   : > { %v8852_v35 = vpop.f32.mrb[94].mxu0 }
 0x679   : > { %v6905_v54 = vsel %vm291_vm0, %v8852_v35, 0  ;;  %v6844_v45 = vpop.f32.mrb[95].mxu0 }
 0x67a   : > { %v13439_v20 = vand.u32 4294901760, %v6905_v54  ;;  %v6902_v53 = vsel %vm291_vm0, %v6844_v45, 0 }
 0x67b   : > { %v13442_v2 = vand.u32 4294901760, %v6902_v53 }
 0x67c   : > { %v13445_v59 = vsub.f32 %v6905_v54, %v13439_v20  ;;  %v8855_v46 = vpop.f32.mrb[96].mxu0 }
 0x67d   : > { %v13454_v60 = vsub.f32 %v6902_v53, %v13442_v2  ;;  %v6911_v18 = vsel %vm291_vm0, %v8855_v46, 0  ;;  %v6856_v24 = vpop.f32.mrb[97].mxu0 }
 0x67e   : > { %v7006_v22 = vand.u32 4294901760, %v13445_v59  ;;  %v13458_v55 = vand.u32 4294901760, %v6911_v18  ;;  %v6908_v40 = vsel %vm291_vm0, %v6856_v24, 0 }
 0x67f   : > { %v6996_v39 = vand.u32 4294901760, %v13454_v60  ;;  %v13462_v58 = vand.u32 4294901760, %v6908_v40 }
 0x680   : > { %v7007_v28 = vsub.f32 %v13445_v59, %v7006_v22  ;;  %v13468_v10 = vsub.f32 %v6911_v18, %v13458_v55  ;;  %v8858_v0 = vpop.f32.mrb[98].mxu0 }
 0x681   : > { %v13471_v11 = vsub.f32 %v6908_v40, %v13462_v58  ;;  %v6917_v29 = vsel %vm291_vm0, %v8858_v0, 0  ;;  %v6868_v31 = vpop.f32.mrb[99].mxu0  ;;  %v6997_v13 = vsub.f32 %v13454_v60, %v6996_v39 }
 0x682   : > { %v7026_v44 = vand.u32 4294901760, %v13468_v10  ;;  %v13478_v27 = vand.u32 4294901760, %v6917_v29  ;;  %v6914_v6 = vsel %vm291_vm0, %v6868_v31, 0  ;;  %v7008_v43 = vand.u32 4294901760, %v7007_v28 }
 0x683   : > { %v7016_v51 = vand.u32 4294901760, %v13471_v11  ;;  %v13482_v38 = vand.u32 4294901760, %v6914_v6  ;;  %v6998_v16 = vand.u32 4294901760, %v6997_v13 }
 0x684   : > { %v13485_v57 = vsub.f32 %v6917_v29, %v13478_v27  ;;  %v8861_v62 = vpop.f32.mrb[100].mxu0  ;;  %v7027_v12 = vsub.f32 %v13468_v10, %v7026_v44 }
 0x685   : > { %v13491_v21 = vsub.f32 %v6914_v6, %v13482_v38  ;;  %v6923_v15 = vsel %vm291_vm0, %v8861_v62, 0  ;;  %v6880_v37 = vpop.f32.mrb[101].mxu0  ;;  %8870 = vmatprep.mubr.f32.mxu1 %v6998_v16  ;;  %v7017_v33 = vsub.f32 %v13471_v11, %v7016_v51 }
 0x686   : > { %v7046_v47 = vand.u32 4294901760, %v13485_v57  ;;  %v13498_v17 = vand.u32 4294901760, %v6923_v15  ;;  %v6920_v30 = vsel %vm291_vm0, %v6880_v37, 0  ;;  %8871 = vmatmul.mubr.f32.vlgmr.msra.gmra.mrb[144].mxu1 %v7008_v43  ;;  %v7028_v49 = vand.u32 4294901760, %v7027_v12 }
 0x687   : > { %v7036_v4 = vand.u32 4294901760, %v13491_v21  ;;  %v13502_v36 = vand.u32 4294901760, %v6920_v30  ;;  %9425 = vmatpush3.bf16.msra.mxu1 %v9422_v23  ;;  %v7018_v8 = vand.u32 4294901760, %v7017_v33 }
 0x688   : > { %v7065_v3 = vsub.f32 %v6923_v15, %v13498_v17  ;;  %9427 = vmatprep.subr.bf16.mxu1 %v9426_v50  ;;  %v7047_v5 = vsub.f32 %v13485_v57, %v7046_v47 }
 0x689   : > { %v7055_v1 = vsub.f32 %v6920_v30, %v13502_v36  ;;  %8873 = vmatprep.mubr.f32.mxu1 %v7018_v8  ;;  %v7037_v34 = vsub.f32 %v13491_v21, %v7036_v4 }
 0x68a   : > { %v7066_v52 = vand.u32 4294901760, %v7065_v3  ;;  %8874 = vmatmul.mubr.f32.gmra.mrb[146].mxu1 %v7028_v49  ;;  %v7048_v23 = vand.u32 4294901760, %v7047_v5 }
 0x68b   : > { %v7056_v26 = vand.u32 4294901760, %v7055_v1  ;;  %v7038_v35 = vand.u32 4294901760, %v7037_v34  ;;  %9429 = vmatpush3.bf16.msra.mxu1 %v9426_v50 }
 0x68c   : > { %v7067_v54 = vsub.f32 %v7065_v3, %v7066_v52  ;;  %9431 = vmatprep.subr.bf16.mxu1 %v13422_v61 }
 0x68d   : > { %8876 = vmatprep.mubr.f32.mxu1 %v7038_v35  ;;  %v7057_v45 = vsub.f32 %v7055_v1, %v7056_v26 }
 0x68e   : > { %8877 = vmatmul.mubr.f32.gmra.mrb[148].mxu1 %v7048_v23  ;;  %v7068_v46 = vand.u32 4294901760, %v7067_v54 }
 0x68f   : > { %v7058_v53 = vand.u32 4294901760, %v7057_v45 }
 0x691   : > { %8879 = vmatprep.mubr.f32.mxu1 %v7058_v53 }
 0x692   : > { %8880 = vmatmul.mubr.f32.gmra.mrb[150].mxu1 %v7068_v46 }
 0x693   : > { %8890 = vmatprep.mubr.f32.mxu1 %v13442_v2 }
 0x696   : > { %8891 = vmatmul.mubr.f32.vlgmr.msra.gmra.mrb[144].mxu1 %v13439_v20 }
 0x697   : > { %9433 = vmatpush3.bf16.msra.mxu1 %v13422_v61  ;;  %8893 = vmatprep.mubr.f32.mxu1 %v13462_v58  ;;  %v9450_v61 = vpack.c.bf16 %v7098_v48, %v7091_v25 }
 0x698   : > { %9435 = vmatprep.subr.bf16.mxu1 %v9434_v9 }
 0x69a   : > { %8894 = vmatmul.mubr.f32.gmra.mrb[146].mxu1 %v13458_v55 }
 0x69b   : > { %8896 = vmatprep.mubr.f32.mxu1 %v13482_v38  ;;  %9437 = vmatpush3.bf16.msra.mxu1 %v9434_v9 }
 0x69c   : > { %9439 = vmatprep.subr.bf16.mxu1 %v13306_v56 }
 0x69e   : > { %8897 = vmatmul.mubr.f32.gmra.mrb[148].mxu1 %v13478_v27 }
 0x69f   : > { %8899 = vmatprep.mubr.f32.mxu1 %v13502_v36 }
 0x6a2   : > { %8900 = vmatmul.mubr.f32.gmra.mrb[150].mxu1 %v13498_v17 }
 0x6a3   : > { %8910 = vmatprep.mubr.f32.mxu1 %v13454_v60 }
 0x6a6   : > { %8911 = vmatmul.mubr.f32.vlgmr.msra.gmra.mrb[144].mxu1 %v13445_v59 }
 0x6a7   : > { %9441 = vmatpush3.bf16.msra.mxu1 %v13306_v56  ;;  %8913 = vmatprep.mubr.f32.mxu1 %v13471_v11 }
 0x6a8   : > { %9443 = vmatprep.subr.bf16.mxu1 %v13312_v41 }
 0x6aa   : > { %8914 = vmatmul.mubr.f32.gmra.mrb[146].mxu1 %v13468_v10 }
 0x6ab   : > { %8916 = vmatprep.mubr.f32.mxu1 %v13491_v21  ;;  %9445 = vmatpush3.bf16.msra.mxu1 %v13312_v41 }
 0x6ac   : > { %9447 = vmatprep.subr.bf16.mxu1 %v13424_v63 }
 0x6ae   : > { %8917 = vmatmul.mubr.f32.gmra.mrb[148].mxu1 %v13485_v57 }
 0x6af   : > { %8919 = vmatprep.mubr.f32.mxu1 %v7055_v1 }
 0x6b2   : > { %8920 = vmatmul.mubr.f32.gmra.mrb[150].mxu1 %v7065_v3 }
 0x6b3   : > { %8930 = vmatprep.mubr.f32.mxu1 %v6996_v39 }
 0x6b6   : > { %8931 = vmatmul.mubr.f32.vlgmr.msra.gmra.mrb[144].mxu1 %v7006_v22 }
 0x6b7   : > { %9449 = vmatpush3.bf16.msra.mxu1 %v13424_v63  ;;  %8933 = vmatprep.mubr.f32.mxu1 %v7016_v51 }
 0x6b8   : > { %9451 = vmatprep.subr.bf16.mxu1 %v9450_v61 }
 0x6ba   : > { %8934 = vmatmul.mubr.f32.gmra.mrb[146].mxu1 %v7026_v44 }
 0x6bb   : > { %8936 = vmatprep.mubr.f32.mxu1 %v7036_v4  ;;  %9453 = vmatpush3.bf16.msra.mxu1 %v9450_v61 }
 0x6bc   : > { %9455 = vmatprep.subr.bf16.mxu1 %v13306_v56 }
 0x6be   : > { %8937 = vmatmul.mubr.f32.gmra.mrb[148].mxu1 %v7046_v47 }
 0x6bf   : > { %8939 = vmatprep.mubr.f32.mxu1 %v7056_v26 }
 0x6c2   : > { %8940 = vmatmul.mubr.f32.gmra.mrb[150].mxu1 %v7066_v52 }
 0x6c3   : > { %8950 = vmatprep.mubr.f32.mxu1 %v13442_v2 }
 0x6c6   : > { %8951 = vmatmul.mubr.f32.vlgmr.msra.gmra.mrb[144].mxu1 %v13439_v20 }
 0x6c7   : > { %9457 = vmatpush3.bf16.msra.mxu1 %v13306_v56  ;;  %8953 = vmatprep.mubr.f32.mxu1 %v13462_v58  ;;  %v7783_v56 = vld [vmem:[%s13593_s6] ss:$0 sm:$0xff] }
 0x6c8   : > { %9459 = vmatprep.subr.bf16.mxu1 %v13312_v41 }
 0x6ca   : > { %8954 = vmatmul.mubr.f32.gmra.mrb[146].mxu1 %v13458_v55 }
 0x6cb   : > { %8956 = vmatprep.mubr.f32.mxu1 %v13482_v38  ;;  %9461 = vmatpush3.bf16.msra.mxu1 %v13312_v41 }
 0x6ce   : > { %8957 = vmatmul.mubr.f32.gmra.mrb[148].mxu1 %v13478_v27 }
 0x6cf   : > { %8959 = vmatprep.mubr.f32.mxu1 %v13502_v36 }
 0x6d2   : > { %8960 = vmatmul.mubr.f32.gmra.mrb[150].mxu1 %v13498_v17 }
 0x6d3   : > { %8970 = vmatprep.mubr.f32.mxu1 %v13442_v2 }
 0x6d6   : > { %8971 = vmatmul.mubr.f32.vlgmr.msra.gmra.mrb[144].mxu1 %v13439_v20 }
 0x6d7   : > { %8973 = vmatprep.mubr.f32.mxu1 %v13462_v58 }
 0x6da   : > { %8974 = vmatmul.mubr.f32.gmra.mrb[146].mxu1 %v13458_v55 }
 0x6db   : > { %8976 = vmatprep.mubr.f32.mxu1 %v13482_v38 }
 0x6de   : > { %8977 = vmatmul.mubr.f32.gmra.mrb[148].mxu1 %v13478_v27 }
 0x6df   : > { %8979 = vmatprep.mubr.f32.mxu1 %v13502_v36 }
 0x6e2   : > { %8980 = vmatmul.mubr.f32.gmra.mrb[150].mxu1 %v13498_v17 }
 0x7a9   : > { %v8972_v41 = vpop.f32.mrb[144].mxu1 }
 0x7aa   : > { %v9470_v63 = vadd.f32 %v8972_v41, %v7783_v56  ;;  %v7665_v14 = vpop.f32.mrb[145].mxu1 }
 0x7ab   : > { %v9471_v7 = vadd.f32 %v7783_v56, %v7665_v14 }
 0x7ac   : > { %7712 = vst.msk [vmem:[%s278_s9 + $0x8] sm:$0xff] %vm291_vm0, %v9470_v63 }
 0x7ad   : > { %7711 = vst.msk [vmem:[%s278_s9] sm:$0xff] %vm291_vm0, %v9471_v7  ;;  %v8975_v25 = vpop.f32.mrb[146].mxu1 }
 0x7ae   : > { %v9472_v48 = vadd.f32 %v8975_v25, %v7783_v56  ;;  %v7677_v20 = vpop.f32.mrb[147].mxu1 }
 0x7af   : > { %v9473_v2 = vadd.f32 %v7783_v56, %v7677_v20 }
 0x7b0   : > { %7714 = vst.msk [vmem:[%s278_s9 + $0x18] sm:$0xff] %vm291_vm0, %v9472_v48 }
 0x7b1   : > { %7713 = vst.msk [vmem:[%s278_s9 + $0x10] sm:$0xff] %vm291_vm0, %v9473_v2  ;;  %v8978_v59 = vpop.f32.mrb[148].mxu1 }
 0x7b2   : > { %v9474_v32 = vadd.f32 %v8978_v59, %v7783_v56  ;;  %v7689_v60 = vpop.f32.mrb[149].mxu1 }
 0x7b3   : > { %v9475_v18 = vadd.f32 %v7783_v56, %v7689_v60 }
 0x7b4   : > { %7716 = vst.msk [vmem:[%s278_s9 + $0x28] sm:$0xff] %vm291_vm0, %v9474_v32 }
 0x7b5   : > { %7715 = vst.msk [vmem:[%s278_s9 + $0x20] sm:$0xff] %vm291_vm0, %v9475_v18  ;;  %v8981_v24 = vpop.f32.mrb[150].mxu1 }
 0x7b6   : > { %v9476_v22 = vadd.f32 %v8981_v24, %v7783_v56  ;;  %v7701_v55 = vpop.f32.mrb[151].mxu1 }
 0x7b7   : > { %v9477_v40 = vadd.f32 %v7783_v56, %v7701_v55 }
 0x7b8   : > { %7718 = vst.msk [vmem:[%s278_s9 + $0x38] sm:$0xff] %vm291_vm0, %v9476_v22 }
 0x7b9   : > { %7717 = vst.msk [vmem:[%s278_s9 + $0x30] sm:$0xff] %vm291_vm0, %v9477_v40 }
 0x7ba PF: > { %s17_s24 = sadd.s32 1, %s9867_s24  }
 0x7bb   : > { %p14_p4 = scmp.ge.s32.totalorder %s17_s24, 4  }
 0x7bd   :  { %16 = sbr.rel (!%p14_p4) target bundleno = 1 (0x1), region = 78 }

</bundles_post_ra>
